<compile_context>
chip_gen: v6e
topology: v6e:2x2x1
jax: 0.10.0
libtpu: 0.0.40
codegen_flags: <defaults>
</compile_context>

<pallas_src>
import functools

import jax
import jax.numpy as jnp
from jax.experimental import pallas as pl
from jax.experimental.pallas import tpu as pltpu

_TM = 512                # row tile for matmul-style kernels (mem-bound; 512 ~ 85% of HBM roofline)
_POOL_VMEM = 2 << 20     # ~2 MiB per pool input block; safe even on v7x's 64 MiB VMEM


# ---------------------------------------------------------------------------
# tile helpers
# ---------------------------------------------------------------------------
def _conv_row_tile(m, target=_TM):
    """Row tile for (rows, C) kernels: full array, or a multiple-of-8 divisor of m,
    else fall back to padding (avoids XLA pad/slice copies in the common case)."""
    if m <= target:
        return m, m                       # single full block
    for t in range(target, 7, -8):        # multiples of 8 descending
        if m % t == 0:
            return t, m
    mp = ((m + target - 1) // target) * target
    return target, mp


def _pool_row_tile(rows, wo, c, itemsize):
    """Largest divisor of rows whose (tr, 2, wo, 2c) block stays under the VMEM budget."""
    target = max(1, _POOL_VMEM // max(1, 2 * wo * 2 * c * itemsize))
    t = max(1, min(rows, target))
    while rows % t:
        t -= 1
    return t


def _row_group(total_groups, rows_per_group, target=_TM):
    """Number of low-res image rows per grid step: largest divisor of total_groups
    keeping ~target matmul rows per block."""
    gl = max(1, min(total_groups, target // max(1, rows_per_group)))
    while total_groups % gl:
        gl -= 1
    return gl


# ---------------------------------------------------------------------------
# Pallas kernels
# ---------------------------------------------------------------------------
def _pw_conv_kernel(x_ref, w_ref, b_ref, o_ref, *, relu):
    """Fused pointwise conv tile: bf16 (TM,Cin)@(Cin,Cout) -> f32 acc + bias (+ReLU)."""
    acc = jnp.dot(x_ref[...], w_ref[...], preferred_element_type=jnp.float32)
    acc = acc + b_ref[...]
    if relu:
        acc = jnp.maximum(acc, 0.0)
    o_ref[...] = acc.astype(o_ref.dtype)


def _enc_fused_kernel(x_ref, w_ref, b_ref, f_ref, p_ref, *, gl, wo):
    """Fused encoder stage on a lane-interleaved (rows, 2*Cin) tile:
    relu(x@W+b) for both W-phases -> full-res feature (skip) AND its 2x2 max-pool."""
    cin = x_ref.shape[-1] // 2
    cout = w_ref.shape[-1]
    x = x_ref[...]
    w = w_ref[...]
    b = b_ref[...]
    a0 = jnp.maximum(jnp.dot(x[:, :cin], w, preferred_element_type=jnp.float32) + b, 0.0)
    a1 = jnp.maximum(jnp.dot(x[:, cin:], w, preferred_element_type=jnp.float32) + b, 0.0)
    f_ref[...] = jnp.concatenate([a0.astype(f_ref.dtype), a1.astype(f_ref.dtype)], axis=-1)
    m = jnp.maximum(a0, a1).reshape(gl, 2, wo, cout)     # W-phase pooled, tile-aligned split
    p = jnp.maximum(m[:, 0], m[:, 1])                    # H-phase pooled: (gl, wo, cout)
    p_ref[...] = p.reshape(gl * wo, cout).astype(p_ref.dtype)


def _enc_pool_kernel(x_ref, w_ref, b_ref, p_ref, *, gl, wo):
    """Encoder stage for classification mode: conv+ReLU+pool, pooled output only
    (the full-res feature is never written to HBM)."""
    cin = x_ref.shape[-1] // 2
    cout = w_ref.shape[-1]
    x = x_ref[...]
    w = w_ref[...]
    b = b_ref[...]
    a0 = jnp.maximum(jnp.dot(x[:, :cin], w, preferred_element_type=jnp.float32) + b, 0.0)
    a1 = jnp.maximum(jnp.dot(x[:, cin:], w, preferred_element_type=jnp.float32) + b, 0.0)
    m = jnp.maximum(a0, a1).reshape(gl, 2, wo, cout)
    p = jnp.maximum(m[:, 0], m[:, 1])
    p_ref[...] = p.reshape(gl * wo, cout).astype(p_ref.dtype)


def _dec_fused_kernel(s_ref, y_ref, w_ref, o_ref, *, gl, wo):
    """Fused decoder stage: relu(skip @ W_skip + nearest_up2x(y_low)) with the
    nearest upsample done in-register (y_low already carries the deep conv + bias)."""
    cs = y_ref.shape[-1]
    s = s_ref[...]                                        # (2*gl*wo, 2*cs)
    w = w_ref[...]
    y = y_ref[...].astype(jnp.float32).reshape(gl, 1, wo, cs)   # low-res deep path
    a0 = jnp.dot(s[:, :cs], w, preferred_element_type=jnp.float32).reshape(gl, 2, wo, cs)
    a1 = jnp.dot(s[:, cs:], w, preferred_element_type=jnp.float32).reshape(gl, 2, wo, cs)
    a0 = jnp.maximum(a0 + y, 0.0).astype(o_ref.dtype)     # y broadcasts over the H-phase
    a1 = jnp.maximum(a1 + y, 0.0).astype(o_ref.dtype)
    o = jnp.concatenate([a0, a1], axis=-1)                # (gl, 2, wo, 2*cs)
    o_ref[...] = o.reshape(gl * 2 * wo, 2 * cs)


def _skip_add_kernel(s_ref, y_ref, w_ref, o_ref):
    """Fallback decoder stage: relu(skip @ W_skip + upsampled_deep) -- concat-free."""
    acc = jnp.dot(s_ref[...], w_ref[...], preferred_element_type=jnp.float32)
    acc = acc + y_ref[...].astype(jnp.float32)
    o_ref[...] = jnp.maximum(acc, 0.0).astype(o_ref.dtype)


def _pool_kernel(x_ref, o_ref):
    """Fallback 2x2 max pool on a (TR, 2, Wo, 2C) tile of the free (N*Ho, 2, Wo, 2C) view."""
    c = o_ref.shape[-1]
    v = jnp.max(x_ref[...], axis=1)                      # (TR, Wo, 2C)
    o_ref[...] = jnp.maximum(v[..., :c], v[..., c:])     # (TR, Wo, C)


# ---------------------------------------------------------------------------
# Pallas wrappers
# ---------------------------------------------------------------------------
def pointwise_conv(x_nhwc, w, b, *, relu, out_dtype=jnp.bfloat16):
    """1x1 conv + bias (+ReLU) over NHWC via a tiled Pallas matmul (bf16 in, f32 acc)."""
    n, h, wd, cin = x_nhwc.shape
    cout = w.shape[-1]
    m = n * h * wd
    xf = x_nhwc.reshape(m, cin).astype(jnp.bfloat16)
    wb = w.astype(jnp.bfloat16)
    b2 = b.reshape(1, cout).astype(jnp.float32)
    tm, mp = _conv_row_tile(m)
    if mp != m:
        xf = jnp.pad(xf, ((0, mp - m), (0, 0)))

    out = pl.pallas_call(
        functools.partial(_pw_conv_kernel, relu=relu),
        out_shape=jax.ShapeDtypeStruct((mp, cout), out_dtype),
        grid=(mp // tm,),
        in_specs=[
            pl.BlockSpec((tm, cin), lambda i: (i, 0)),
            pl.BlockSpec((cin, cout), lambda i: (0, 0)),
            pl.BlockSpec((1, cout), lambda i: (0, 0)),
        ],
        out_specs=pl.BlockSpec((tm, cout), lambda i: (i, 0)),
        compiler_params=pltpu.CompilerParams(dimension_semantics=("parallel",)),
    )(xf, wb, b2)
    if mp != m:
        out = out[:m]
    return out.reshape(n, h, wd, cout)


def maxpool2x2(x_nhwc):
    """Fallback 2x2 / stride-2 max pool (only used when the fused stage can't run)."""
    n, h, w, c = x_nhwc.shape
    ho, wo = h // 2, w // 2
    rows = n * ho
    xv = x_nhwc.reshape(rows, 2, wo, 2 * c)
    tr = _pool_row_tile(rows, wo, c, xv.dtype.itemsize)

    out = pl.pallas_call(
        _pool_kernel,
        out_shape=jax.ShapeDtypeStruct((rows, wo, c), x_nhwc.dtype),
        grid=(rows // tr,),
        in_specs=[pl.BlockSpec((tr, 2, wo, 2 * c), lambda i: (i, 0, 0, 0))],
        out_specs=pl.BlockSpec((tr, wo, c), lambda i: (i, 0, 0)),
        compiler_params=pltpu.CompilerParams(dimension_semantics=("parallel",)),
    )(xv)
    return out.reshape(n, ho, wo, c)


def skip_conv_add(skip_nhwc, yup_nhwc, w_skip):
    """Fallback decoder stage: relu(skip @ W_skip + y_up), y_up already carries bias."""
    n, h, wd, cs = skip_nhwc.shape
    m = n * h * wd
    sf = skip_nhwc.reshape(m, cs).astype(jnp.bfloat16)
    yf = yup_nhwc.reshape(m, cs).astype(jnp.bfloat16)
    wb = w_skip.astype(jnp.bfloat16)
    tm, mp = _conv_row_tile(m)
    if mp != m:
        sf = jnp.pad(sf, ((0, mp - m), (0, 0)))
        yf = jnp.pad(yf, ((0, mp - m), (0, 0)))

    out = pl.pallas_call(
        _skip_add_kernel,
        out_shape=jax.ShapeDtypeStruct((mp, cs), jnp.bfloat16),
        grid=(mp // tm,),
        in_specs=[
            pl.BlockSpec((tm, cs), lambda i: (i, 0)),
            pl.BlockSpec((tm, cs), lambda i: (i, 0)),
            pl.BlockSpec((cs, cs), lambda i: (0, 0)),
        ],
        out_specs=pl.BlockSpec((tm, cs), lambda i: (i, 0)),
        compiler_params=pltpu.CompilerParams(dimension_semantics=("parallel",)),
    )(sf, yf, wb)
    if mp != m:
        out = out[:m]
    return out.reshape(n, h, wd, cs)


def upsample2x(x_nhwc):
    """Nearest-neighbor 2x upsample (fallback XLA glue; fused under jit)."""
    return jnp.repeat(jnp.repeat(x_nhwc, 2, axis=1), 2, axis=2)


def encoder_stage_fused(x_nhwc, w, b, *, want_feature=True):
    """One encoder stage: relu(1x1 conv) full-res feature + its 2x2 max-pool in a
    single HBM pass.  Falls back to separate kernels when Wo % 8 != 0."""
    n, h, wd, cin = x_nhwc.shape
    cout = w.shape[-1]
    ho, wo = h // 2, wd // 2
    if (h % 2) or (wd % 2) or (wo % 8):
        f = pointwise_conv(x_nhwc, w, b, relu=True)
        p = maxpool2x2(f)
        return (f if want_feature else None), p

    xf = x_nhwc.reshape(n * h * wo, 2 * cin).astype(jnp.bfloat16)
    wb = w.astype(jnp.bfloat16)
    b2 = b.reshape(1, cout).astype(jnp.float32)
    gl = _row_group(n * ho, 2 * wo)
    rb, pb = gl * 2 * wo, gl * wo
    grid = ((n * ho) // gl,)
    in_specs = [
        pl.BlockSpec((rb, 2 * cin), lambda i: (i, 0)),
        pl.BlockSpec((cin, cout), lambda i: (0, 0)),
        pl.BlockSpec((1, cout), lambda i: (0, 0)),
    ]
    cp = pltpu.CompilerParams(dimension_semantics=("parallel",))

    if want_feature:
        f_flat, p_flat = pl.pallas_call(
            functools.partial(_enc_fused_kernel, gl=gl, wo=wo),
            out_shape=(jax.ShapeDtypeStruct((n * h * wo, 2 * cout), jnp.bfloat16),
                       jax.ShapeDtypeStruct((n * ho * wo, cout), jnp.bfloat16)),
            grid=grid,
            in_specs=in_specs,
            out_specs=(pl.BlockSpec((rb, 2 * cout), lambda i: (i, 0)),
                       pl.BlockSpec((pb, cout), lambda i: (i, 0))),
            compiler_params=cp,
        )(xf, wb, b2)
        return f_flat.reshape(n, h, wd, cout), p_flat.reshape(n, ho, wo, cout)

    p_flat = pl.pallas_call(
        functools.partial(_enc_pool_kernel, gl=gl, wo=wo),
        out_shape=jax.ShapeDtypeStruct((n * ho * wo, cout), jnp.bfloat16),
        grid=grid,
        in_specs=in_specs,
        out_specs=pl.BlockSpec((pb, cout), lambda i: (i, 0)),
        compiler_params=cp,
    )(xf, wb, b2)
    return None, p_flat.reshape(n, ho, wo, cout)


def decoder_stage_fused(skip_nhwc, y_low_nhwc, w_skip):
    """One decoder stage: relu(skip @ W_skip + nearest_up2x(y_low)) in one HBM pass
    (no y_up tensor).  Falls back to the separate upsample + add kernel if Wo % 8 != 0."""
    n, h, wd, cs = skip_nhwc.shape
    ho, wo = h // 2, wd // 2
    if (h % 2) or (wd % 2) or (wo % 8):
        return skip_conv_add(skip_nhwc, upsample2x(y_low_nhwc), w_skip)

    sf = skip_nhwc.reshape(n * h * wo, 2 * cs).astype(jnp.bfloat16)
    yf = y_low_nhwc.reshape(n * ho * wo, cs).astype(jnp.bfloat16)
    wb = w_skip.astype(jnp.bfloat16)
    gl = _row_group(n * ho, 2 * wo)
    rb, yb = gl * 2 * wo, gl * wo
    out = pl.pallas_call(
        functools.partial(_dec_fused_kernel, gl=gl, wo=wo),
        out_shape=jax.ShapeDtypeStruct((n * h * wo, 2 * cs), jnp.bfloat16),
        grid=((n * ho) // gl,),
        in_specs=[
            pl.BlockSpec((rb, 2 * cs), lambda i: (i, 0)),
            pl.BlockSpec((yb, cs), lambda i: (i, 0)),
            pl.BlockSpec((cs, cs), lambda i: (0, 0)),
        ],
        out_specs=pl.BlockSpec((rb, 2 * cs), lambda i: (i, 0)),
        compiler_params=pltpu.CompilerParams(dimension_semantics=("parallel",)),
    )(sf, yf, wb)
    return out.reshape(n, h, wd, cs)


# ---------------------------------------------------------------------------
# SegOne model (encoder + decoder) in JAX, hot paths in Pallas
# ---------------------------------------------------------------------------
class SegOneJAX:
    model_types = {"SEGONE": ("segmentation", "classification"),
                   "ONENET": ("segmentation", "classification")}

    def __init__(self, opts, key):
        assert opts["name"] in self.model_types
        assert opts["type"] in self.model_types[opts["name"]]
        self.opts = opts

        chans = list(opts["channels"])           # encoder channel schedule
        c_in = opts["in_channels"]
        n_cls = opts["num_classes"]
        self.chans = chans

        def init_linear(k, cin, cout):
            kw, kb = jax.random.split(k)
            scale = 1.0 / jnp.sqrt(jnp.float32(cin))
            w = jax.random.normal(kw, (cin, cout), jnp.float32) * scale
            b = jax.random.normal(kb, (cout,), jnp.float32) * 0.01
            return w, b

        n_enc = len(chans)
        n_dec = len(chans) - 1
        keys = jax.random.split(key, n_enc + n_dec + 1)

        # encoder stage weights
        enc_in = [c_in] + chans[:-1]
        enc = [init_linear(keys[i], enc_in[i], chans[i]) for i in range(n_enc)]

        # decoder stage weights: the conv over concat([deep, skip]) is split into
        # its deep / skip halves so the concat never materializes.
        dec = []
        for j in range(n_dec):
            deep_c = chans[-1 - j]
            skip_c = chans[-2 - j]
            w, b = init_linear(keys[n_enc + j], deep_c + skip_c, skip_c)
            dec.append((w[:deep_c], w[deep_c:], b))

        head_in = chans[0] if opts["type"] == "segmentation" else chans[-1]
        head = init_linear(keys[-1], head_in, n_cls)

        self.params = {"enc": enc, "dec": dec, "head": head}
        self._forward = jax.jit(self._forward_impl)

    # ---- encoder ----
    def _encoder(self, params, x_nhwc, *, want_skips):
        feats = []
        x = x_nhwc
        n_stage = len(params["enc"])
        for i, (w, b) in enumerate(params["enc"]):
            if i < n_stage - 1:
                f, x = encoder_stage_fused(x, w, b, want_feature=want_skips)
                feats.append(f)                   # pre-pool features feed the skips
            else:
                x = pointwise_conv(x, w, b, relu=True)
                feats.append(x)
        return feats

    # ---- decoder ----
    def _decoder(self, params, feats):
        if self.opts["type"] == "classification":
            # GAP + linear head: tiny matmul, plain XLA is faster than a padded kernel.
            d = feats[-1].astype(jnp.float32)
            pooled = jnp.mean(d, axis=(1, 2))                   # (N, C)
            w, b = params["head"]
            return pooled @ w + b                               # (N, n_cls)

        # segmentation decoder with skip connections (concat-free, upsample fused)
        d = feats[-1]
        for j, (w_deep, w_skip, b) in enumerate(params["dec"]):
            # deep-path 1x1 conv at LOW resolution (commutes with nearest upsample):
            #   relu(up(d)@Wd + skip@Ws + b) == relu(skip@Ws + up(d@Wd + b))
            y = pointwise_conv(d, w_deep, b, relu=False)
            skip = feats[-2 - j]
            d = decoder_stage_fused(skip, y, w_skip)
        hw, hb = params["head"]
        return pointwise_conv(d, hw, hb, relu=False, out_dtype=jnp.float32)

    def _forward_impl(self, params, x_nchw):
        # NCHW (PyTorch) -> NHWC (kernel layout)
        x = jnp.transpose(x_nchw, (0, 2, 3, 1))
        want_skips = self.opts["type"] == "segmentation"
        feats = self._encoder(params, x, want_skips=want_skips)
        out = self._decoder(params, feats)
        if self.opts["type"] == "segmentation":
            out = jnp.transpose(out, (0, 3, 1, 2))              # back to NCHW
        return out

    def forward(self, x_nchw):
        return self._forward(self.params, x_nchw)

    __call__ = forward


# ---------------------------------------------------------------------------
# Demo / smoke test
# ---------------------------------------------------------------------------
if __name__ == "__main__":
    opts = {
        "name": "SEGONE",
        "type": "segmentation",
        "in_channels": 4,
        "num_classes": 3,
        "channels": [16, 32, 64],
    }

    key = jax.random.PRNGKey(0)
    x = jax.random.normal(key, (2, 4, 16, 16), jnp.float32)      # NCHW input

    model = SegOneJAX(opts, key=jax.random.PRNGKey(42))
    out = jax.block_until_ready(model(x))
    expected = (2, opts["num_classes"], 16, 16)
    assert out.shape == expected, (out.shape, expected)
    assert out.dtype == jnp.float32
    assert bool(jnp.all(jnp.isfinite(out)))

    # classification head path (GAP + linear, same Pallas encoder, pool-only stages)
    cls_opts = dict(opts, type="classification")
    cls_model = SegOneJAX(cls_opts, key=jax.random.PRNGKey(7))
    logits = jax.block_until_ready(cls_model(x))
    assert logits.shape == (2, opts["num_classes"])
    assert bool(jnp.all(jnp.isfinite(logits)))

    print("KERNEL_OK")
</pallas_src>

<mosaic_0001>
module attributes {stable_mosaic.version = 11 : i64} {
  func.func @_pw_conv_kernel(%arg0: i32, %arg1: memref<128x16xbf16, #tpu.memory_space<vmem>>, %arg2: memref<16x32xbf16, #tpu.memory_space<vmem>>, %arg3: memref<1x32xf32, #tpu.memory_space<vmem>>, %arg4: memref<128x32xbf16, #tpu.memory_space<vmem>>) attributes {dimension_semantics = [#tpu.dimension_semantics<parallel>], iteration_bounds = array<i64: 1>, scalar_prefetch = 0 : i64, scratch_operands = 0 : i64, tpu.core_type = #tpu.core_type<tc>, window_params = [{transform_indices = @transform_0, window_bounds = array<i64: 128, 16>}, {pipeline_mode = #tpu.pipeline_mode<synchronous>, transform_indices = @transform_1, window_bounds = array<i64: 16, 32>}, {pipeline_mode = #tpu.pipeline_mode<synchronous>, transform_indices = @transform_2, window_bounds = array<i64: 1, 32>}, {transform_indices = @transform_3, window_bounds = array<i64: 128, 32>}]} {
    %c0 = arith.constant 0 : index
    %c0_0 = arith.constant 0 : index
    %0 = vector.load %arg1[%c0, %c0_0] : memref<128x16xbf16, #tpu.memory_space<vmem>>, vector<128x16xbf16>
    %c0_1 = arith.constant 0 : index
    %c0_2 = arith.constant 0 : index
    %1 = vector.load %arg2[%c0_1, %c0_2] : memref<16x32xbf16, #tpu.memory_space<vmem>>, vector<16x32xbf16>
    %cst = arith.constant dense<0.000000e+00> : vector<128x32xf32>
    %2 = tpu.matmul %0, %1, %cst {dimension_numbers = #tpu.dot_dimension_numbers<[1], [0], [0], [1], [0, 0, 1, 1], [], []>} : vector<128x16xbf16>, vector<16x32xbf16>, vector<128x32xf32> -> vector<128x32xf32>
    %c0_3 = arith.constant 0 : index
    %c0_4 = arith.constant 0 : index
    %3 = vector.load %arg3[%c0_3, %c0_4] : memref<1x32xf32, #tpu.memory_space<vmem>>, vector<1x32xf32>
    %4 = vector.broadcast %3 : vector<1x32xf32> to vector<128x32xf32>
    %5 = arith.addf %2, %4 : vector<128x32xf32>
    %cst_5 = arith.constant 0.000000e+00 : f32
    %6 = vector.broadcast %cst_5 : f32 to vector<128x32xf32>
    %7 = arith.maximumf %5, %6 : vector<128x32xf32>
    %8 = arith.truncf %7 : vector<128x32xf32> to vector<128x32xbf16>
    %c0_6 = arith.constant 0 : index
    %c0_7 = arith.constant 0 : index
    %9 = vector.load %arg4[%c0_6, %c0_7] : memref<128x32xbf16, #tpu.memory_space<vmem>>, vector<128x32xbf16>
    tpu.vector_store %arg4[%c0_6, %c0_7], %8 {strides = array<i32>} : memref<128x32xbf16, #tpu.memory_space<vmem>>, vector<128x32xbf16>,
    return
  }
  func.func @transform_0(%arg0: i32) -> (i32, i32) {
    %c0_i32 = arith.constant 0 : i32
    %c0_i32_0 = arith.constant 0 : i32
    return %arg0, %c0_i32 : i32, i32
  }
  func.func @transform_1(%arg0: i32) -> (i32, i32) {
    %c0_i32 = arith.constant 0 : i32
    %c0_i32_0 = arith.constant 0 : i32
    %c0_i32_1 = arith.constant 0 : i32
    return %c0_i32, %c0_i32_0 : i32, i32
  }
  func.func @transform_2(%arg0: i32) -> (i32, i32) {
    %c0_i32 = arith.constant 0 : i32
    %c0_i32_0 = arith.constant 0 : i32
    %c0_i32_1 = arith.constant 0 : i32
    return %c0_i32, %c0_i32_0 : i32, i32
  }
  func.func @transform_3(%arg0: i32) -> (i32, i32) {
    %c0_i32 = arith.constant 0 : i32
    %c0_i32_0 = arith.constant 0 : i32
    return %arg0, %c0_i32 : i32, i32
  }
}

module attributes {stable_mosaic.version = 11 : i64} {
  func.func @_enc_fused_kernel(%arg0: i32, %arg1: memref<256x8xbf16, #tpu.memory_space<vmem>>, %arg2: memref<4x16xbf16, #tpu.memory_space<vmem>>, %arg3: memref<1x16xf32, #tpu.memory_space<vmem>>, %arg4: memref<256x32xbf16, #tpu.memory_space<vmem>>, %arg5: memref<128x16xbf16, #tpu.memory_space<vmem>>) attributes {dimension_semantics = [#tpu.dimension_semantics<parallel>], iteration_bounds = array<i64: 1>, scalar_prefetch = 0 : i64, scratch_operands = 0 : i64, tpu.core_type = #tpu.core_type<tc>, window_params = [{transform_indices = @transform_0, window_bounds = array<i64: 256, 8>}, {pipeline_mode = #tpu.pipeline_mode<synchronous>, transform_indices = @transform_1, window_bounds = array<i64: 4, 16>}, {pipeline_mode = #tpu.pipeline_mode<synchronous>, transform_indices = @transform_2, window_bounds = array<i64: 1, 16>}, {transform_indices = @transform_3, window_bounds = array<i64: 256, 32>}, {transform_indices = @transform_4, window_bounds = array<i64: 128, 16>}]} {
    %c0 = arith.constant 0 : index
    %c0_0 = arith.constant 0 : index
    %0 = vector.load %arg1[%c0, %c0_0] : memref<256x8xbf16, #tpu.memory_space<vmem>>, vector<256x8xbf16>
    %c0_1 = arith.constant 0 : index
    %c0_2 = arith.constant 0 : index
    %1 = vector.load %arg2[%c0_1, %c0_2] : memref<4x16xbf16, #tpu.memory_space<vmem>>, vector<4x16xbf16>
    %c0_3 = arith.constant 0 : index
    %c0_4 = arith.constant 0 : index
    %2 = vector.load %arg3[%c0_3, %c0_4] : memref<1x16xf32, #tpu.memory_space<vmem>>, vector<1x16xf32>
    %3 = vector.extract_strided_slice %0 {offsets = [0, 0], sizes = [256, 4], strides = [1, 1]} : vector<256x8xbf16> to vector<256x4xbf16>
    %cst = arith.constant dense<0.000000e+00> : vector<256x16xf32>
    %4 = tpu.matmul %3, %1, %cst {dimension_numbers = #tpu.dot_dimension_numbers<[1], [0], [0], [1], [0, 0, 1, 1], [], []>} : vector<256x4xbf16>, vector<4x16xbf16>, vector<256x16xf32> -> vector<256x16xf32>
    %5 = vector.broadcast %2 : vector<1x16xf32> to vector<256x16xf32>
    %6 = arith.addf %4, %5 : vector<256x16xf32>
    %cst_5 = arith.constant 0.000000e+00 : f32
    %7 = vector.broadcast %cst_5 : f32 to vector<256x16xf32>
    %8 = arith.maximumf %6, %7 : vector<256x16xf32>
    %9 = vector.extract_strided_slice %0 {offsets = [0, 4], sizes = [256, 4], strides = [1, 1]} : vector<256x8xbf16> to vector<256x4xbf16>
    %cst_6 = arith.constant dense<0.000000e+00> : vector<256x16xf32>
    %10 = tpu.matmul %9, %1, %cst_6 {dimension_numbers = #tpu.dot_dimension_numbers<[1], [0], [0], [1], [0, 0, 1, 1], [], []>} : vector<256x4xbf16>, vector<4x16xbf16>, vector<256x16xf32> -> vector<256x16xf32>
    %11 = vector.broadcast %2 : vector<1x16xf32> to vector<256x16xf32>
    %12 = arith.addf %10, %11 : vector<256x16xf32>
    %cst_7 = arith.constant 0.000000e+00 : f32
    %13 = vector.broadcast %cst_7 : f32 to vector<256x16xf32>
    %14 = arith.maximumf %12, %13 : vector<256x16xf32>
    %15 = arith.truncf %8 : vector<256x16xf32> to vector<256x16xbf16>
    %16 = arith.truncf %14 : vector<256x16xf32> to vector<256x16xbf16>
    %17 = tpu.concatenate %15, %16 in 1 : vector<256x16xbf16>, vector<256x16xbf16> -> vector<256x32xbf16>
    %c0_8 = arith.constant 0 : index
    %c0_9 = arith.constant 0 : index
    %18 = vector.load %arg4[%c0_8, %c0_9] : memref<256x32xbf16, #tpu.memory_space<vmem>>, vector<256x32xbf16>
    tpu.vector_store %arg4[%c0_8, %c0_9], %17 {strides = array<i32>} : memref<256x32xbf16, #tpu.memory_space<vmem>>, vector<256x32xbf16>,
    %19 = arith.maximumf %8, %14 : vector<256x16xf32>
    %20 = vector.shape_cast %19 : vector<256x16xf32> to vector<16x2x8x16xf32>
    %21 = vector.extract_strided_slice %20 {offsets = [0, 0, 0, 0], sizes = [16, 1, 8, 16], strides = [1, 1, 1, 1]} : vector<16x2x8x16xf32> to vector<16x1x8x16xf32>
    %22 = vector.shape_cast %21 : vector<16x1x8x16xf32> to vector<16x8x16xf32>
    %23 = vector.extract_strided_slice %20 {offsets = [0, 1, 0, 0], sizes = [16, 1, 8, 16], strides = [1, 1, 1, 1]} : vector<16x2x8x16xf32> to vector<16x1x8x16xf32>
    %24 = vector.shape_cast %23 : vector<16x1x8x16xf32> to vector<16x8x16xf32>
    %25 = arith.maximumf %22, %24 : vector<16x8x16xf32>
    %26 = vector.shape_cast %25 : vector<16x8x16xf32> to vector<128x16xf32>
    %27 = arith.truncf %26 : vector<128x16xf32> to vector<128x16xbf16>
    %c0_10 = arith.constant 0 : index
    %c0_11 = arith.constant 0 : index
    %28 = vector.load %arg5[%c0_10, %c0_11] : memref<128x16xbf16, #tpu.memory_space<vmem>>, vector<128x16xbf16>
    tpu.vector_store %arg5[%c0_10, %c0_11], %27 {strides = array<i32>} : memref<128x16xbf16, #tpu.memory_space<vmem>>, vector<128x16xbf16>,
    return
  }
  func.func @transform_0(%arg0: i32) -> (i32, i32) {
    %c0_i32 = arith.constant 0 : i32
    %c0_i32_0 = arith.constant 0 : i32
    return %arg0, %c0_i32 : i32, i32
  }
  func.func @transform_1(%arg0: i32) -> (i32, i32) {
    %c0_i32 = arith.constant 0 : i32
    %c0_i32_0 = arith.constant 0 : i32
    %c0_i32_1 = arith.constant 0 : i32
    return %c0_i32, %c0_i32_0 : i32, i32
  }
  func.func @transform_2(%arg0: i32) -> (i32, i32) {
    %c0_i32 = arith.constant 0 : i32
    %c0_i32_0 = arith.constant 0 : i32
    %c0_i32_1 = arith.constant 0 : i32
    return %c0_i32, %c0_i32_0 : i32, i32
  }
  func.func @transform_3(%arg0: i32) -> (i32, i32) {
    %c0_i32 = arith.constant 0 : i32
    %c0_i32_0 = arith.constant 0 : i32
    return %arg0, %c0_i32 : i32, i32
  }
  func.func @transform_4(%arg0: i32) -> (i32, i32) {
    %c0_i32 = arith.constant 0 : i32
    %c0_i32_0 = arith.constant 0 : i32
    return %arg0, %c0_i32 : i32, i32
  }
}

module attributes {stable_mosaic.version = 11 : i64} {
  func.func @_pool_kernel(%arg0: i32, %arg1: memref<8x2x4x64xbf16, #tpu.memory_space<vmem>>, %arg2: memref<8x4x32xbf16, #tpu.memory_space<vmem>>) attributes {dimension_semantics = [#tpu.dimension_semantics<parallel>], iteration_bounds = array<i64: 1>, scalar_prefetch = 0 : i64, scratch_operands = 0 : i64, tpu.core_type = #tpu.core_type<tc>, window_params = [{transform_indices = @transform_0, window_bounds = array<i64: 8, 2, 4, 64>}, {transform_indices = @transform_1, window_bounds = array<i64: 8, 4, 32>}]} {
    %c0 = arith.constant 0 : index
    %c0_0 = arith.constant 0 : index
    %c0_1 = arith.constant 0 : index
    %c0_2 = arith.constant 0 : index
    %0 = vector.load %arg1[%c0, %c0_0, %c0_1, %c0_2] : memref<8x2x4x64xbf16, #tpu.memory_space<vmem>>, vector<8x2x4x64xbf16>
    %cst = arith.constant dense<0xFF80> : vector<8x4x64xbf16>
    %1 = vector.multi_reduction <maximumf>, %0, %cst [1] : vector<8x2x4x64xbf16> to vector<8x4x64xbf16>
    %2 = vector.extract_strided_slice %1 {offsets = [0, 0, 0], sizes = [8, 4, 32], strides = [1, 1, 1]} : vector<8x4x64xbf16> to vector<8x4x32xbf16>
    %3 = vector.extract_strided_slice %1 {offsets = [0, 0, 32], sizes = [8, 4, 32], strides = [1, 1, 1]} : vector<8x4x64xbf16> to vector<8x4x32xbf16>
    %4 = arith.maximumf %2, %3 : vector<8x4x32xbf16>
    %c0_3 = arith.constant 0 : index
    %c0_4 = arith.constant 0 : index
    %c0_5 = arith.constant 0 : index
    %5 = vector.load %arg2[%c0_3, %c0_4, %c0_5] : memref<8x4x32xbf16, #tpu.memory_space<vmem>>, vector<8x4x32xbf16>
    tpu.vector_store %arg2[%c0_3, %c0_4, %c0_5], %4 {strides = array<i32>} : memref<8x4x32xbf16, #tpu.memory_space<vmem>>, vector<8x4x32xbf16>,
    return
  }
  func.func @transform_0(%arg0: i32) -> (i32, i32, i32, i32) {
    %c0_i32 = arith.constant 0 : i32
    %c0_i32_0 = arith.constant 0 : i32
    %c0_i32_1 = arith.constant 0 : i32
    %c0_i32_2 = arith.constant 0 : i32
    return %arg0, %c0_i32, %c0_i32_0, %c0_i32_1 : i32, i32, i32, i32
  }
  func.func @transform_1(%arg0: i32) -> (i32, i32, i32) {
    %c0_i32 = arith.constant 0 : i32
    %c0_i32_0 = arith.constant 0 : i32
    %c0_i32_1 = arith.constant 0 : i32
    return %arg0, %c0_i32, %c0_i32_0 : i32, i32, i32
  }
}

module attributes {stable_mosaic.version = 11 : i64} {
  func.func @_pw_conv_kernel(%arg0: i32, %arg1: memref<32x32xbf16, #tpu.memory_space<vmem>>, %arg2: memref<32x64xbf16, #tpu.memory_space<vmem>>, %arg3: memref<1x64xf32, #tpu.memory_space<vmem>>, %arg4: memref<32x64xbf16, #tpu.memory_space<vmem>>) attributes {dimension_semantics = [#tpu.dimension_semantics<parallel>], iteration_bounds = array<i64: 1>, scalar_prefetch = 0 : i64, scratch_operands = 0 : i64, tpu.core_type = #tpu.core_type<tc>, window_params = [{transform_indices = @transform_0, window_bounds = array<i64: 32, 32>}, {pipeline_mode = #tpu.pipeline_mode<synchronous>, transform_indices = @transform_1, window_bounds = array<i64: 32, 64>}, {pipeline_mode = #tpu.pipeline_mode<synchronous>, transform_indices = @transform_2, window_bounds = array<i64: 1, 64>}, {transform_indices = @transform_3, window_bounds = array<i64: 32, 64>}]} {
    %c0 = arith.constant 0 : index
    %c0_0 = arith.constant 0 : index
    %0 = vector.load %arg1[%c0, %c0_0] : memref<32x32xbf16, #tpu.memory_space<vmem>>, vector<32x32xbf16>
    %c0_1 = arith.constant 0 : index
    %c0_2 = arith.constant 0 : index
    %1 = vector.load %arg2[%c0_1, %c0_2] : memref<32x64xbf16, #tpu.memory_space<vmem>>, vector<32x64xbf16>
    %cst = arith.constant dense<0.000000e+00> : vector<32x64xf32>
    %2 = tpu.matmul %0, %1, %cst {dimension_numbers = #tpu.dot_dimension_numbers<[1], [0], [0], [1], [0, 0, 1, 1], [], []>} : vector<32x32xbf16>, vector<32x64xbf16>, vector<32x64xf32> -> vector<32x64xf32>
    %c0_3 = arith.constant 0 : index
    %c0_4 = arith.constant 0 : index
    %3 = vector.load %arg3[%c0_3, %c0_4] : memref<1x64xf32, #tpu.memory_space<vmem>>, vector<1x64xf32>
    %4 = vector.broadcast %3 : vector<1x64xf32> to vector<32x64xf32>
    %5 = arith.addf %2, %4 : vector<32x64xf32>
    %cst_5 = arith.constant 0.000000e+00 : f32
    %6 = vector.broadcast %cst_5 : f32 to vector<32x64xf32>
    %7 = arith.maximumf %5, %6 : vector<32x64xf32>
    %8 = arith.truncf %7 : vector<32x64xf32> to vector<32x64xbf16>
    %c0_6 = arith.constant 0 : index
    %c0_7 = arith.constant 0 : index
    %9 = vector.load %arg4[%c0_6, %c0_7] : memref<32x64xbf16, #tpu.memory_space<vmem>>, vector<32x64xbf16>
    tpu.vector_store %arg4[%c0_6, %c0_7], %8 {strides = array<i32>} : memref<32x64xbf16, #tpu.memory_space<vmem>>, vector<32x64xbf16>,
    return
  }
  func.func @transform_0(%arg0: i32) -> (i32, i32) {
    %c0_i32 = arith.constant 0 : i32
    %c0_i32_0 = arith.constant 0 : i32
    return %arg0, %c0_i32 : i32, i32
  }
  func.func @transform_1(%arg0: i32) -> (i32, i32) {
    %c0_i32 = arith.constant 0 : i32
    %c0_i32_0 = arith.constant 0 : i32
    %c0_i32_1 = arith.constant 0 : i32
    return %c0_i32, %c0_i32_0 : i32, i32
  }
  func.func @transform_2(%arg0: i32) -> (i32, i32) {
    %c0_i32 = arith.constant 0 : i32
    %c0_i32_0 = arith.constant 0 : i32
    %c0_i32_1 = arith.constant 0 : i32
    return %c0_i32, %c0_i32_0 : i32, i32
  }
  func.func @transform_3(%arg0: i32) -> (i32, i32) {
    %c0_i32 = arith.constant 0 : i32
    %c0_i32_0 = arith.constant 0 : i32
    return %arg0, %c0_i32 : i32, i32
  }
}

module attributes {stable_mosaic.version = 11 : i64} {
  func.func @_skip_add_kernel(%arg0: i32, %arg1: memref<128x32xbf16, #tpu.memory_space<vmem>>, %arg2: memref<128x32xbf16, #tpu.memory_space<vmem>>, %arg3: memref<32x32xbf16, #tpu.memory_space<vmem>>, %arg4: memref<128x32xbf16, #tpu.memory_space<vmem>>) attributes {dimension_semantics = [#tpu.dimension_semantics<parallel>], iteration_bounds = array<i64: 1>, scalar_prefetch = 0 : i64, scratch_operands = 0 : i64, tpu.core_type = #tpu.core_type<tc>, window_params = [{transform_indices = @transform_0, window_bounds = array<i64: 128, 32>}, {transform_indices = @transform_1, window_bounds = array<i64: 128, 32>}, {pipeline_mode = #tpu.pipeline_mode<synchronous>, transform_indices = @transform_2, window_bounds = array<i64: 32, 32>}, {transform_indices = @transform_3, window_bounds = array<i64: 128, 32>}]} {
    %c0 = arith.constant 0 : index
    %c0_0 = arith.constant 0 : index
    %0 = vector.load %arg1[%c0, %c0_0] : memref<128x32xbf16, #tpu.memory_space<vmem>>, vector<128x32xbf16>
    %c0_1 = arith.constant 0 : index
    %c0_2 = arith.constant 0 : index
    %1 = vector.load %arg3[%c0_1, %c0_2] : memref<32x32xbf16, #tpu.memory_space<vmem>>, vector<32x32xbf16>
    %cst = arith.constant dense<0.000000e+00> : vector<128x32xf32>
    %2 = tpu.matmul %0, %1, %cst {dimension_numbers = #tpu.dot_dimension_numbers<[1], [0], [0], [1], [0, 0, 1, 1], [], []>} : vector<128x32xbf16>, vector<32x32xbf16>, vector<128x32xf32> -> vector<128x32xf32>
    %c0_3 = arith.constant 0 : index
    %c0_4 = arith.constant 0 : index
    %3 = vector.load %arg2[%c0_3, %c0_4] : memref<128x32xbf16, #tpu.memory_space<vmem>>, vector<128x32xbf16>
    %4 = arith.extf %3 : vector<128x32xbf16> to vector<128x32xf32>
    %5 = arith.addf %2, %4 : vector<128x32xf32>
    %cst_5 = arith.constant 0.000000e+00 : f32
    %6 = vector.broadcast %cst_5 : f32 to vector<128x32xf32>
    %7 = arith.maximumf %5, %6 : vector<128x32xf32>
    %8 = arith.truncf %7 : vector<128x32xf32> to vector<128x32xbf16>
    %c0_6 = arith.constant 0 : index
    %c0_7 = arith.constant 0 : index
    %9 = vector.load %arg4[%c0_6, %c0_7] : memref<128x32xbf16, #tpu.memory_space<vmem>>, vector<128x32xbf16>
    tpu.vector_store %arg4[%c0_6, %c0_7], %8 {strides = array<i32>} : memref<128x32xbf16, #tpu.memory_space<vmem>>, vector<128x32xbf16>,
    return
  }
  func.func @transform_0(%arg0: i32) -> (i32, i32) {
    %c0_i32 = arith.constant 0 : i32
    %c0_i32_0 = arith.constant 0 : i32
    return %arg0, %c0_i32 : i32, i32
  }
  func.func @transform_1(%arg0: i32) -> (i32, i32) {
    %c0_i32 = arith.constant 0 : i32
    %c0_i32_0 = arith.constant 0 : i32
    return %arg0, %c0_i32 : i32, i32
  }
  func.func @transform_2(%arg0: i32) -> (i32, i32) {
    %c0_i32 = arith.constant 0 : i32
    %c0_i32_0 = arith.constant 0 : i32
    %c0_i32_1 = arith.constant 0 : i32
    return %c0_i32, %c0_i32_0 : i32, i32
  }
  func.func @transform_3(%arg0: i32) -> (i32, i32) {
    %c0_i32 = arith.constant 0 : i32
    %c0_i32_0 = arith.constant 0 : i32
    return %arg0, %c0_i32 : i32, i32
  }
}

module attributes {stable_mosaic.version = 11 : i64} {
  func.func @_pw_conv_kernel(%arg0: i32, %arg1: memref<128x32xbf16, #tpu.memory_space<vmem>>, %arg2: memref<32x16xbf16, #tpu.memory_space<vmem>>, %arg3: memref<1x16xf32, #tpu.memory_space<vmem>>, %arg4: memref<128x16xbf16, #tpu.memory_space<vmem>>) attributes {dimension_semantics = [#tpu.dimension_semantics<parallel>], iteration_bounds = array<i64: 1>, scalar_prefetch = 0 : i64, scratch_operands = 0 : i64, tpu.core_type = #tpu.core_type<tc>, window_params = [{transform_indices = @transform_0, window_bounds = array<i64: 128, 32>}, {pipeline_mode = #tpu.pipeline_mode<synchronous>, transform_indices = @transform_1, window_bounds = array<i64: 32, 16>}, {pipeline_mode = #tpu.pipeline_mode<synchronous>, transform_indices = @transform_2, window_bounds = array<i64: 1, 16>}, {transform_indices = @transform_3, window_bounds = array<i64: 128, 16>}]} {
    %c0 = arith.constant 0 : index
    %c0_0 = arith.constant 0 : index
    %0 = vector.load %arg1[%c0, %c0_0] : memref<128x32xbf16, #tpu.memory_space<vmem>>, vector<128x32xbf16>
    %c0_1 = arith.constant 0 : index
    %c0_2 = arith.constant 0 : index
    %1 = vector.load %arg2[%c0_1, %c0_2] : memref<32x16xbf16, #tpu.memory_space<vmem>>, vector<32x16xbf16>
    %cst = arith.constant dense<0.000000e+00> : vector<128x16xf32>
    %2 = tpu.matmul %0, %1, %cst {dimension_numbers = #tpu.dot_dimension_numbers<[1], [0], [0], [1], [0, 0, 1, 1], [], []>} : vector<128x32xbf16>, vector<32x16xbf16>, vector<128x16xf32> -> vector<128x16xf32>
    %c0_3 = arith.constant 0 : index
    %c0_4 = arith.constant 0 : index
    %3 = vector.load %arg3[%c0_3, %c0_4] : memref<1x16xf32, #tpu.memory_space<vmem>>, vector<1x16xf32>
    %4 = vector.broadcast %3 : vector<1x16xf32> to vector<128x16xf32>
    %5 = arith.addf %2, %4 : vector<128x16xf32>
    %6 = arith.truncf %5 : vector<128x16xf32> to vector<128x16xbf16>
    %c0_5 = arith.constant 0 : index
    %c0_6 = arith.constant 0 : index
    %7 = vector.load %arg4[%c0_5, %c0_6] : memref<128x16xbf16, #tpu.memory_space<vmem>>, vector<128x16xbf16>
    tpu.vector_store %arg4[%c0_5, %c0_6], %6 {strides = array<i32>} : memref<128x16xbf16, #tpu.memory_space<vmem>>, vector<128x16xbf16>,
    return
  }
  func.func @transform_0(%arg0: i32) -> (i32, i32) {
    %c0_i32 = arith.constant 0 : i32
    %c0_i32_0 = arith.constant 0 : i32
    return %arg0, %c0_i32 : i32, i32
  }
  func.func @transform_1(%arg0: i32) -> (i32, i32) {
    %c0_i32 = arith.constant 0 : i32
    %c0_i32_0 = arith.constant 0 : i32
    %c0_i32_1 = arith.constant 0 : i32
    return %c0_i32, %c0_i32_0 : i32, i32
  }
  func.func @transform_2(%arg0: i32) -> (i32, i32) {
    %c0_i32 = arith.constant 0 : i32
    %c0_i32_0 = arith.constant 0 : i32
    %c0_i32_1 = arith.constant 0 : i32
    return %c0_i32, %c0_i32_0 : i32, i32
  }
  func.func @transform_3(%arg0: i32) -> (i32, i32) {
    %c0_i32 = arith.constant 0 : i32
    %c0_i32_0 = arith.constant 0 : i32
    return %arg0, %c0_i32 : i32, i32
  }
}

module attributes {stable_mosaic.version = 11 : i64} {
  func.func @_pw_conv_kernel(%arg0: i32, %arg1: memref<32x64xbf16, #tpu.memory_space<vmem>>, %arg2: memref<64x32xbf16, #tpu.memory_space<vmem>>, %arg3: memref<1x32xf32, #tpu.memory_space<vmem>>, %arg4: memref<32x32xbf16, #tpu.memory_space<vmem>>) attributes {dimension_semantics = [#tpu.dimension_semantics<parallel>], iteration_bounds = array<i64: 1>, scalar_prefetch = 0 : i64, scratch_operands = 0 : i64, tpu.core_type = #tpu.core_type<tc>, window_params = [{transform_indices = @transform_0, window_bounds = array<i64: 32, 64>}, {pipeline_mode = #tpu.pipeline_mode<synchronous>, transform_indices = @transform_1, window_bounds = array<i64: 64, 32>}, {pipeline_mode = #tpu.pipeline_mode<synchronous>, transform_indices = @transform_2, window_bounds = array<i64: 1, 32>}, {transform_indices = @transform_3, window_bounds = array<i64: 32, 32>}]} {
    %c0 = arith.constant 0 : index
    %c0_0 = arith.constant 0 : index
    %0 = vector.load %arg1[%c0, %c0_0] : memref<32x64xbf16, #tpu.memory_space<vmem>>, vector<32x64xbf16>
    %c0_1 = arith.constant 0 : index
    %c0_2 = arith.constant 0 : index
    %1 = vector.load %arg2[%c0_1, %c0_2] : memref<64x32xbf16, #tpu.memory_space<vmem>>, vector<64x32xbf16>
    %cst = arith.constant dense<0.000000e+00> : vector<32x32xf32>
    %2 = tpu.matmul %0, %1, %cst {dimension_numbers = #tpu.dot_dimension_numbers<[1], [0], [0], [1], [0, 0, 1, 1], [], []>} : vector<32x64xbf16>, vector<64x32xbf16>, vector<32x32xf32> -> vector<32x32xf32>
    %c0_3 = arith.constant 0 : index
    %c0_4 = arith.constant 0 : index
    %3 = vector.load %arg3[%c0_3, %c0_4] : memref<1x32xf32, #tpu.memory_space<vmem>>, vector<1x32xf32>
    %4 = vector.broadcast %3 : vector<1x32xf32> to vector<32x32xf32>
    %5 = arith.addf %2, %4 : vector<32x32xf32>
    %6 = arith.truncf %5 : vector<32x32xf32> to vector<32x32xbf16>
    %c0_5 = arith.constant 0 : index
    %c0_6 = arith.constant 0 : index
    %7 = vector.load %arg4[%c0_5, %c0_6] : memref<32x32xbf16, #tpu.memory_space<vmem>>, vector<32x32xbf16>
    tpu.vector_store %arg4[%c0_5, %c0_6], %6 {strides = array<i32>} : memref<32x32xbf16, #tpu.memory_space<vmem>>, vector<32x32xbf16>,
    return
  }
  func.func @transform_0(%arg0: i32) -> (i32, i32) {
    %c0_i32 = arith.constant 0 : i32
    %c0_i32_0 = arith.constant 0 : i32
    return %arg0, %c0_i32 : i32, i32
  }
  func.func @transform_1(%arg0: i32) -> (i32, i32) {
    %c0_i32 = arith.constant 0 : i32
    %c0_i32_0 = arith.constant 0 : i32
    %c0_i32_1 = arith.constant 0 : i32
    return %c0_i32, %c0_i32_0 : i32, i32
  }
  func.func @transform_2(%arg0: i32) -> (i32, i32) {
    %c0_i32 = arith.constant 0 : i32
    %c0_i32_0 = arith.constant 0 : i32
    %c0_i32_1 = arith.constant 0 : i32
    return %c0_i32, %c0_i32_0 : i32, i32
  }
  func.func @transform_3(%arg0: i32) -> (i32, i32) {
    %c0_i32 = arith.constant 0 : i32
    %c0_i32_0 = arith.constant 0 : i32
    return %arg0, %c0_i32 : i32, i32
  }
}

module attributes {stable_mosaic.version = 11 : i64} {
  func.func @_dec_fused_kernel(%arg0: i32, %arg1: memref<256x32xbf16, #tpu.memory_space<vmem>>, %arg2: memref<128x16xbf16, #tpu.memory_space<vmem>>, %arg3: memref<16x16xbf16, #tpu.memory_space<vmem>>, %arg4: memref<256x32xbf16, #tpu.memory_space<vmem>>) attributes {dimension_semantics = [#tpu.dimension_semantics<parallel>], iteration_bounds = array<i64: 1>, scalar_prefetch = 0 : i64, scratch_operands = 0 : i64, tpu.core_type = #tpu.core_type<tc>, window_params = [{transform_indices = @transform_0, window_bounds = array<i64: 256, 32>}, {transform_indices = @transform_1, window_bounds = array<i64: 128, 16>}, {pipeline_mode = #tpu.pipeline_mode<synchronous>, transform_indices = @transform_2, window_bounds = array<i64: 16, 16>}, {transform_indices = @transform_3, window_bounds = array<i64: 256, 32>}]} {
    %c0 = arith.constant 0 : index
    %c0_0 = arith.constant 0 : index
    %0 = vector.load %arg1[%c0, %c0_0] : memref<256x32xbf16, #tpu.memory_space<vmem>>, vector<256x32xbf16>
    %c0_1 = arith.constant 0 : index
    %c0_2 = arith.constant 0 : index
    %1 = vector.load %arg3[%c0_1, %c0_2] : memref<16x16xbf16, #tpu.memory_space<vmem>>, vector<16x16xbf16>
    %c0_3 = arith.constant 0 : index
    %c0_4 = arith.constant 0 : index
    %2 = vector.load %arg2[%c0_3, %c0_4] : memref<128x16xbf16, #tpu.memory_space<vmem>>, vector<128x16xbf16>
    %3 = arith.extf %2 : vector<128x16xbf16> to vector<128x16xf32>
    %4 = vector.shape_cast %3 : vector<128x16xf32> to vector<16x1x8x16xf32>
    %5 = vector.extract_strided_slice %0 {offsets = [0, 0], sizes = [256, 16], strides = [1, 1]} : vector<256x32xbf16> to vector<256x16xbf16>
    %cst = arith.constant dense<0.000000e+00> : vector<256x16xf32>
    %6 = tpu.matmul %5, %1, %cst {dimension_numbers = #tpu.dot_dimension_numbers<[1], [0], [0], [1], [0, 0, 1, 1], [], []>} : vector<256x16xbf16>, vector<16x16xbf16>, vector<256x16xf32> -> vector<256x16xf32>
    %7 = vector.shape_cast %6 : vector<256x16xf32> to vector<16x2x8x16xf32>
    %8 = vector.extract_strided_slice %0 {offsets = [0, 16], sizes = [256, 16], strides = [1, 1]} : vector<256x32xbf16> to vector<256x16xbf16>
    %cst_5 = arith.constant dense<0.000000e+00> : vector<256x16xf32>
    %9 = tpu.matmul %8, %1, %cst_5 {dimension_numbers = #tpu.dot_dimension_numbers<[1], [0], [0], [1], [0, 0, 1, 1], [], []>} : vector<256x16xbf16>, vector<16x16xbf16>, vector<256x16xf32> -> vector<256x16xf32>
    %10 = vector.shape_cast %9 : vector<256x16xf32> to vector<16x2x8x16xf32>
    %11 = vector.broadcast %4 : vector<16x1x8x16xf32> to vector<16x2x8x16xf32>
    %12 = arith.addf %7, %11 : vector<16x2x8x16xf32>
    %cst_6 = arith.constant 0.000000e+00 : f32
    %13 = vector.broadcast %cst_6 : f32 to vector<16x2x8x16xf32>
    %14 = arith.maximumf %12, %13 : vector<16x2x8x16xf32>
    %15 = arith.truncf %14 : vector<16x2x8x16xf32> to vector<16x2x8x16xbf16>
    %16 = vector.broadcast %4 : vector<16x1x8x16xf32> to vector<16x2x8x16xf32>
    %17 = arith.addf %10, %16 : vector<16x2x8x16xf32>
    %cst_7 = arith.constant 0.000000e+00 : f32
    %18 = vector.broadcast %cst_7 : f32 to vector<16x2x8x16xf32>
    %19 = arith.maximumf %17, %18 : vector<16x2x8x16xf32>
    %20 = arith.truncf %19 : vector<16x2x8x16xf32> to vector<16x2x8x16xbf16>
    %21 = tpu.concatenate %15, %20 in 3 : vector<16x2x8x16xbf16>, vector<16x2x8x16xbf16> -> vector<16x2x8x32xbf16>
    %22 = vector.shape_cast %21 : vector<16x2x8x32xbf16> to vector<256x32xbf16>
    %c0_8 = arith.constant 0 : index
    %c0_9 = arith.constant 0 : index
    %23 = vector.load %arg4[%c0_8, %c0_9] : memref<256x32xbf16, #tpu.memory_space<vmem>>, vector<256x32xbf16>
    tpu.vector_store %arg4[%c0_8, %c0_9], %22 {strides = array<i32>} : memref<256x32xbf16, #tpu.memory_space<vmem>>, vector<256x32xbf16>,
    return
  }
  func.func @transform_0(%arg0: i32) -> (i32, i32) {
    %c0_i32 = arith.constant 0 : i32
    %c0_i32_0 = arith.constant 0 : i32
    return %arg0, %c0_i32 : i32, i32
  }
  func.func @transform_1(%arg0: i32) -> (i32, i32) {
    %c0_i32 = arith.constant 0 : i32
    %c0_i32_0 = arith.constant 0 : i32
    return %arg0, %c0_i32 : i32, i32
  }
  func.func @transform_2(%arg0: i32) -> (i32, i32) {
    %c0_i32 = arith.constant 0 : i32
    %c0_i32_0 = arith.constant 0 : i32
    %c0_i32_1 = arith.constant 0 : i32
    return %c0_i32, %c0_i32_0 : i32, i32
  }
  func.func @transform_3(%arg0: i32) -> (i32, i32) {
    %c0_i32 = arith.constant 0 : i32
    %c0_i32_0 = arith.constant 0 : i32
    return %arg0, %c0_i32 : i32, i32
  }
}

module attributes {stable_mosaic.version = 11 : i64} {
  func.func @_pw_conv_kernel(%arg0: i32, %arg1: memref<512x16xbf16, #tpu.memory_space<vmem>>, %arg2: memref<16x3xbf16, #tpu.memory_space<vmem>>, %arg3: memref<1x3xf32, #tpu.memory_space<vmem>>, %arg4: memref<512x3xf32, #tpu.memory_space<vmem>>) attributes {dimension_semantics = [#tpu.dimension_semantics<parallel>], iteration_bounds = array<i64: 1>, scalar_prefetch = 0 : i64, scratch_operands = 0 : i64, tpu.core_type = #tpu.core_type<tc>, window_params = [{transform_indices = @transform_0, window_bounds = array<i64: 512, 16>}, {pipeline_mode = #tpu.pipeline_mode<synchronous>, transform_indices = @transform_1, window_bounds = array<i64: 16, 3>}, {pipeline_mode = #tpu.pipeline_mode<synchronous>, transform_indices = @transform_2, window_bounds = array<i64: 1, 3>}, {transform_indices = @transform_3, window_bounds = array<i64: 512, 3>}]} {
    %c0 = arith.constant 0 : index
    %c0_0 = arith.constant 0 : index
    %0 = vector.load %arg1[%c0, %c0_0] : memref<512x16xbf16, #tpu.memory_space<vmem>>, vector<512x16xbf16>
    %c0_1 = arith.constant 0 : index
    %c0_2 = arith.constant 0 : index
    %1 = vector.load %arg2[%c0_1, %c0_2] : memref<16x3xbf16, #tpu.memory_space<vmem>>, vector<16x3xbf16>
    %cst = arith.constant dense<0.000000e+00> : vector<512x3xf32>
    %2 = tpu.matmul %0, %1, %cst {dimension_numbers = #tpu.dot_dimension_numbers<[1], [0], [0], [1], [0, 0, 1, 1], [], []>} : vector<512x16xbf16>, vector<16x3xbf16>, vector<512x3xf32> -> vector<512x3xf32>
    %c0_3 = arith.constant 0 : index
    %c0_4 = arith.constant 0 : index
    %3 = vector.load %arg3[%c0_3, %c0_4] : memref<1x3xf32, #tpu.memory_space<vmem>>, vector<1x3xf32>
    %4 = vector.broadcast %3 : vector<1x3xf32> to vector<512x3xf32>
    %5 = arith.addf %2, %4 : vector<512x3xf32>
    %c0_5 = arith.constant 0 : index
    %c0_6 = arith.constant 0 : index
    %6 = vector.load %arg4[%c0_5, %c0_6] : memref<512x3xf32, #tpu.memory_space<vmem>>, vector<512x3xf32>
    tpu.vector_store %arg4[%c0_5, %c0_6], %5 {strides = array<i32>} : memref<512x3xf32, #tpu.memory_space<vmem>>, vector<512x3xf32>,
    return
  }
  func.func @transform_0(%arg0: i32) -> (i32, i32) {
    %c0_i32 = arith.constant 0 : i32
    %c0_i32_0 = arith.constant 0 : i32
    return %arg0, %c0_i32 : i32, i32
  }
  func.func @transform_1(%arg0: i32) -> (i32, i32) {
    %c0_i32 = arith.constant 0 : i32
    %c0_i32_0 = arith.constant 0 : i32
    %c0_i32_1 = arith.constant 0 : i32
    return %c0_i32, %c0_i32_0 : i32, i32
  }
  func.func @transform_2(%arg0: i32) -> (i32, i32) {
    %c0_i32 = arith.constant 0 : i32
    %c0_i32_0 = arith.constant 0 : i32
    %c0_i32_1 = arith.constant 0 : i32
    return %c0_i32, %c0_i32_0 : i32, i32
  }
  func.func @transform_3(%arg0: i32) -> (i32, i32) {
    %c0_i32 = arith.constant 0 : i32
    %c0_i32_0 = arith.constant 0 : i32
    return %arg0, %c0_i32 : i32, i32
  }
}

</mosaic_0001>

<bundles_post_ra>
// kernel: _forward_impl.12
= control target key start
LH: loop header
LB: loop body
LE: loop exit
PB: predicated region body
PF: predicated region fallthrough
CT: control target
= control target key end

     0   :  { %vm52_vm0 = vcmask 261120   ;;  %vm128_vm1 = vcmask 519168   ;;  %s215_s1 = inlined_call_operand.vmem [shape: bf16[32,64], index: 1, kind: input, shape index: {}]   ;;  %s216_s0 = inlined_call_operand.vmem [shape: bf16[32,32], index: 0, kind: input, shape index: {}]   ;;  %s217_s2 = inlined_call_operand.vmem [shape: f32[1,64], index: 2, kind: input, shape index: {}]   ;;  %s218_s3 = inlined_call_operand.vmem [shape: bf16[32,64], index: 3, kind: output, shape index: {}]  }
   0x1   :  { %v164_v0 = vld [vmem:[%s215_s1 + $0x8] sm:$0xff]   ;;  %v165_v1 = vld [vmem:[%s215_s1] sm:$0xff]  }
   0x2   :  { %156 = vmatprep.subr.bf16.mxu0 %v164_v0  ;;  %v166_v2 = vld [vmem:[%s216_s0] sm:$0xff]   ;;  %v167_v3 = vld [vmem:[%s216_s0 + $0x8] sm:$0xff]  }
   0x3   :  { %157 = vmatpush3.bf16.msra.mxu0 %v164_v0  ;;  %160 = vmatprep.mubr.msk.bf16.mxu0 %vm52_vm0, %v166_v2  ;;  %v137_v4 = vld [vmem:[%s217_s2] ss:$0 sm:$0xff] }
   0x4   :  { %158 = vmatprep.subr.bf16.mxu0 %v165_v1 }
   0x7   :  { %159 = vmatpush3.bf16.msra.mxu0 %v165_v1 }
   0xa   :  { %161 = vmatmul.mubr.msk.bf16.vlgmr.msra.gmra.mxu0 %vm52_vm0, %v167_v3 }
  0xca   :  { %v162_v5 = vpop.f32.mrf.mxu0 }
  0xcb   :  { %v102_v6 = vadd.f32 %v162_v5, %v137_v4 }
  0xcc   :  { %v93_v7 = vpop.f32.mrf.mxu0 }
  0xcd   :  { %v110_v8 = vmax.f32 %v102_v6, 0.0  ;;  %v94_v9 = vadd.f32 %v137_v4, %v93_v7 }
  0xce   :  { %v163_v10 = vpop.f32.mrf.mxu0 }
  0xcf   :  { %v150_v11 = vpack.c.bf16 %v110_v8, %v110_v8  ;;  %v108_v12 = vmax.f32 %v94_v9, 0.0  ;;  %v105_v13 = vadd.f32 %v163_v10, %v137_v4 }
  0xd0   :  { %v96_v14 = vpop.f32.mrf.mxu0 }
  0xd1   :  { %131 = vst.msk [vmem:[%s218_s3 + $0x8] sm:$0xf] %vm128_vm1, %v150_v11  ;;  %v148_v15 = vpack.c.bf16 %v108_v12, %v108_v12  ;;  %v111_v16 = vmax.f32 %v105_v13, 0.0  ;;  %v97_v17 = vadd.f32 %v137_v4, %v96_v14 }
  0xd3   :  { %129 = vst.msk [vmem:[%s218_s3] sm:$0xf] %vm128_vm1, %v148_v15  ;;  %v151_v18 = vpack.c.bf16 %v111_v16, %v111_v16  ;;  %v109_v19 = vmax.f32 %v97_v17, 0.0 }
  0xd5   :  { %132 = vst.msk [vmem:[%s218_s3 + $0xc] sm:$0xf] %vm128_vm1, %v151_v18  ;;  %v149_v20 = vpack.c.bf16 %v109_v19, %v109_v19 }
  0xd7   :  { %130 = vst.msk [vmem:[%s218_s3 + $0x4] sm:$0xf] %vm128_vm1, %v149_v20 }

// kernel: _forward_impl.11
= control target key start
LH: loop header
LB: loop body
LE: loop exit
PB: predicated region body
PF: predicated region fallthrough
CT: control target
= control target key end

     0   :  { %vm25_vm0 = vcmask 517120   ;;  %s137_s20 = smov 96   ;;  %vm123_vm1 = vcmask 254976   ;;  %s252_s0 = inlined_call_operand.vmem [shape: bf16[8,2,4,64], index: 0, kind: input, shape index: {}]   ;;  %s253_s1 = inlined_call_operand.vmem [shape: bf16[8,4,32], index: 1, kind: output, shape index: {}]  }
   0x1   :  { %v13_v0 = vld [vmem:[%s252_s0 + $0x8] sm:$0x3]  ;;  %v14_v1 = vld [vmem:[%s252_s0 + $0xa] sm:$0x3]  ;;  %v9_v2 = vld [vmem:[%s252_s0] sm:$0x3] }
   0x2   :  { %v42_v3 = vsel %vm25_vm0, %v13_v0, 4286644096  ;;  %v45_v4 = vsel %vm25_vm0, %v14_v1, 4286644096  ;;  %v10_v5 = vld [vmem:[%s252_s0 + $0x2] sm:$0x3] }
   0x3   :  { %v47_v6 = vmax.bf16 %v45_v4, %v42_v3  ;;  %v28_v7 = vsel %vm25_vm0, %v9_v2, 4286644096  ;;  %v31_v8 = vsel %vm25_vm0, %v10_v5, 4286644096  ;;  %v15_v9 = vld [vmem:[%s252_s0 + $0xc] sm:$0x3] }
   0x4   :  { %v33_v10 = vmax.bf16 %v31_v8, %v28_v7  ;;  %v16_v11 = vld [vmem:[%s252_s0 + $0xe] sm:$0x3]  ;;  %v49_v12 = vsel %vm25_vm0, %v15_v9, 4286644096  ;;  %v11_v13 = vld [vmem:[%s252_s0 + $0x4] sm:$0x3] }
   0x5   :  { %95 = vrot.lane.b32.xlu1 %v47_v6, %s137_s20  ;;  %v52_v14 = vsel %vm25_vm0, %v16_v11, 4286644096  ;;  %v12_v15 = vld [vmem:[%s252_s0 + $0x6] sm:$0x3]  ;;  %v35_v16 = vsel %vm25_vm0, %v11_v13, 4286644096 }
   0x6   :  { %91 = vrot.lane.b32.xlu0 %v33_v10, %s137_s20  ;;  %v54_v17 = vmax.bf16 %v52_v14, %v49_v12  ;;  %v38_v18 = vsel %vm25_vm0, %v12_v15, 4286644096  ;;  %v19_v19 = vld [vmem:[%s252_s0 + $0x14] sm:$0x3]  ;;  %v20_v20 = vld [vmem:[%s252_s0 + $0x16] sm:$0x3] }
   0x7   :  { %v40_v21 = vmax.bf16 %v38_v18, %v35_v16  ;;  %v63_v22 = vsel %vm25_vm0, %v19_v19, 4286644096  ;;  %v66_v23 = vsel %vm25_vm0, %v20_v20, 4286644096  ;;  %v17_v24 = vld [vmem:[%s252_s0 + $0x10] sm:$0x3] }
   0x8   :  { %v18_v25 = vld [vmem:[%s252_s0 + $0x12] sm:$0x3]  ;;  %v56_v26 = vsel %vm25_vm0, %v17_v24, 4286644096  ;;  %v23_v27 = vld [vmem:[%s252_s0 + $0x1c] sm:$0x3]  ;;  %v68_v28 = vmax.bf16 %v66_v23, %v63_v22 }
   0x9   :  { %97 = vrot.lane.b32.xlu1 %v54_v17, %s137_s20  ;;  %v59_v29 = vsel %vm25_vm0, %v18_v25, 4286644096  ;;  %v24_v30 = vld [vmem:[%s252_s0 + $0x1e] sm:$0x3]  ;;  %v77_v31 = vsel %vm25_vm0, %v23_v27, 4286644096 }
   0xa   :  { %93 = vrot.lane.b32.xlu0 %v40_v21, %s137_s20  ;;  %v61_v32 = vmax.bf16 %v59_v29, %v56_v26  ;;  %v80_v33 = vsel %vm25_vm0, %v24_v30, 4286644096  ;;  %v21_v34 = vld [vmem:[%s252_s0 + $0x18] sm:$0x3]  ;;  %v22_v35 = vld [vmem:[%s252_s0 + $0x1a] sm:$0x3] }
   0xb   :  { %v70_v36 = vsel %vm25_vm0, %v21_v34, 4286644096  ;;  %v73_v37 = vsel %vm25_vm0, %v22_v35, 4286644096  ;;  %v82_v38 = vmax.bf16 %v80_v33, %v77_v31 }
   0xc   :  { %v75_v39 = vmax.bf16 %v73_v37, %v70_v36 }
   0xd   :  { %101 = vrot.lane.b32.xlu1 %v68_v28, %s137_s20 }
   0xe   :  { %99 = vrot.lane.b32.xlu0 %v61_v32, %s137_s20 }
  0x11   :  { %105 = vrot.lane.b32.xlu1 %v82_v38, %s137_s20 }
  0x12   :  { %103 = vrot.lane.b32.xlu0 %v75_v39, %s137_s20 }
  0x77   :  { %v96_v40 = vpop.permute.xlu1 %95 }
  0x78   :  { %v117_v41 = vmax.bf16 %v96_v40, %v47_v6  ;;  %v92_v42 = vpop.permute.xlu0 %91 }
  0x79   :  { %v115_v43 = vmax.bf16 %v92_v42, %v33_v10 }
  0x7a   :  { %126 = vst.msk [vmem:[%s253_s1 + $0x4] sm:$0x3] %vm123_vm1, %v117_v41 }
  0x7b   :  { %124 = vst.msk [vmem:[%s253_s1] sm:$0x3] %vm123_vm1, %v115_v43  ;;  %v98_v44 = vpop.permute.xlu1 %97 }
  0x7c   :  { %v118_v45 = vmax.bf16 %v98_v44, %v54_v17  ;;  %v94_v46 = vpop.permute.xlu0 %93 }
  0x7d   :  { %v116_v47 = vmax.bf16 %v94_v46, %v40_v21 }
  0x7e   :  { %127 = vst.msk [vmem:[%s253_s1 + $0x6] sm:$0x3] %vm123_vm1, %v118_v45 }
  0x7f   :  { %125 = vst.msk [vmem:[%s253_s1 + $0x2] sm:$0x3] %vm123_vm1, %v116_v47  ;;  %v102_v48 = vpop.permute.xlu1 %101 }
  0x80   :  { %v120_v49 = vmax.bf16 %v102_v48, %v68_v28  ;;  %v100_v50 = vpop.permute.xlu0 %99 }
  0x81   :  { %v119_v51 = vmax.bf16 %v100_v50, %v61_v32 }
  0x82   :  { %129 = vst.msk [vmem:[%s253_s1 + $0xa] sm:$0x3] %vm123_vm1, %v120_v49 }
  0x83   :  { %128 = vst.msk [vmem:[%s253_s1 + $0x8] sm:$0x3] %vm123_vm1, %v119_v51  ;;  %v106_v52 = vpop.permute.xlu1 %105 }
  0x84   :  { %v122_v53 = vmax.bf16 %v106_v52, %v82_v38  ;;  %v104_v54 = vpop.permute.xlu0 %103 }
  0x85   :  { %v121_v55 = vmax.bf16 %v104_v54, %v75_v39 }
  0x86   :  { %131 = vst.msk [vmem:[%s253_s1 + $0xe] sm:$0x3] %vm123_vm1, %v122_v53 }
  0x87   :  { %130 = vst.msk [vmem:[%s253_s1 + $0xc] sm:$0x3] %vm123_vm1, %v121_v55 }

// kernel: _forward_impl.10
= control target key start
LH: loop header
LB: loop body
LE: loop exit
PB: predicated region body
PF: predicated region fallthrough
CT: control target
= control target key end

     0   :  { %vm86_vm0 = vcmask 130048   ;;  %vm288_vm1 = vcmask 257024   ;;  %s537_s1 = inlined_call_operand.vmem [shape: bf16[16,32], index: 1, kind: input, shape index: {}]   ;;  %s538_s0 = inlined_call_operand.vmem [shape: bf16[128,16], index: 0, kind: input, shape index: {}]   ;;  %s539_s2 = inlined_call_operand.vmem [shape: f32[1,32], index: 2, kind: input, shape index: {}]   ;;  %s540_s3 = inlined_call_operand.vmem [shape: bf16[128,32], index: 3, kind: output, shape index: {}]  }
   0x1   :  { %v388_v0 = vld [vmem:[%s537_s1] sm:$0xff]   ;;  %v391_v3 = vld [vmem:[%s538_s0 + $0x8] sm:$0xff]   ;;  %v393_v5 = vld [vmem:[%s538_s0 + $0x10] sm:$0xff]  }
   0x2   :  { %v389_v1 = vld [vmem:[%s538_s0] sm:$0xff]   ;;  %368 = vmatprep.subr.bf16.mxu0 %v388_v0  ;;  %386 = vmatprep.subr.bf16.mxu1 %v388_v0  ;;  %v392_v4 = vld [vmem:[%s538_s0 + $0x28] sm:$0xff]   ;;  %v394_v6 = vld [vmem:[%s538_s0 + $0x30] sm:$0xff]  }
   0x3   :  { %v390_v2 = vld [vmem:[%s538_s0 + $0x20] sm:$0xff]   ;;  %369 = vmatpush3.bf16.msra.mxu0 %v388_v0  ;;  %387 = vmatpush3.bf16.msra.mxu1 %v388_v0  ;;  %v395_v7 = vld [vmem:[%s538_s0 + $0x18] sm:$0xff]  }
   0x4   :  { %370 = vmatprep.mubr.msk.bf16.mxu0 %vm86_vm0, %v389_v1  ;;  %378 = vmatprep.mubr.msk.bf16.mxu1 %vm86_vm0, %v390_v2  ;;  %v396_v8 = vld [vmem:[%s538_s0 + $0x38] sm:$0xff]   ;;  %v455_v9 = vld [vmem:[%s539_s2] ss:$0 sm:$0xff] }
   0x6   :  { %371 = vmatmul.mubr.msk.bf16.vlgmr.msra.gmra.mxu0 %vm86_vm0, %v391_v3  ;;  %379 = vmatmul.mubr.msk.bf16.vlgmr.msra.gmra.mxu1 %vm86_vm0, %v392_v4 }
   0x7   :  { %374 = vmatprep.mubr.msk.bf16.mxu0 %vm86_vm0, %v393_v5  ;;  %382 = vmatprep.mubr.msk.bf16.mxu1 %vm86_vm0, %v394_v6 }
   0xe   :  { %375 = vmatmul.mubr.msk.bf16.gmra.mxu0 %vm86_vm0, %v395_v7  ;;  %383 = vmatmul.mubr.msk.bf16.gmra.mxu1 %vm86_vm0, %v396_v8 }
  0xc6   :  { %v372_v10 = vpop.f32.mrf.mxu0  ;;  %v380_v11 = vpop.f32.mrf.mxu1 }
  0xc7   :  { %v154_v12 = vadd.f32 %v372_v10, %v455_v9  ;;  %v186_v13 = vadd.f32 %v380_v11, %v455_v9 }
  0xc8   :  { %v145_v14 = vpop.f32.mrf.mxu0  ;;  %v177_v15 = vpop.f32.mrf.mxu1 }
  0xc9   :  { %v210_v16 = vmax.f32 %v154_v12, 0.0  ;;  %v218_v17 = vmax.f32 %v186_v13, 0.0  ;;  %v146_v18 = vadd.f32 %v455_v9, %v145_v14  ;;  %v178_v19 = vadd.f32 %v455_v9, %v177_v15 }
  0xca   :  { %v373_v20 = vpop.f32.mrf.mxu0  ;;  %v381_v21 = vpop.f32.mrf.mxu1 }
  0xcb   :  { %v345_v22 = vpack.c.bf16 %v210_v16, %v210_v16  ;;  %v353_v23 = vpack.c.bf16 %v218_v17, %v218_v17  ;;  %v208_v24 = vmax.f32 %v146_v18, 0.0  ;;  %v216_v25 = vmax.f32 %v178_v19, 0.0 }
  0xcc   :  { %v157_v26 = vadd.f32 %v373_v20, %v455_v9  ;;  %v189_v27 = vadd.f32 %v381_v21, %v455_v9  ;;  %v148_v28 = vpop.f32.mrf.mxu0  ;;  %v180_v29 = vpop.f32.mrf.mxu1 }
  0xcd   :  { %291 = vst.msk [vmem:[%s540_s3 + $0x8] sm:$0xf] %vm288_vm1, %v345_v22  ;;  %299 = vst.msk [vmem:[%s540_s3 + $0x28] sm:$0xf] %vm288_vm1, %v353_v23  ;;  %v343_v30 = vpack.c.bf16 %v208_v24, %v208_v24  ;;  %v351_v31 = vpack.c.bf16 %v216_v25, %v216_v25  ;;  %v149_v32 = vadd.f32 %v455_v9, %v148_v28 }
  0xce   :  { %v181_v33 = vadd.f32 %v455_v9, %v180_v29  ;;  %v211_v34 = vmax.f32 %v157_v26, 0.0  ;;  %v219_v35 = vmax.f32 %v189_v27, 0.0  ;;  %v376_v36 = vpop.f32.mrf.mxu0  ;;  %v384_v37 = vpop.f32.mrf.mxu1 }
  0xcf   :  { %289 = vst.msk [vmem:[%s540_s3] sm:$0xf] %vm288_vm1, %v343_v30  ;;  %297 = vst.msk [vmem:[%s540_s3 + $0x20] sm:$0xf] %vm288_vm1, %v351_v31  ;;  %v209_v38 = vmax.f32 %v149_v32, 0.0  ;;  %v170_v40 = vadd.f32 %v376_v36, %v455_v9  ;;  %v202_v41 = vadd.f32 %v384_v37, %v455_v9 }
  0xd0   :  { %v217_v39 = vmax.f32 %v181_v33, 0.0  ;;  %v346_v42 = vpack.c.bf16 %v211_v34, %v211_v34  ;;  %v354_v43 = vpack.c.bf16 %v219_v35, %v219_v35  ;;  %v161_v44 = vpop.f32.mrf.mxu0  ;;  %v193_v45 = vpop.f32.mrf.mxu1 }
  0xd1   :  { %v344_v46 = vpack.c.bf16 %v209_v38, %v209_v38  ;;  %v214_v48 = vmax.f32 %v170_v40, 0.0  ;;  %v222_v49 = vmax.f32 %v202_v41, 0.0  ;;  %v162_v50 = vadd.f32 %v455_v9, %v161_v44 }
  0xd2   :  { %v352_v47 = vpack.c.bf16 %v217_v39, %v217_v39  ;;  %292 = vst.msk [vmem:[%s540_s3 + $0xc] sm:$0xf] %vm288_vm1, %v346_v42  ;;  %300 = vst.msk [vmem:[%s540_s3 + $0x2c] sm:$0xf] %vm288_vm1, %v354_v43  ;;  %v194_v51 = vadd.f32 %v455_v9, %v193_v45  ;;  %v377_v52 = vpop.f32.mrf.mxu0  ;;  %v385_v53 = vpop.f32.mrf.mxu1 }
  0xd3   :  { %290 = vst.msk [vmem:[%s540_s3 + $0x4] sm:$0xf] %vm288_vm1, %v344_v46  ;;  %v349_v54 = vpack.c.bf16 %v214_v48, %v214_v48  ;;  %v357_v55 = vpack.c.bf16 %v222_v49, %v222_v49  ;;  %v173_v56 = vadd.f32 %v377_v52, %v455_v9  ;;  %v205_v57 = vadd.f32 %v385_v53, %v455_v9 }
  0xd4   :  { %298 = vst.msk [vmem:[%s540_s3 + $0x24] sm:$0xf] %vm288_vm1, %v352_v47  ;;  %v212_v58 = vmax.f32 %v162_v50, 0.0  ;;  %v220_v59 = vmax.f32 %v194_v51, 0.0  ;;  %v164_v60 = vpop.f32.mrf.mxu0  ;;  %v196_v61 = vpop.f32.mrf.mxu1 }
  0xd5   :  { %295 = vst.msk [vmem:[%s540_s3 + $0x18] sm:$0xf] %vm288_vm1, %v349_v54  ;;  %303 = vst.msk [vmem:[%s540_s3 + $0x38] sm:$0xf] %vm288_vm1, %v357_v55  ;;  %v215_v62 = vmax.f32 %v173_v56, 0.0  ;;  %v223_v63 = vmax.f32 %v205_v57, 0.0  ;;  %v165_v0 = vadd.f32 %v455_v9, %v164_v60  ;;  %v197_v1 = vadd.f32 %v455_v9, %v196_v61 }
  0xd6   :  { %v347_v2 = vpack.c.bf16 %v212_v58, %v212_v58  ;;  %v355_v3 = vpack.c.bf16 %v220_v59, %v220_v59 }
  0xd7   :  { %v350_v4 = vpack.c.bf16 %v215_v62, %v215_v62  ;;  %v358_v5 = vpack.c.bf16 %v223_v63, %v223_v63  ;;  %v213_v6 = vmax.f32 %v165_v0, 0.0  ;;  %v221_v7 = vmax.f32 %v197_v1, 0.0 }
  0xd8   :  { %293 = vst.msk [vmem:[%s540_s3 + $0x10] sm:$0xf] %vm288_vm1, %v347_v2  ;;  %301 = vst.msk [vmem:[%s540_s3 + $0x30] sm:$0xf] %vm288_vm1, %v355_v3 }
  0xd9   :  { %296 = vst.msk [vmem:[%s540_s3 + $0x1c] sm:$0xf] %vm288_vm1, %v350_v4  ;;  %304 = vst.msk [vmem:[%s540_s3 + $0x3c] sm:$0xf] %vm288_vm1, %v358_v5  ;;  %v348_v8 = vpack.c.bf16 %v213_v6, %v213_v6  ;;  %v356_v9 = vpack.c.bf16 %v221_v7, %v221_v7 }
  0xdb   :  { %294 = vst.msk [vmem:[%s540_s3 + $0x14] sm:$0xf] %vm288_vm1, %v348_v8  ;;  %302 = vst.msk [vmem:[%s540_s3 + $0x34] sm:$0xf] %vm288_vm1, %v356_v9 }

// kernel: _forward_impl.9
= control target key start
LH: loop header
LB: loop body
LE: loop exit
PB: predicated region body
PF: predicated region fallthrough
CT: control target
= control target key end

     0   :  { %vm137_vm0 = vcmask 31744   ;;  %s1302_s19 = smov 124   ;;  %vm186_vm1 = vcmask 1041408   ;;  %vm1042_vm2 = vcmask 125952   ;;  %vm736_vm3 = vcmask 130048   ;;  %s1999_s0 = inlined_call_operand.vmem [shape: bf16[256,8], index: 0, kind: input, shape index: {}]   ;;  %s2000_s1 = inlined_call_operand.vmem [shape: bf16[4,16], index: 1, kind: input, shape index: {}]   ;;  %s2001_s2 = inlined_call_operand.vmem [shape: f32[1,16], index: 2, kind: input, shape index: {}]   ;;  %s2002_s4 = inlined_call_operand.vmem [shape: bf16[128,16], index: 4, kind: output, shape index: {1}]   ;;  %s2003_s3 = inlined_call_operand.vmem [shape: bf16[256,32], index: 3, kind: output, shape index: {0}]  }
   0x1   :  { %v1286_v0 = vld [vmem:[%s1999_s0] sm:$0xff]   ;;  %v1287_v1 = vld [vmem:[%s1999_s0 + $0x8] sm:$0xff]   ;;  %v1288_v2 = vld [vmem:[%s1999_s0 + $0x10] sm:$0xff]   ;;  %vm897_vm4 = vcmask 257024  }
   0x2   :  { %383 = vrot.lane.b32.xlu0 %v1286_v0, %s1302_s19  ;;  %1216 = vmatprep.mubr.msk.bf16.mxu0 %vm137_vm0, %v1286_v0  ;;  %v1289_v3 = vld [vmem:[%s1999_s0 + $0x18] sm:$0xff]   ;;  %v1290_v4 = vld [vmem:[%s1999_s0 + $0x20] sm:$0xff]   ;;  %v1291_v5 = vld [vmem:[%s1999_s0 + $0x28] sm:$0xff]  }
   0x3   :  { %387 = vrot.lane.b32.xlu1 %v1288_v2, %s1302_s19  ;;  %v1292_v6 = vld [vmem:[%s1999_s0 + $0x30] sm:$0xff]   ;;  %v1293_v7 = vld [vmem:[%s1999_s0 + $0x38] sm:$0xff]   ;;  %v1294_v8 = vld [vmem:[%s1999_s0 + $0x40] sm:$0xff]  }
   0x4   :  { %v1295_v9 = vld [vmem:[%s1999_s0 + $0x48] sm:$0xff]   ;;  %v49_v10 = vld [vmem:[%s2000_s1] sm:$0x3]  ;;  %v1296_v12 = vld [vmem:[%s1999_s0 + $0x50] sm:$0xff]  }
   0x5   :  { %1282 = vmatprep.subr.msk.bf16.mxu0 %vm186_vm1, %v49_v10  ;;  %1283 = vmatprep.subr.msk.bf16.mxu1 %vm186_vm1, %v49_v10  ;;  %v188_v11 = vsel %vm186_vm1, %v49_v10, 0  ;;  %v1297_v13 = vld [vmem:[%s1999_s0 + $0x58] sm:$0xff]   ;;  %v1298_v14 = vld [vmem:[%s1999_s0 + $0x60] sm:$0xff]   ;;  %v1299_v15 = vld [vmem:[%s1999_s0 + $0x68] sm:$0xff]  }
   0x6   :  { %385 = vrot.lane.b32.xlu0 %v1287_v1, %s1302_s19  ;;  %1215 = vmatpush3.bf16.msra.mxu0 %v188_v11  ;;  %v1300_v16 = vld [vmem:[%s1999_s0 + $0x70] sm:$0xff]   ;;  %v1301_v17 = vld [vmem:[%s1999_s0 + $0x78] sm:$0xff]   ;;  %v1449_v51 = vld [vmem:[%s2001_s2] ss:$0 sm:$0xff]  ;;  %s1303_s2 = smov 16  }
   0x7   :  { %389 = vrot.lane.b32.xlu1 %v1289_v3, %s1302_s19  ;;  %1249 = vmatpush3.bf16.msra.mxu1 %v188_v11 }
   0x9   :  { %1217 = vmatmul.mubr.msk.bf16.vlgmr.msra.gmra.mxu0 %vm137_vm0, %v1287_v1 }
   0xa   :  { %391 = vrot.lane.b32.xlu0 %v1290_v4, %s1302_s19  ;;  %1220 = vmatprep.mubr.msk.bf16.mxu0 %vm137_vm0, %v1288_v2 }
   0xb   :  { %393 = vrot.lane.b32.xlu1 %v1291_v5, %s1302_s19 }
   0xe   :  { %395 = vrot.lane.b32.xlu0 %v1292_v6, %s1302_s19 }
   0xf   :  { %397 = vrot.lane.b32.xlu1 %v1293_v7, %s1302_s19 }
  0x11   :  { %1221 = vmatmul.mubr.msk.bf16.gmra.mxu0 %vm137_vm0, %v1289_v3 }
  0x12   :  { %399 = vrot.lane.b32.xlu0 %v1294_v8, %s1302_s19  ;;  %1224 = vmatprep.mubr.msk.bf16.mxu0 %vm137_vm0, %v1290_v4 }
  0x13   :  { %401 = vrot.lane.b32.xlu1 %v1295_v9, %s1302_s19 }
  0x16   :  { %403 = vrot.lane.b32.xlu0 %v1296_v12, %s1302_s19 }
  0x17   :  { %405 = vrot.lane.b32.xlu1 %v1297_v13, %s1302_s19 }
  0x19   :  { %1225 = vmatmul.mubr.msk.bf16.gmra.mxu0 %vm137_vm0, %v1291_v5 }
  0x1a   :  { %407 = vrot.lane.b32.xlu0 %v1298_v14, %s1302_s19  ;;  %1228 = vmatprep.mubr.msk.bf16.mxu0 %vm137_vm0, %v1292_v6 }
  0x1b   :  { %409 = vrot.lane.b32.xlu1 %v1299_v15, %s1302_s19 }
  0x1e   :  { %411 = vrot.lane.b32.xlu0 %v1300_v16, %s1302_s19 }
  0x1f   :  { %413 = vrot.lane.b32.xlu1 %v1301_v17, %s1302_s19 }
  0x21   :  { %1229 = vmatmul.mubr.msk.bf16.gmra.mxu0 %vm137_vm0, %v1293_v7 }
  0x22   :  { %1232 = vmatprep.mubr.msk.bf16.mxu0 %vm137_vm0, %v1294_v8 }
  0x29   :  { %1233 = vmatmul.mubr.msk.bf16.gmra.mxu0 %vm137_vm0, %v1295_v9 }
  0x2a   :  { %1236 = vmatprep.mubr.msk.bf16.mxu0 %vm137_vm0, %v1296_v12 }
  0x31   :  { %1237 = vmatmul.mubr.msk.bf16.gmra.mxu0 %vm137_vm0, %v1297_v13 }
  0x32   :  { %1240 = vmatprep.mubr.msk.bf16.mxu0 %vm137_vm0, %v1298_v14 }
  0x39   :  { %1241 = vmatmul.mubr.msk.bf16.gmra.mxu0 %vm137_vm0, %v1299_v15 }
  0x3a   :  { %1244 = vmatprep.mubr.msk.bf16.mxu0 %vm137_vm0, %v1300_v16 }
  0x41   :  { %1245 = vmatmul.mubr.msk.bf16.gmra.mxu0 %vm137_vm0, %v1301_v17 }
  0x74   :  { %v384_v18 = vpop.permute.xlu0 %383 }
  0x75   :  { %1250 = vmatprep.mubr.msk.bf16.mxu1 %vm137_vm0, %v384_v18  ;;  %v388_v19 = vpop.permute.xlu1 %387 }
  0x78   :  { %v386_v20 = vpop.permute.xlu0 %385 }
  0x79   :  { %1251 = vmatmul.mubr.msk.bf16.vlgmr.msra.gmra.mxu1 %vm137_vm0, %v386_v20  ;;  %v390_v21 = vpop.permute.xlu1 %389 }
  0x7a   :  { %1254 = vmatprep.mubr.msk.bf16.mxu1 %vm137_vm0, %v388_v19 }
  0x7c   :  { %v392_v22 = vpop.permute.xlu0 %391 }
  0x7d   :  { %v394_v23 = vpop.permute.xlu1 %393 }
  0x80   :  { %v396_v24 = vpop.permute.xlu0 %395 }
  0x81   :  { %1255 = vmatmul.mubr.msk.bf16.gmra.mxu1 %vm137_vm0, %v390_v21  ;;  %v398_v25 = vpop.permute.xlu1 %397 }
  0x82   :  { %1258 = vmatprep.mubr.msk.bf16.mxu1 %vm137_vm0, %v392_v22 }
  0x84   :  { %v400_v26 = vpop.permute.xlu0 %399 }
  0x85   :  { %v402_v27 = vpop.permute.xlu1 %401 }
  0x88   :  { %v404_v28 = vpop.permute.xlu0 %403 }
  0x89   :  { %1259 = vmatmul.mubr.msk.bf16.gmra.mxu1 %vm137_vm0, %v394_v23  ;;  %v406_v29 = vpop.permute.xlu1 %405 }
  0x8a   :  { %1262 = vmatprep.mubr.msk.bf16.mxu1 %vm137_vm0, %v396_v24 }
  0x8c   :  { %v408_v30 = vpop.permute.xlu0 %407 }
  0x8d   :  { %v410_v31 = vpop.permute.xlu1 %409 }
  0x90   :  { %v412_v32 = vpop.permute.xlu0 %411 }
  0x91   :  { %1263 = vmatmul.mubr.msk.bf16.gmra.mxu1 %vm137_vm0, %v398_v25  ;;  %v414_v33 = vpop.permute.xlu1 %413 }
  0x92   :  { %1266 = vmatprep.mubr.msk.bf16.mxu1 %vm137_vm0, %v400_v26 }
  0x99   :  { %1267 = vmatmul.mubr.msk.bf16.gmra.mxu1 %vm137_vm0, %v402_v27 }
  0x9a   :  { %1270 = vmatprep.mubr.msk.bf16.mxu1 %vm137_vm0, %v404_v28 }
  0xa1   :  { %1271 = vmatmul.mubr.msk.bf16.gmra.mxu1 %vm137_vm0, %v406_v29 }
  0xa2   :  { %1274 = vmatprep.mubr.msk.bf16.mxu1 %vm137_vm0, %v408_v30 }
  0xa9   :  { %1275 = vmatmul.mubr.msk.bf16.gmra.mxu1 %vm137_vm0, %v410_v31 }
  0xaa   :  { %1278 = vmatprep.mubr.msk.bf16.mxu1 %vm137_vm0, %v412_v32 }
  0xb1   :  { %1279 = vmatmul.mubr.msk.bf16.gmra.mxu1 %vm137_vm0, %v414_v33 }
  0xc9   :  { %v1218_v34 = vpop.f32.mrf.mxu0 }
  0xca   :  { %v1454_v53 = vadd.f32 %v1218_v34, %v1449_v51 }
  0xcb   :  { %v224_v35 = vpop.f32.mrf.mxu0 }
  0xcc   :  { %v1461_v57 = vadd.f32 %v1449_v51, %v224_v35  ;;  %v353_v62 = vmax.f32 %v1454_v53, 0.0 }
  0xcd   :  { %v1219_v36 = vpop.f32.mrf.mxu0 }
  0xce   :  { %v1458_v56 = vadd.f32 %v1219_v36, %v1449_v51  ;;  %v351_v3 = vmax.f32 %v1461_v57, 0.0 }
  0xcf   :  { %v227_v37 = vpop.f32.mrf.mxu0 }
  0xd0   :  { %v1465_v60 = vadd.f32 %v1449_v51, %v227_v37  ;;  %v354_v1 = vmax.f32 %v1458_v56, 0.0 }
  0xd1   :  { %v1222_v38 = vpop.f32.mrf.mxu0 }
  0xd2   :  { %v352_v7 = vmax.f32 %v1465_v60, 0.0  ;;  %v1480_v11 = vadd.f32 %v1222_v38, %v1449_v51 }
  0xd3   :  { %v240_v39 = vpop.f32.mrf.mxu0 }
  0xd4   :  { %v1489_v18 = vadd.f32 %v1449_v51, %v240_v39  ;;  %v357_v26 = vmax.f32 %v1480_v11, 0.0 }
  0xd5   :  { %v1223_v40 = vpop.f32.mrf.mxu0 }
  0xd6   :  { %v1483_v13 = vadd.f32 %v1223_v40, %v1449_v51  ;;  %v355_v34 = vmax.f32 %v1489_v18, 0.0 }
  0xd7   :  { %v243_v41 = vpop.f32.mrf.mxu0 }
  0xd8   :  { %v1492_v20 = vadd.f32 %v1449_v51, %v243_v41  ;;  %v358_v32 = vmax.f32 %v1483_v13, 0.0 }
  0xd9   :  { %v1428_v42 = vpop.f32.mrf.mxu0 }
  0xda   :  { %v356_v35 = vmax.f32 %v1492_v20, 0.0  ;;  %v659_v57 = vpack.c.bf16 %v358_v32, %v357_v26 }
  0xdb   :  { %v1430_v43 = vpop.f32.mrf.mxu0 }
  0xdd   :  { %v1432_v44 = vpop.f32.mrf.mxu0 }
  0xdf   :  { %v1434_v45 = vpop.f32.mrf.mxu0 }
  0xe1   :  { %v1436_v46 = vpop.f32.mrf.mxu0 }
  0xe3   :  { %v1438_v47 = vpop.f32.mrf.mxu0 }
  0xe5   :  { %v1440_v48 = vpop.f32.mrf.mxu0 }
  0xe7   :  { %v1442_v49 = vpop.f32.mrf.mxu0 }
  0xe9   :  { %v1444_v50 = vpop.f32.mrf.mxu0 }
  0xeb   :  { %v1451_v52 = vpop.f32.mrf.mxu0 }
  0xed   :  { %v1467_v61 = vpop.f32.mrf.mxu0 }
  0xef   :  { %v1475_v9 = vpop.f32.mrf.mxu0 }
  0xf1   :  { %v1499_v25 = vpop.f32.mrf.mxu0 }
  0xf3   :  { %v1513_v41 = vpop.f32.mrf.mxu0 }
 0x139   :  { %v1252_v54 = vpop.f32.mrf.mxu1 }
 0x13a   :  { %v506_v55 = vadd.f32 %v1252_v54, %v1449_v51 }
 0x13b   :  { %v497_v58 = vpop.f32.mrf.mxu1 }
 0x13c   :  { %v498_v59 = vadd.f32 %v1449_v51, %v497_v58  ;;  %v626_v63 = vmax.f32 %v506_v55, 0.0  ;;  %v1519_v55 = vadd.f32 %v1428_v42, %v1449_v51  ;;  %v1534_v42 = vadd.f32 %v1449_v51, %v1430_v43 }
 0x13d   :  { %v1253_v0 = vpop.f32.mrf.mxu1 }
 0x13e   :  { %v509_v2 = vadd.f32 %v1253_v0, %v1449_v51  ;;  %v624_v5 = vmax.f32 %v498_v59, 0.0  ;;  %v932_v10 = vmax.f32 %v353_v62, %v626_v63  ;;  %v1523_v59 = vadd.f32 %v1432_v44, %v1449_v51 }
 0x13f   :  { %v500_v4 = vpop.f32.mrf.mxu1  ;;  %v1538_v44 = vadd.f32 %v1449_v51, %v1434_v45  ;;  %v361_v43 = vmax.f32 %v1519_v55, 0.0 }
 0x140   :  { %v627_v6 = vmax.f32 %v509_v2, 0.0  ;;  %v501_v8 = vadd.f32 %v1449_v51, %v500_v4  ;;  %v930_v21 = vmax.f32 %v351_v3, %v624_v5 }
 0x141   :  { %v1256_v12 = vpop.f32.mrf.mxu1 }
 0x142   :  { %v673_v14 = vpack.c.bf16 %v627_v6, %v626_v63  ;;  %v933_v15 = vmax.f32 %v354_v1, %v627_v6  ;;  %v625_v16 = vmax.f32 %v501_v8, 0.0  ;;  %v522_v17 = vadd.f32 %v1256_v12, %v1449_v51 }
 0x143   :  { %v513_v19 = vpop.f32.mrf.mxu1 }
 0x144   :  { %v963_v22 = vmax.f32 %v932_v10, %v933_v15  ;;  %v672_v23 = vpack.c.bf16 %v625_v16, %v624_v5  ;;  %v931_v24 = vmax.f32 %v352_v7, %v625_v16  ;;  %706 = vrot.lane.b32.xlu1 %v673_v14, %s1303_s2  ;;  %v630_v27 = vmax.f32 %v522_v17, 0.0  ;;  %v1545_v14 = vpop.f32.mrf.mxu0 }
 0x145   :  { %v514_v28 = vadd.f32 %v1449_v51, %v513_v19  ;;  %v1257_v29 = vpop.f32.mrf.mxu1 }
 0x146   :  { %v1165_v30 = vpack.c.bf16 %v963_v22, %v963_v22  ;;  %v962_v31 = vmax.f32 %v930_v21, %v931_v24  ;;  %v525_v33 = vadd.f32 %v1257_v29, %v1449_v51  ;;  %704 = vrot.lane.b32.xlu0 %v672_v23, %s1303_s2  ;;  %v936_v54 = vmax.f32 %v357_v26, %v630_v27 }
 0x147   :  { %v516_v36 = vpop.f32.mrf.mxu1  ;;  %v628_v38 = vmax.f32 %v514_v28, 0.0  ;;  %v362_v21 = vmax.f32 %v1523_v59, 0.0  ;;  %v2019_v23 = vmax.f32 %v1534_v42, 0.0  ;;  %v2017_v24 = vmax.f32 %v1538_v44, 0.0 }
 0x148   :  { %1044 = vst.msk [vmem:[%s2002_s4 + $0x4] sm:$0xf] %vm1042_vm2, %v1165_v30  ;;  %v1164_v37 = vpack.c.bf16 %v962_v31, %v962_v31  ;;  %v631_v39 = vmax.f32 %v525_v33, 0.0  ;;  %v517_v40 = vadd.f32 %v1449_v51, %v516_v36  ;;  %v1559_v33 = vpop.f32.mrf.mxu0  ;;  %v2020_v26 = vmax.f32 %v1534_v42, 0.0 }
 0x149   :  { %v1260_v58 = vpop.f32.mrf.mxu1  ;;  %v934_v6 = vmax.f32 %v355_v34, %v628_v38  ;;  %v661_v18 = vpack.c.bf16 %v362_v21, %v361_v43 }
 0x14a   :  { %1043 = vst.msk [vmem:[%s2002_s4] sm:$0xf] %vm1042_vm2, %v1164_v37  ;;  %v675_v63 = vpack.c.bf16 %v631_v39, %v630_v27  ;;  %v937_v0 = vmax.f32 %v358_v32, %v631_v39  ;;  %v629_v2 = vmax.f32 %v517_v40, 0.0  ;;  %v538_v4 = vadd.f32 %v1260_v58, %v1449_v51 }
 0x14b   :  { %v529_v5 = vpop.f32.mrf.mxu1  ;;  %v1565_v37 = vadd.f32 %v1436_v46, %v1449_v51  ;;  %v1569_v39 = vadd.f32 %v1440_v48, %v1449_v51  ;;  %v1580_v46 = vadd.f32 %v1449_v51, %v1438_v47  ;;  %v1584_v48 = vadd.f32 %v1449_v51, %v1442_v49 }
 0x14c   :  { %v965_v8 = vmax.f32 %v936_v54, %v937_v0  ;;  %v674_v10 = vpack.c.bf16 %v629_v2, %v628_v38  ;;  %v935_v12 = vmax.f32 %v356_v35, %v629_v2  ;;  %710 = vrot.lane.b32.xlu1 %v675_v63, %s1303_s2  ;;  %v634_v15 = vmax.f32 %v538_v4, 0.0 }
 0x14d   :  { %v530_v16 = vadd.f32 %v1449_v51, %v529_v5  ;;  %v1261_v17 = vpop.f32.mrf.mxu1  ;;  %v2013_v47 = vmax.f32 %v1565_v37, 0.0  ;;  %v2021_v32 = vmax.f32 %v1538_v44, 0.0  ;;  %v2022_v42 = vmax.f32 %v1565_v37, 0.0 }
 0x14e   :  { %v1167_v45 = vpack.c.bf16 %v965_v8, %v965_v8  ;;  %v964_v19 = vmax.f32 %v934_v6, %v935_v12  ;;  %v541_v22 = vadd.f32 %v1261_v17, %v1449_v51  ;;  %708 = vrot.lane.b32.xlu0 %v674_v10, %s1303_s2  ;;  %v940_v36 = vmax.f32 %v361_v43, %v634_v15  ;;  %v1591_v8 = vpop.f32.mrf.mxu0 }
 0x14f   :  { %v532_v27 = vpop.f32.mrf.mxu1  ;;  %v632_v29 = vmax.f32 %v530_v16, 0.0  ;;  %v2012_v17 = vmax.f32 %v1569_v39, 0.0  ;;  %v2023_v44 = vmax.f32 %v1569_v39, 0.0 }
 0x150   :  { %1046 = vst.msk [vmem:[%s2002_s4 + $0xc] sm:$0xf] %vm1042_vm2, %v1167_v45  ;;  %v1166_v28 = vpack.c.bf16 %v964_v19, %v964_v19  ;;  %v635_v30 = vmax.f32 %v541_v22, 0.0  ;;  %v533_v31 = vadd.f32 %v1449_v51, %v532_v27  ;;  %v2007_v19 = vmax.f32 %v1580_v46, 0.0 }
 0x151   :  { %v1264_v38 = vpop.f32.mrf.mxu1  ;;  %v938_v2 = vmax.f32 %v2019_v23, %v632_v29  ;;  %v2006_v22 = vmax.f32 %v1584_v48, 0.0  ;;  %v663_v43 = vpack.c.bf16 %v2023_v44, %v2022_v42 }
 0x152   :  { %1045 = vst.msk [vmem:[%s2002_s4 + $0x8] sm:$0xf] %vm1042_vm2, %v1166_v28  ;;  %v677_v40 = vpack.c.bf16 %v635_v30, %v634_v15  ;;  %v941_v54 = vmax.f32 %v362_v21, %v635_v30  ;;  %v633_v58 = vmax.f32 %v533_v31, 0.0  ;;  %v554_v63 = vadd.f32 %v1264_v38, %v1449_v51 }
 0x153   :  { %v545_v0 = vpop.f32.mrf.mxu1 }
 0x154   :  { %v967_v4 = vmax.f32 %v940_v36, %v941_v54  ;;  %v676_v5 = vpack.c.bf16 %v633_v58, %v632_v29  ;;  %v939_v6 = vmax.f32 %v2017_v24, %v633_v58  ;;  %714 = vrot.lane.b32.xlu1 %v677_v40, %s1303_s2  ;;  %v638_v10 = vmax.f32 %v554_v63, 0.0  ;;  %v1605_v36 = vpop.f32.mrf.mxu0 }
 0x155   :  { %v546_v12 = vadd.f32 %v1449_v51, %v545_v0  ;;  %v1265_v15 = vpop.f32.mrf.mxu1  ;;  %v1611_v40 = vadd.f32 %v1444_v50, %v1449_v51  ;;  %v1615_v58 = vadd.f32 %v1467_v61, %v1449_v51  ;;  %v1626_v50 = vadd.f32 %v1449_v51, %v1451_v52 }
 0x156   :  { %v1169_v49 = vpack.c.bf16 %v967_v4, %v967_v4  ;;  %v966_v16 = vmax.f32 %v938_v2, %v939_v6  ;;  %v557_v45 = vadd.f32 %v1265_v15, %v1449_v51  ;;  %712 = vrot.lane.b32.xlu0 %v676_v5, %s1303_s2  ;;  %v944_v38 = vmax.f32 %v2013_v47, %v638_v10 }
 0x157   :  { %v548_v27 = vpop.f32.mrf.mxu1  ;;  %v636_v29 = vmax.f32 %v546_v12, 0.0  ;;  %v1630_v61 = vadd.f32 %v1449_v51, %v1475_v9 }
 0x158   :  { %1048 = vst.msk [vmem:[%s2002_s4 + $0x14] sm:$0xf] %vm1042_vm2, %v1169_v49  ;;  %v1168_v28 = vpack.c.bf16 %v966_v16, %v966_v16  ;;  %v639_v30 = vmax.f32 %v557_v45, 0.0  ;;  %v549_v31 = vadd.f32 %v1449_v51, %v548_v27  ;;  %v1243_v49 = vpop.f32.mrf.mxu0  ;;  %v2005_v16 = vmax.f32 %v1611_v40, 0.0 }
 0x159   :  { %v1268_v54 = vpop.f32.mrf.mxu1  ;;  %v942_v6 = vmax.f32 %v2007_v19, %v636_v29 }
 0x15a   :  { %1047 = vst.msk [vmem:[%s2002_s4 + $0x10] sm:$0xf] %vm1042_vm2, %v1168_v28  ;;  %v679_v63 = vpack.c.bf16 %v639_v30, %v638_v10  ;;  %v945_v0 = vmax.f32 %v2012_v17, %v639_v30  ;;  %v637_v2 = vmax.f32 %v549_v31, 0.0  ;;  %v570_v4 = vadd.f32 %v1268_v54, %v1449_v51 }
 0x15b   :  { %v561_v5 = vpop.f32.mrf.mxu1  ;;  %v2004_v30 = vmax.f32 %v1615_v58, 0.0 }
 0x15c   :  { %v969_v12 = vmax.f32 %v944_v38, %v945_v0  ;;  %v678_v10 = vpack.c.bf16 %v637_v2, %v636_v29  ;;  %v943_v15 = vmax.f32 %v2006_v22, %v637_v2  ;;  %718 = vrot.lane.b32.xlu1 %v679_v63, %s1303_s2  ;;  %v642_v52 = vmax.f32 %v570_v4, 0.0 }
 0x15d   :  { %v562_v45 = vadd.f32 %v1449_v51, %v561_v5  ;;  %v1269_v27 = vpop.f32.mrf.mxu1  ;;  %v2008_v29 = vmax.f32 %v1626_v50, 0.0  ;;  %v2010_v38 = vmax.f32 %v1630_v61, 0.0  ;;  %v323_v5 = vpop.f32.mrf.mxu0 }
 0x15e   :  { %v1171_v28 = vpack.c.bf16 %v969_v12, %v969_v12  ;;  %v968_v9 = vmax.f32 %v942_v6, %v943_v15  ;;  %v573_v31 = vadd.f32 %v1269_v27, %v1449_v51  ;;  %716 = vrot.lane.b32.xlu0 %v678_v10, %s1303_s2  ;;  %v948_v6 = vmax.f32 %v2005_v16, %v642_v52 }
 0x15f   :  { %v564_v54 = vpop.f32.mrf.mxu1  ;;  %v640_v0 = vmax.f32 %v562_v45, 0.0  ;;  %v1653_v12 = vadd.f32 %v1499_v25, %v1449_v51  ;;  %v1657_v15 = vadd.f32 %v1545_v14, %v1449_v51  ;;  %v1668_v25 = vadd.f32 %v1449_v51, %v1513_v41 }
 0x160   :  { %1050 = vst.msk [vmem:[%s2002_s4 + $0x1c] sm:$0xf] %vm1042_vm2, %v1171_v28  ;;  %v1170_v63 = vpack.c.bf16 %v968_v9, %v968_v9  ;;  %v643_v2 = vmax.f32 %v573_v31, 0.0  ;;  %v565_v4 = vadd.f32 %v1449_v51, %v564_v54  ;;  %v1672_v14 = vadd.f32 %v1449_v51, %v1559_v33 }
 0x161   :  { %v1272_v10 = vpop.f32.mrf.mxu1  ;;  %v946_v54 = vmax.f32 %v2008_v29, %v640_v0  ;;  %v2011_v19 = vmax.f32 %v1657_v15, 0.0 }
 0x162   :  { %1049 = vst.msk [vmem:[%s2002_s4 + $0x18] sm:$0xf] %vm1042_vm2, %v1170_v63  ;;  %v681_v45 = vpack.c.bf16 %v643_v2, %v642_v52  ;;  %v949_v27 = vmax.f32 %v2004_v30, %v643_v2  ;;  %v641_v28 = vmax.f32 %v565_v4, 0.0  ;;  %v586_v9 = vadd.f32 %v1272_v10, %v1449_v51  ;;  %v1246_v4 = vpop.f32.mrf.mxu0 }
 0x163   :  { %v577_v31 = vpop.f32.mrf.mxu1  ;;  %v2009_v10 = vmax.f32 %v1653_v12, 0.0 }
 0x164   :  { %v971_v63 = vmax.f32 %v948_v6, %v949_v27  ;;  %v680_v52 = vpack.c.bf16 %v641_v28, %v640_v0  ;;  %v947_v2 = vmax.f32 %v2010_v38, %v641_v28  ;;  %722 = vrot.lane.b32.xlu1 %v681_v45, %s1303_s2  ;;  %v646_v41 = vmax.f32 %v586_v9, 0.0 }
 0x165   :  { %v578_v30 = vadd.f32 %v1449_v51, %v577_v31  ;;  %v1273_v16 = vpop.f32.mrf.mxu1  ;;  %v2014_v0 = vmax.f32 %v1668_v25, 0.0  ;;  %v2016_v6 = vmax.f32 %v1672_v14, 0.0 }
 0x166   :  { %v1173_v22 = vpack.c.bf16 %v971_v63, %v971_v63  ;;  %v970_v33 = vmax.f32 %v946_v54, %v947_v2  ;;  %v589_v29 = vadd.f32 %v1273_v16, %v1449_v51  ;;  %720 = vrot.lane.b32.xlu0 %v680_v52, %s1303_s2  ;;  %v336_v54 = vpop.f32.mrf.mxu0  ;;  %v952_v16 = vmax.f32 %v2009_v10, %v646_v41 }
 0x167   :  { %v580_v45 = vpop.f32.mrf.mxu1  ;;  %v644_v28 = vmax.f32 %v578_v30, 0.0  ;;  %v1695_v63 = vadd.f32 %v1591_v8, %v1449_v51  ;;  %v1698_v2 = vadd.f32 %v1243_v49, %v1449_v51  ;;  %v1709_v8 = vadd.f32 %v1449_v51, %v1605_v36 }
 0x168   :  { %1052 = vst.msk [vmem:[%s2002_s4 + $0x24] sm:$0xf] %vm1042_vm2, %v1173_v22  ;;  %v1172_v27 = vpack.c.bf16 %v970_v33, %v970_v33  ;;  %v647_v9 = vmax.f32 %v589_v29, 0.0  ;;  %v581_v31 = vadd.f32 %v1449_v51, %v580_v45  ;;  %v1712_v49 = vadd.f32 %v1449_v51, %v323_v5 }
 0x169   :  { %v1276_v52 = vpop.f32.mrf.mxu1  ;;  %v950_v10 = vmax.f32 %v2014_v0, %v644_v28  ;;  %v2018_v47 = vmax.f32 %v1698_v2, 0.0 }
 0x16a   :  { %1051 = vst.msk [vmem:[%s2002_s4 + $0x20] sm:$0xf] %vm1042_vm2, %v1172_v27  ;;  %v683_v22 = vpack.c.bf16 %v647_v9, %v646_v41  ;;  %v953_v30 = vmax.f32 %v2011_v19, %v647_v9  ;;  %v645_v29 = vmax.f32 %v581_v31, 0.0  ;;  %v602_v33 = vadd.f32 %v1276_v52, %v1449_v51  ;;  %v1247_v9 = vpop.f32.mrf.mxu0 }
 0x16b   :  { %v593_v45 = vpop.f32.mrf.mxu1  ;;  %v2015_v31 = vmax.f32 %v1695_v63, 0.0 }
 0x16c   :  { %v973_v38 = vmax.f32 %v952_v16, %v953_v30  ;;  %v682_v27 = vpack.c.bf16 %v645_v29, %v644_v28  ;;  %v951_v41 = vmax.f32 %v2016_v6, %v645_v29  ;;  %726 = vrot.lane.b32.xlu1 %v683_v22, %s1303_s2  ;;  %v650_v52 = vmax.f32 %v602_v33, 0.0  ;;  %v339_v33 = vpop.f32.mrf.mxu0 }
 0x16d   :  { %v594_v36 = vadd.f32 %v1449_v51, %v593_v45  ;;  %v1277_v19 = vpop.f32.mrf.mxu1  ;;  %v375_v28 = vmax.f32 %v1709_v8, 0.0  ;;  %v376_v16 = vmax.f32 %v1712_v49, 0.0  ;;  %v1734_v45 = vadd.f32 %v1246_v4, %v1449_v51 }
 0x16e   :  { %v1175_v17 = vpack.c.bf16 %v973_v38, %v973_v38  ;;  %v972_v5 = vmax.f32 %v950_v10, %v951_v41  ;;  %v605_v0 = vadd.f32 %v1277_v19, %v1449_v51  ;;  %724 = vrot.lane.b32.xlu0 %v682_v27, %s1303_s2  ;;  %v956_v19 = vmax.f32 %v2015_v31, %v650_v52 }
 0x16f   :  { %v596_v22 = vpop.f32.mrf.mxu1  ;;  %v648_v29 = vmax.f32 %v594_v36, 0.0  ;;  %v1737_v41 = vadd.f32 %v1247_v9, %v1449_v51  ;;  %v1750_v31 = vadd.f32 %v1449_v51, %v339_v33 }
 0x170   :  { %1054 = vst.msk [vmem:[%s2002_s4 + $0x2c] sm:$0xf] %vm1042_vm2, %v1175_v17  ;;  %v1174_v30 = vpack.c.bf16 %v972_v5, %v972_v5  ;;  %v651_v38 = vmax.f32 %v605_v0, 0.0  ;;  %v597_v10 = vadd.f32 %v1449_v51, %v596_v22  ;;  %v1747_v22 = vadd.f32 %v1449_v51, %v336_v54 }
 0x171   :  { %v1280_v27 = vpop.f32.mrf.mxu1  ;;  %v954_v9 = vmax.f32 %v375_v28, %v648_v29  ;;  %v382_v54 = vmax.f32 %v1737_v41, 0.0 }
 0x172   :  { %1053 = vst.msk [vmem:[%s2002_s4 + $0x28] sm:$0xf] %vm1042_vm2, %v1174_v30  ;;  %v685_v17 = vpack.c.bf16 %v651_v38, %v650_v52  ;;  %v957_v0 = vmax.f32 %v2018_v47, %v651_v38  ;;  %v649_v36 = vmax.f32 %v597_v10, 0.0  ;;  %v618_v5 = vadd.f32 %v1280_v27, %v1449_v51 }
 0x173   :  { %v609_v4 = vpop.f32.mrf.mxu1  ;;  %v381_v30 = vmax.f32 %v1734_v45, 0.0 }
 0x174   :  { %v975_v6 = vmax.f32 %v956_v19, %v957_v0  ;;  %v684_v24 = vpack.c.bf16 %v649_v36, %v648_v29  ;;  %v955_v52 = vmax.f32 %v376_v16, %v649_v36  ;;  %730 = vrot.lane.b32.xlu1 %v685_v17, %s1303_s2  ;;  %v610_v38 = vadd.f32 %v1449_v51, %v609_v4 }
 0x175   :  { %v1281_v10 = vpop.f32.mrf.mxu1  ;;  %v654_v47 = vmax.f32 %v618_v5, 0.0  ;;  %v379_v29 = vmax.f32 %v1747_v22, 0.0  ;;  %v380_v19 = vmax.f32 %v1750_v31, 0.0  ;;  %v671_v8 = vpack.c.bf16 %v382_v54, %v381_v30 }
 0x176   :  { %v1177_v27 = vpack.c.bf16 %v975_v6, %v975_v6  ;;  %v974_v33 = vmax.f32 %v954_v9, %v955_v52  ;;  %v621_v23 = vadd.f32 %v1281_v10, %v1449_v51  ;;  %728 = vrot.lane.b32.xlu0 %v684_v24, %s1303_s2  ;;  %v652_v36 = vmax.f32 %v610_v38, 0.0 }
 0x177   :  { %v612_v0 = vpop.f32.mrf.mxu1  ;;  %v960_v24 = vmax.f32 %v381_v30, %v654_v47 }
 0x178   :  { %1056 = vst.msk [vmem:[%s2002_s4 + $0x34] sm:$0xf] %vm1042_vm2, %v1177_v27  ;;  %v1176_v17 = vpack.c.bf16 %v974_v33, %v974_v33  ;;  %v655_v4 = vmax.f32 %v621_v23, 0.0  ;;  %v613_v6 = vadd.f32 %v1449_v51, %v612_v0  ;;  %v958_v10 = vmax.f32 %v379_v29, %v652_v36 }
 0x179   :  { %v657_v0 = vpack.c.bf16 %v354_v1, %v353_v62  ;;  %v658_v62 = vpack.c.bf16 %v356_v35, %v355_v34  ;;  %v660_v34 = vpack.c.bf16 %v2021_v32, %v2020_v26 }
 0x17a   :  { %1055 = vst.msk [vmem:[%s2002_s4 + $0x30] sm:$0xf] %vm1042_vm2, %v1176_v17  ;;  %v687_v5 = vpack.c.bf16 %v655_v4, %v654_v47  ;;  %v961_v9 = vmax.f32 %v382_v54, %v655_v4  ;;  %v653_v52 = vmax.f32 %v613_v6, 0.0 }
 0x17c   :  { %v977_v38 = vmax.f32 %v960_v24, %v961_v9  ;;  %v686_v23 = vpack.c.bf16 %v653_v52, %v652_v36  ;;  %v959_v51 = vmax.f32 %v380_v19, %v653_v52  ;;  %734 = vrot.lane.b32.xlu1 %v687_v5, %s1303_s2  ;;  %v656_v36 = vpack.c.bf16 %v352_v7, %v351_v3 }
 0x17e   :  { %v1179_v27 = vpack.c.bf16 %v977_v38, %v977_v38  ;;  %v976_v33 = vmax.f32 %v958_v10, %v959_v51  ;;  %732 = vrot.lane.b32.xlu0 %v686_v23, %s1303_s2 }
 0x180   :  { %1058 = vst.msk [vmem:[%s2002_s4 + $0x3c] sm:$0xf] %vm1042_vm2, %v1179_v27  ;;  %v1178_v47 = vpack.c.bf16 %v976_v33, %v976_v33  ;;  %v2024_v33 = vmax.f32 %v1580_v46, 0.0  ;;  %v2026_v46 = vmax.f32 %v1611_v40, 0.0 }
 0x182   :  { %1057 = vst.msk [vmem:[%s2002_s4 + $0x38] sm:$0xf] %vm1042_vm2, %v1178_v47  ;;  %v2025_v47 = vmax.f32 %v1584_v48, 0.0  ;;  %v2027_v48 = vmax.f32 %v1615_v58, 0.0 }
 0x1b6   :  { %v707_v17 = vpop.permute.xlu1 %706 }
 0x1b7   :  { %v742_v4 = vsel %vm736_vm3, %v657_v0, %v707_v17  ;;  %v662_v0 = vpack.c.bf16 %v2025_v47, %v2024_v33 }
 0x1b8   :  { %v1118_v6 = vcombine.low %v742_v4, %v742_v4  ;;  %v1119_v24 = vcombine.high %v742_v4, %v742_v4  ;;  %v705_v5 = vpop.permute.xlu0 %704 }
 0x1b9   :  { %v739_v9 = vsel %vm736_vm3, %v656_v36, %v705_v5  ;;  %v665_v5 = vpack.c.bf16 %v2027_v48, %v2026_v46 }
 0x1ba   :  { %900 = vst.msk [vmem:[%s2003_s3 + $0x8] sm:$0xf] %vm897_vm4, %v1118_v6  ;;  %901 = vst.msk [vmem:[%s2003_s3 + $0xc] sm:$0xf] %vm897_vm4, %v1119_v24  ;;  %v1116_v53 = vcombine.low %v739_v9, %v739_v9  ;;  %v1117_v56 = vcombine.high %v739_v9, %v739_v9 }
 0x1bc   :  { %898 = vst.msk [vmem:[%s2003_s3] sm:$0xf] %vm897_vm4, %v1116_v53  ;;  %899 = vst.msk [vmem:[%s2003_s3 + $0x4] sm:$0xf] %vm897_vm4, %v1117_v56  ;;  %v2028_v53 = vmax.f32 %v1626_v50, 0.0  ;;  %v2029_v56 = vmax.f32 %v1630_v61, 0.0 }
 0x1bd   :  { %v2030_v50 = vmax.f32 %v1653_v12, 0.0  ;;  %v2031_v61 = vmax.f32 %v1657_v15, 0.0 }
 0x1be   :  { %v711_v60 = vpop.permute.xlu1 %710 }
 0x1bf   :  { %v748_v1 = vsel %vm736_vm3, %v659_v57, %v711_v60  ;;  %v664_v57 = vpack.c.bf16 %v2029_v56, %v2028_v53 }
 0x1c0   :  { %v1122_v3 = vcombine.low %v748_v1, %v748_v1  ;;  %v1123_v7 = vcombine.high %v748_v1, %v748_v1  ;;  %v709_v52 = vpop.permute.xlu0 %708 }
 0x1c1   :  { %v745_v10 = vsel %vm736_vm3, %v658_v62, %v709_v52  ;;  %v667_v52 = vpack.c.bf16 %v2031_v61, %v2030_v50 }
 0x1c2   :  { %904 = vst.msk [vmem:[%s2003_s3 + $0x18] sm:$0xf] %vm897_vm4, %v1122_v3  ;;  %905 = vst.msk [vmem:[%s2003_s3 + $0x1c] sm:$0xf] %vm897_vm4, %v1123_v7  ;;  %v1120_v11 = vcombine.low %v745_v10, %v745_v10  ;;  %v1121_v13 = vcombine.high %v745_v10, %v745_v10 }
 0x1c4   :  { %902 = vst.msk [vmem:[%s2003_s3 + $0x10] sm:$0xf] %vm897_vm4, %v1120_v11  ;;  %903 = vst.msk [vmem:[%s2003_s3 + $0x14] sm:$0xf] %vm897_vm4, %v1121_v13  ;;  %v2032_v11 = vmax.f32 %v1668_v25, 0.0  ;;  %v2033_v13 = vmax.f32 %v1672_v14, 0.0 }
 0x1c5   :  { %v2034_v25 = vmax.f32 %v1695_v63, 0.0  ;;  %v2035_v14 = vmax.f32 %v1698_v2, 0.0 }
 0x1c6   :  { %v715_v20 = vpop.permute.xlu1 %714 }
 0x1c7   :  { %v754_v35 = vsel %vm736_vm3, %v661_v18, %v715_v20  ;;  %v666_v18 = vpack.c.bf16 %v2033_v13, %v2032_v11 }
 0x1c8   :  { %v1126_v38 = vcombine.low %v754_v35, %v754_v35  ;;  %v1127_v23 = vcombine.high %v754_v35, %v754_v35  ;;  %v713_v51 = vpop.permute.xlu0 %712 }
 0x1c9   :  { %v751_v27 = vsel %vm736_vm3, %v660_v34, %v713_v51  ;;  %v668_v51 = vpack.c.bf16 %v376_v16, %v375_v28  ;;  %v670_v28 = vpack.c.bf16 %v380_v19, %v379_v29 }
 0x1ca   :  { %908 = vst.msk [vmem:[%s2003_s3 + $0x28] sm:$0xf] %vm897_vm4, %v1126_v38  ;;  %909 = vst.msk [vmem:[%s2003_s3 + $0x2c] sm:$0xf] %vm897_vm4, %v1127_v23  ;;  %v1124_v55 = vcombine.low %v751_v27, %v751_v27  ;;  %v1125_v59 = vcombine.high %v751_v27, %v751_v27  ;;  %v669_v38 = vpack.c.bf16 %v2035_v14, %v2034_v25 }
 0x1cc   :  { %906 = vst.msk [vmem:[%s2003_s3 + $0x20] sm:$0xf] %vm897_vm4, %v1124_v55  ;;  %907 = vst.msk [vmem:[%s2003_s3 + $0x24] sm:$0xf] %vm897_vm4, %v1125_v59 }
 0x1ce   :  { %v719_v21 = vpop.permute.xlu1 %718 }
 0x1cf   :  { %v760_v17 = vsel %vm736_vm3, %v663_v43, %v719_v21 }
 0x1d0   :  { %v1130_v36 = vcombine.low %v760_v17, %v760_v17  ;;  %v1131_v4 = vcombine.high %v760_v17, %v760_v17  ;;  %v717_v6 = vpop.permute.xlu0 %716 }
 0x1d1   :  { %v757_v24 = vsel %vm736_vm3, %v662_v0, %v717_v6 }
 0x1d2   :  { %912 = vst.msk [vmem:[%s2003_s3 + $0x38] sm:$0xf] %vm897_vm4, %v1130_v36  ;;  %913 = vst.msk [vmem:[%s2003_s3 + $0x3c] sm:$0xf] %vm897_vm4, %v1131_v4  ;;  %v1128_v37 = vcombine.low %v757_v24, %v757_v24  ;;  %v1129_v39 = vcombine.high %v757_v24, %v757_v24 }
 0x1d4   :  { %910 = vst.msk [vmem:[%s2003_s3 + $0x30] sm:$0xf] %vm897_vm4, %v1128_v37  ;;  %911 = vst.msk [vmem:[%s2003_s3 + $0x34] sm:$0xf] %vm897_vm4, %v1129_v39 }
 0x1d6   :  { %v723_v9 = vpop.permute.xlu1 %722 }
 0x1d7   :  { %v766_v60 = vsel %vm736_vm3, %v665_v5, %v723_v9 }
 0x1d8   :  { %v1134_v62 = vcombine.low %v766_v60, %v766_v60  ;;  %v1135_v1 = vcombine.high %v766_v60, %v766_v60  ;;  %v721_v3 = vpop.permute.xlu0 %720 }
 0x1d9   :  { %v763_v7 = vsel %vm736_vm3, %v664_v57, %v721_v3 }
 0x1da   :  { %916 = vst.msk [vmem:[%s2003_s3 + $0x48] sm:$0xf] %vm897_vm4, %v1134_v62  ;;  %917 = vst.msk [vmem:[%s2003_s3 + $0x4c] sm:$0xf] %vm897_vm4, %v1135_v1  ;;  %v1132_v40 = vcombine.low %v763_v7, %v763_v7  ;;  %v1133_v58 = vcombine.high %v763_v7, %v763_v7 }
 0x1dc   :  { %914 = vst.msk [vmem:[%s2003_s3 + $0x40] sm:$0xf] %vm897_vm4, %v1132_v40  ;;  %915 = vst.msk [vmem:[%s2003_s3 + $0x44] sm:$0xf] %vm897_vm4, %v1133_v58 }
 0x1de   :  { %v727_v10 = vpop.permute.xlu1 %726 }
 0x1df   :  { %v772_v20 = vsel %vm736_vm3, %v667_v52, %v727_v10 }
 0x1e0   :  { %v1138_v26 = vcombine.low %v772_v20, %v772_v20  ;;  %v1139_v32 = vcombine.high %v772_v20, %v772_v20  ;;  %v725_v34 = vpop.permute.xlu0 %724 }
 0x1e1   :  { %v769_v35 = vsel %vm736_vm3, %v666_v18, %v725_v34 }
 0x1e2   :  { %920 = vst.msk [vmem:[%s2003_s3 + $0x58] sm:$0xf] %vm897_vm4, %v1138_v26  ;;  %921 = vst.msk [vmem:[%s2003_s3 + $0x5c] sm:$0xf] %vm897_vm4, %v1139_v32  ;;  %v1136_v12 = vcombine.low %v769_v35, %v769_v35  ;;  %v1137_v15 = vcombine.high %v769_v35, %v769_v35 }
 0x1e4   :  { %918 = vst.msk [vmem:[%s2003_s3 + $0x50] sm:$0xf] %vm897_vm4, %v1136_v12  ;;  %919 = vst.msk [vmem:[%s2003_s3 + $0x54] sm:$0xf] %vm897_vm4, %v1137_v15 }
 0x1e6   :  { %v731_v23 = vpop.permute.xlu1 %730 }
 0x1e7   :  { %v778_v27 = vsel %vm736_vm3, %v669_v38, %v731_v23 }
 0x1e8   :  { %v1142_v55 = vcombine.low %v778_v27, %v778_v27  ;;  %v1143_v59 = vcombine.high %v778_v27, %v778_v27  ;;  %v729_v42 = vpop.permute.xlu0 %728 }
 0x1e9   :  { %v775_v44 = vsel %vm736_vm3, %v668_v51, %v729_v42 }
 0x1ea   :  { %924 = vst.msk [vmem:[%s2003_s3 + $0x68] sm:$0xf] %vm897_vm4, %v1142_v55  ;;  %925 = vst.msk [vmem:[%s2003_s3 + $0x6c] sm:$0xf] %vm897_vm4, %v1143_v59  ;;  %v1140_v63 = vcombine.low %v775_v44, %v775_v44  ;;  %v1141_v2 = vcombine.high %v775_v44, %v775_v44 }
 0x1ec   :  { %922 = vst.msk [vmem:[%s2003_s3 + $0x60] sm:$0xf] %vm897_vm4, %v1140_v63  ;;  %923 = vst.msk [vmem:[%s2003_s3 + $0x64] sm:$0xf] %vm897_vm4, %v1141_v2 }
 0x1ee   :  { %v735_v49 = vpop.permute.xlu1 %734 }
 0x1ef   :  { %v784_v16 = vsel %vm736_vm3, %v671_v8, %v735_v49 }
 0x1f0   :  { %v1146_v43 = vcombine.low %v784_v16, %v784_v16  ;;  %v1147_v21 = vcombine.high %v784_v16, %v784_v16  ;;  %v733_v33 = vpop.permute.xlu0 %732 }
 0x1f1   :  { %v781_v47 = vsel %vm736_vm3, %v670_v28, %v733_v33 }
 0x1f2   :  { %928 = vst.msk [vmem:[%s2003_s3 + $0x78] sm:$0xf] %vm897_vm4, %v1146_v43  ;;  %929 = vst.msk [vmem:[%s2003_s3 + $0x7c] sm:$0xf] %vm897_vm4, %v1147_v21  ;;  %v1144_v45 = vcombine.low %v781_v47, %v781_v47  ;;  %v1145_v31 = vcombine.high %v781_v47, %v781_v47 }
 0x1f4   :  { %926 = vst.msk [vmem:[%s2003_s3 + $0x70] sm:$0xf] %vm897_vm4, %v1144_v45  ;;  %927 = vst.msk [vmem:[%s2003_s3 + $0x74] sm:$0xf] %vm897_vm4, %v1145_v31 }

// kernel: _forward_impl.13
= control target key start
LH: loop header
LB: loop body
LE: loop exit
PB: predicated region body
PF: predicated region fallthrough
CT: control target
= control target key end

     0   :  { %vm68_vm0 = vcmask 523264   ;;  %vm140_vm1 = vcmask 257024   ;;  %s243_s1 = inlined_call_operand.vmem [shape: bf16[64,32], index: 1, kind: input, shape index: {}]   ;;  %s244_s0 = inlined_call_operand.vmem [shape: bf16[32,64], index: 0, kind: input, shape index: {}]   ;;  %s245_s2 = inlined_call_operand.vmem [shape: f32[1,32], index: 2, kind: input, shape index: {}]   ;;  %s246_s3 = inlined_call_operand.vmem [shape: bf16[32,32], index: 3, kind: output, shape index: {}]  }
   0x1   :  { %v184_v0 = vld [vmem:[%s243_s1 + $0x18] sm:$0xff]   ;;  %v185_v1 = vld [vmem:[%s243_s1 + $0x10] sm:$0xff]   ;;  %v186_v2 = vld [vmem:[%s243_s1 + $0x8] sm:$0xff]  }
   0x2   :  { %172 = vmatprep.subr.bf16.mxu0 %v184_v0  ;;  %v188_v3 = vld [vmem:[%s244_s0] sm:$0xff]   ;;  %v189_v5 = vld [vmem:[%s244_s0 + $0x8] sm:$0xff]  }
   0x3   :  { %173 = vmatpush3.bf16.msra.mxu0 %v184_v0  ;;  %180 = vmatprep.mubr.msk.bf16.mxu0 %vm68_vm0, %v188_v3  ;;  %v187_v4 = vld [vmem:[%s243_s1] sm:$0xff]  }
   0x4   :  { %174 = vmatprep.subr.bf16.mxu0 %v185_v1  ;;  %v149_v6 = vld [vmem:[%s245_s2] ss:$0 sm:$0xff] }
   0x7   :  { %175 = vmatpush3.bf16.msra.mxu0 %v185_v1 }
   0x8   :  { %176 = vmatprep.subr.bf16.mxu0 %v186_v2 }
   0xb   :  { %177 = vmatpush3.bf16.msra.mxu0 %v186_v2 }
   0xc   :  { %178 = vmatprep.subr.bf16.mxu0 %v187_v4 }
   0xf   :  { %179 = vmatpush3.bf16.msra.mxu0 %v187_v4 }
  0x12   :  { %181 = vmatmul.mubr.msk.bf16.vlgmr.msra.gmra.mxu0 %vm68_vm0, %v189_v5 }
  0xd2   :  { %v182_v7 = vpop.f32.mrf.mxu0 }
  0xd3   :  { %v118_v8 = vadd.f32 %v182_v7, %v149_v6 }
  0xd4   :  { %v109_v9 = vpop.f32.mrf.mxu0 }
  0xd5   :  { %v164_v10 = vpack.c.bf16 %v118_v8, %v118_v8  ;;  %v110_v11 = vadd.f32 %v149_v6, %v109_v9 }
  0xd6   :  { %v183_v12 = vpop.f32.mrf.mxu0 }
  0xd7   :  { %143 = vst.msk [vmem:[%s246_s3 + $0x8] sm:$0xf] %vm140_vm1, %v164_v10  ;;  %v162_v13 = vpack.c.bf16 %v110_v11, %v110_v11  ;;  %v121_v14 = vadd.f32 %v183_v12, %v149_v6 }
  0xd8   :  { %v112_v15 = vpop.f32.mrf.mxu0 }
  0xd9   :  { %141 = vst.msk [vmem:[%s246_s3] sm:$0xf] %vm140_vm1, %v162_v13  ;;  %v165_v16 = vpack.c.bf16 %v121_v14, %v121_v14  ;;  %v113_v17 = vadd.f32 %v149_v6, %v112_v15 }
  0xdb   :  { %144 = vst.msk [vmem:[%s246_s3 + $0xc] sm:$0xf] %vm140_vm1, %v165_v16  ;;  %v163_v18 = vpack.c.bf16 %v113_v17, %v113_v17 }
  0xdd   :  { %142 = vst.msk [vmem:[%s246_s3 + $0x4] sm:$0xf] %vm140_vm1, %v163_v18 }

// kernel: _forward_impl.15
= control target key start
LH: loop header
LB: loop body
LE: loop exit
PB: predicated region body
PF: predicated region fallthrough
CT: control target
= control target key end

     0   :  { %vm94_vm0 = vcmask 261120   ;;  %vm280_vm1 = vcmask 125952   ;;  %s521_s1 = inlined_call_operand.vmem [shape: bf16[32,16], index: 1, kind: input, shape index: {}]   ;;  %s522_s0 = inlined_call_operand.vmem [shape: bf16[128,32], index: 0, kind: input, shape index: {}]   ;;  %s523_s2 = inlined_call_operand.vmem [shape: f32[1,16], index: 2, kind: input, shape index: {}]   ;;  %s524_s3 = inlined_call_operand.vmem [shape: bf16[128,16], index: 3, kind: output, shape index: {}]  }
   0x1   :  { %v386_v0 = vld [vmem:[%s521_s1 + $0x8] sm:$0xff]   ;;  %v387_v1 = vld [vmem:[%s521_s1] sm:$0xff]   ;;  %v392_v6 = vld [vmem:[%s522_s0 + $0x10] sm:$0xff]  }
   0x2   :  { %362 = vmatprep.subr.bf16.mxu0 %v386_v0  ;;  %382 = vmatprep.subr.bf16.mxu1 %v386_v0  ;;  %v388_v2 = vld [vmem:[%s522_s0] sm:$0xff]   ;;  %v390_v4 = vld [vmem:[%s522_s0 + $0x8] sm:$0xff]   ;;  %v393_v7 = vld [vmem:[%s522_s0 + $0x30] sm:$0xff]  }
   0x3   :  { %363 = vmatpush3.bf16.msra.mxu0 %v386_v0  ;;  %384 = vmatpush3.bf16.msra.mxu1 %v386_v0  ;;  %v389_v3 = vld [vmem:[%s522_s0 + $0x20] sm:$0xff]   ;;  %v391_v5 = vld [vmem:[%s522_s0 + $0x28] sm:$0xff]   ;;  %v394_v8 = vld [vmem:[%s522_s0 + $0x18] sm:$0xff]  }
   0x4   :  { %364 = vmatprep.subr.bf16.mxu0 %v387_v1  ;;  %383 = vmatprep.subr.bf16.mxu1 %v387_v1  ;;  %v395_v9 = vld [vmem:[%s522_s0 + $0x38] sm:$0xff]   ;;  %v301_v10 = vld [vmem:[%s523_s2] ss:$0 sm:$0xff] }
   0x5   :  { %366 = vmatprep.mubr.msk.bf16.mxu0 %vm94_vm0, %v388_v2  ;;  %374 = vmatprep.mubr.msk.bf16.mxu1 %vm94_vm0, %v389_v3 }
   0x7   :  { %365 = vmatpush3.bf16.msra.mxu0 %v387_v1  ;;  %385 = vmatpush3.bf16.msra.mxu1 %v387_v1 }
   0xa   :  { %367 = vmatmul.mubr.msk.bf16.vlgmr.msra.gmra.mxu0 %vm94_vm0, %v390_v4  ;;  %375 = vmatmul.mubr.msk.bf16.vlgmr.msra.gmra.mxu1 %vm94_vm0, %v391_v5 }
   0xb   :  { %370 = vmatprep.mubr.msk.bf16.mxu0 %vm94_vm0, %v392_v6  ;;  %378 = vmatprep.mubr.msk.bf16.mxu1 %vm94_vm0, %v393_v7 }
  0x12   :  { %371 = vmatmul.mubr.msk.bf16.gmra.mxu0 %vm94_vm0, %v394_v8  ;;  %379 = vmatmul.mubr.msk.bf16.gmra.mxu1 %vm94_vm0, %v395_v9 }
  0xca   :  { %v368_v11 = vpop.f32.mrf.mxu0  ;;  %v376_v12 = vpop.f32.mrf.mxu1 }
  0xcb   :  { %v162_v13 = vadd.f32 %v368_v11, %v301_v10  ;;  %v194_v14 = vadd.f32 %v376_v12, %v301_v10 }
  0xcc   :  { %v153_v15 = vpop.f32.mrf.mxu0  ;;  %v185_v16 = vpop.f32.mrf.mxu1 }
  0xcd   :  { %v338_v17 = vpack.c.bf16 %v162_v13, %v162_v13  ;;  %v346_v18 = vpack.c.bf16 %v194_v14, %v194_v14  ;;  %v154_v19 = vadd.f32 %v301_v10, %v153_v15  ;;  %v186_v20 = vadd.f32 %v301_v10, %v185_v16 }
  0xce   :  { %v369_v21 = vpop.f32.mrf.mxu0  ;;  %v377_v22 = vpop.f32.mrf.mxu1 }
  0xcf   :  { %283 = vst.msk [vmem:[%s524_s3 + $0x8] sm:$0xf] %vm280_vm1, %v338_v17  ;;  %291 = vst.msk [vmem:[%s524_s3 + $0x28] sm:$0xf] %vm280_vm1, %v346_v18  ;;  %v336_v23 = vpack.c.bf16 %v154_v19, %v154_v19  ;;  %v344_v24 = vpack.c.bf16 %v186_v20, %v186_v20  ;;  %v165_v25 = vadd.f32 %v369_v21, %v301_v10 }
  0xd0   :  { %v197_v26 = vadd.f32 %v377_v22, %v301_v10  ;;  %v156_v27 = vpop.f32.mrf.mxu0  ;;  %v188_v28 = vpop.f32.mrf.mxu1 }
  0xd1   :  { %281 = vst.msk [vmem:[%s524_s3] sm:$0xf] %vm280_vm1, %v336_v23  ;;  %289 = vst.msk [vmem:[%s524_s3 + $0x20] sm:$0xf] %vm280_vm1, %v344_v24  ;;  %v339_v29 = vpack.c.bf16 %v165_v25, %v165_v25  ;;  %v157_v31 = vadd.f32 %v301_v10, %v156_v27  ;;  %v189_v32 = vadd.f32 %v301_v10, %v188_v28 }
  0xd2   :  { %v347_v30 = vpack.c.bf16 %v197_v26, %v197_v26  ;;  %v372_v33 = vpop.f32.mrf.mxu0  ;;  %v380_v34 = vpop.f32.mrf.mxu1 }
  0xd3   :  { %284 = vst.msk [vmem:[%s524_s3 + $0xc] sm:$0xf] %vm280_vm1, %v339_v29  ;;  %v337_v35 = vpack.c.bf16 %v157_v31, %v157_v31  ;;  %v345_v36 = vpack.c.bf16 %v189_v32, %v189_v32  ;;  %v178_v37 = vadd.f32 %v372_v33, %v301_v10  ;;  %v210_v38 = vadd.f32 %v380_v34, %v301_v10 }
  0xd4   :  { %292 = vst.msk [vmem:[%s524_s3 + $0x2c] sm:$0xf] %vm280_vm1, %v347_v30  ;;  %v169_v39 = vpop.f32.mrf.mxu0  ;;  %v201_v40 = vpop.f32.mrf.mxu1 }
  0xd5   :  { %282 = vst.msk [vmem:[%s524_s3 + $0x4] sm:$0xf] %vm280_vm1, %v337_v35  ;;  %290 = vst.msk [vmem:[%s524_s3 + $0x24] sm:$0xf] %vm280_vm1, %v345_v36  ;;  %v342_v41 = vpack.c.bf16 %v178_v37, %v178_v37  ;;  %v350_v42 = vpack.c.bf16 %v210_v38, %v210_v38  ;;  %v170_v43 = vadd.f32 %v301_v10, %v169_v39 }
  0xd6   :  { %v202_v44 = vadd.f32 %v301_v10, %v201_v40  ;;  %v373_v45 = vpop.f32.mrf.mxu0  ;;  %v381_v46 = vpop.f32.mrf.mxu1 }
  0xd7   :  { %287 = vst.msk [vmem:[%s524_s3 + $0x18] sm:$0xf] %vm280_vm1, %v342_v41  ;;  %295 = vst.msk [vmem:[%s524_s3 + $0x38] sm:$0xf] %vm280_vm1, %v350_v42  ;;  %v340_v47 = vpack.c.bf16 %v170_v43, %v170_v43  ;;  %v181_v49 = vadd.f32 %v373_v45, %v301_v10  ;;  %v213_v50 = vadd.f32 %v381_v46, %v301_v10 }
  0xd8   :  { %v348_v48 = vpack.c.bf16 %v202_v44, %v202_v44  ;;  %v172_v51 = vpop.f32.mrf.mxu0  ;;  %v204_v52 = vpop.f32.mrf.mxu1 }
  0xd9   :  { %285 = vst.msk [vmem:[%s524_s3 + $0x10] sm:$0xf] %vm280_vm1, %v340_v47  ;;  %v343_v53 = vpack.c.bf16 %v181_v49, %v181_v49  ;;  %v351_v54 = vpack.c.bf16 %v213_v50, %v213_v50  ;;  %v173_v55 = vadd.f32 %v301_v10, %v172_v51  ;;  %v205_v56 = vadd.f32 %v301_v10, %v204_v52 }
  0xda   :  { %293 = vst.msk [vmem:[%s524_s3 + $0x30] sm:$0xf] %vm280_vm1, %v348_v48 }
  0xdb   :  { %288 = vst.msk [vmem:[%s524_s3 + $0x1c] sm:$0xf] %vm280_vm1, %v343_v53  ;;  %296 = vst.msk [vmem:[%s524_s3 + $0x3c] sm:$0xf] %vm280_vm1, %v351_v54  ;;  %v341_v57 = vpack.c.bf16 %v173_v55, %v173_v55  ;;  %v349_v58 = vpack.c.bf16 %v205_v56, %v205_v56 }
  0xdd   :  { %286 = vst.msk [vmem:[%s524_s3 + $0x14] sm:$0xf] %vm280_vm1, %v341_v57  ;;  %294 = vst.msk [vmem:[%s524_s3 + $0x34] sm:$0xf] %vm280_vm1, %v349_v58 }

// kernel: _forward_impl.14
= control target key start
LH: loop header
LB: loop body
LE: loop exit
PB: predicated region body
PF: predicated region fallthrough
CT: control target
= control target key end

     0   :  { %vm119_vm0 = vcmask 261120   ;;  %vm321_vm1 = vcmask 257024   ;;  %s637_s2 = inlined_call_operand.vmem [shape: bf16[32,32], index: 2, kind: input, shape index: {}]   ;;  %s638_s0 = inlined_call_operand.vmem [shape: bf16[128,32], index: 0, kind: input, shape index: {}]   ;;  %s639_s1 = inlined_call_operand.vmem [shape: bf16[128,32], index: 1, kind: input, shape index: {}]   ;;  %s640_s3 = inlined_call_operand.vmem [shape: bf16[128,32], index: 3, kind: output, shape index: {}]  }
   0x1   :  { %v465_v0 = vld [vmem:[%s637_s2 + $0x8] sm:$0xff]   ;;  %v466_v1 = vld [vmem:[%s637_s2] sm:$0xff]   ;;  %v471_v6 = vld [vmem:[%s638_s0 + $0x10] sm:$0xff]  }
   0x2   :  { %441 = vmatprep.subr.bf16.mxu0 %v465_v0  ;;  %461 = vmatprep.subr.bf16.mxu1 %v465_v0  ;;  %v467_v2 = vld [vmem:[%s638_s0] sm:$0xff]   ;;  %v469_v4 = vld [vmem:[%s638_s0 + $0x8] sm:$0xff]   ;;  %v472_v7 = vld [vmem:[%s638_s0 + $0x30] sm:$0xff]  }
   0x3   :  { %442 = vmatpush3.bf16.msra.mxu0 %v465_v0  ;;  %463 = vmatpush3.bf16.msra.mxu1 %v465_v0  ;;  %v468_v3 = vld [vmem:[%s638_s0 + $0x20] sm:$0xff]   ;;  %v470_v5 = vld [vmem:[%s638_s0 + $0x28] sm:$0xff]   ;;  %v473_v8 = vld [vmem:[%s638_s0 + $0x18] sm:$0xff]  }
   0x4   :  { %443 = vmatprep.subr.bf16.mxu0 %v466_v1  ;;  %462 = vmatprep.subr.bf16.mxu1 %v466_v1  ;;  %v474_v9 = vld [vmem:[%s638_s0 + $0x38] sm:$0xff]   ;;  %v424_v10 = vld [vmem:[%s639_s1 + $0x8] sm:$0xff]   ;;  %v393_v12 = vld [vmem:[%s639_s1] sm:$0xff]  }
   0x5   :  { %445 = vmatprep.mubr.msk.bf16.mxu0 %vm119_vm0, %v467_v2  ;;  %453 = vmatprep.mubr.msk.bf16.mxu1 %vm119_vm0, %v468_v3  ;;  %v428_v11 = vld [vmem:[%s639_s1 + $0x28] sm:$0xff]   ;;  %v427_v13 = vld [vmem:[%s639_s1 + $0x20] sm:$0xff]   ;;  %v398_v14 = vunpack.c.l.bf16 %v424_v10  ;;  %v394_v16 = vunpack.c.l.bf16 %v393_v12  ;;  %v548_v22 = vld [vmem:[%s639_s1 + $0x18] sm:$0xff]   ;;  %v399_v26 = vunpack.c.h.bf16 %v424_v10  ;;  %v395_v28 = vunpack.c.h.bf16 %v393_v12 }
   0x6   :  { %v414_v15 = vunpack.c.l.bf16 %v428_v11  ;;  %v410_v17 = vunpack.c.l.bf16 %v427_v13  ;;  %v553_v23 = vld [vmem:[%s639_s1 + $0x38] sm:$0xff]   ;;  %v415_v27 = vunpack.c.h.bf16 %v428_v11  ;;  %v411_v29 = vunpack.c.h.bf16 %v427_v13  ;;  %v558_v34 = vld [vmem:[%s639_s1 + $0x10] sm:$0xff]  }
   0x7   :  { %444 = vmatpush3.bf16.msra.mxu0 %v466_v1  ;;  %464 = vmatpush3.bf16.msra.mxu1 %v466_v1  ;;  %v563_v35 = vld [vmem:[%s639_s1 + $0x30] sm:$0xff]   ;;  %v406_v38 = vunpack.c.l.bf16 %v548_v22  ;;  %v422_v39 = vunpack.c.l.bf16 %v553_v23  ;;  %v402_v48 = vunpack.c.l.bf16 %v558_v34  ;;  %v407_v58 = vunpack.c.h.bf16 %v548_v22 }
   0x8   :  { %v418_v49 = vunpack.c.l.bf16 %v563_v35  ;;  %v423_v59 = vunpack.c.h.bf16 %v553_v23 }
   0xa   :  { %446 = vmatmul.mubr.msk.bf16.vlgmr.msra.gmra.mxu0 %vm119_vm0, %v469_v4  ;;  %454 = vmatmul.mubr.msk.bf16.vlgmr.msra.gmra.mxu1 %vm119_vm0, %v470_v5  ;;  %v403_v4 = vunpack.c.h.bf16 %v558_v34  ;;  %v419_v5 = vunpack.c.h.bf16 %v563_v35 }
   0xb   :  { %449 = vmatprep.mubr.msk.bf16.mxu0 %vm119_vm0, %v471_v6  ;;  %457 = vmatprep.mubr.msk.bf16.mxu1 %vm119_vm0, %v472_v7 }
  0x12   :  { %450 = vmatmul.mubr.msk.bf16.gmra.mxu0 %vm119_vm0, %v473_v8  ;;  %458 = vmatmul.mubr.msk.bf16.gmra.mxu1 %vm119_vm0, %v474_v9 }
  0xca   :  { %v447_v18 = vpop.f32.mrf.mxu0  ;;  %v455_v19 = vpop.f32.mrf.mxu1 }
  0xcb   :  { %v187_v20 = vadd.f32 %v447_v18, %v398_v14  ;;  %v219_v21 = vadd.f32 %v455_v19, %v414_v15 }
  0xcc   :  { %v178_v24 = vpop.f32.mrf.mxu0  ;;  %v210_v25 = vpop.f32.mrf.mxu1 }
  0xcd   :  { %v243_v30 = vmax.f32 %v187_v20, 0.0  ;;  %v251_v31 = vmax.f32 %v219_v21, 0.0  ;;  %v179_v32 = vadd.f32 %v394_v16, %v178_v24  ;;  %v211_v33 = vadd.f32 %v410_v17, %v210_v25 }
  0xce   :  { %v448_v36 = vpop.f32.mrf.mxu0  ;;  %v456_v37 = vpop.f32.mrf.mxu1 }
  0xcf   :  { %v378_v40 = vpack.c.bf16 %v243_v30, %v243_v30  ;;  %v386_v41 = vpack.c.bf16 %v251_v31, %v251_v31  ;;  %v241_v42 = vmax.f32 %v179_v32, 0.0  ;;  %v249_v43 = vmax.f32 %v211_v33, 0.0 }
  0xd0   :  { %v190_v44 = vadd.f32 %v448_v36, %v399_v26  ;;  %v222_v45 = vadd.f32 %v456_v37, %v415_v27  ;;  %v181_v46 = vpop.f32.mrf.mxu0  ;;  %v213_v47 = vpop.f32.mrf.mxu1 }
  0xd1   :  { %324 = vst.msk [vmem:[%s640_s3 + $0x8] sm:$0xf] %vm321_vm1, %v378_v40  ;;  %332 = vst.msk [vmem:[%s640_s3 + $0x28] sm:$0xf] %vm321_vm1, %v386_v41  ;;  %v376_v50 = vpack.c.bf16 %v241_v42, %v241_v42  ;;  %v384_v51 = vpack.c.bf16 %v249_v43, %v249_v43  ;;  %v182_v52 = vadd.f32 %v395_v28, %v181_v46 }
  0xd2   :  { %v214_v53 = vadd.f32 %v411_v29, %v213_v47  ;;  %v244_v54 = vmax.f32 %v190_v44, 0.0  ;;  %v252_v55 = vmax.f32 %v222_v45, 0.0  ;;  %v451_v56 = vpop.f32.mrf.mxu0  ;;  %v459_v57 = vpop.f32.mrf.mxu1 }
  0xd3   :  { %322 = vst.msk [vmem:[%s640_s3] sm:$0xf] %vm321_vm1, %v376_v50  ;;  %330 = vst.msk [vmem:[%s640_s3 + $0x20] sm:$0xf] %vm321_vm1, %v384_v51  ;;  %v242_v60 = vmax.f32 %v182_v52, 0.0  ;;  %v203_v62 = vadd.f32 %v451_v56, %v406_v38  ;;  %v235_v63 = vadd.f32 %v459_v57, %v422_v39 }
  0xd4   :  { %v250_v61 = vmax.f32 %v214_v53, 0.0  ;;  %v379_v0 = vpack.c.bf16 %v244_v54, %v244_v54  ;;  %v387_v1 = vpack.c.bf16 %v252_v55, %v252_v55  ;;  %v194_v2 = vpop.f32.mrf.mxu0  ;;  %v226_v3 = vpop.f32.mrf.mxu1 }
  0xd5   :  { %v377_v6 = vpack.c.bf16 %v242_v60, %v242_v60  ;;  %v247_v8 = vmax.f32 %v203_v62, 0.0  ;;  %v255_v9 = vmax.f32 %v235_v63, 0.0  ;;  %v195_v10 = vadd.f32 %v402_v48, %v194_v2 }
  0xd6   :  { %v385_v7 = vpack.c.bf16 %v250_v61, %v250_v61  ;;  %325 = vst.msk [vmem:[%s640_s3 + $0xc] sm:$0xf] %vm321_vm1, %v379_v0  ;;  %333 = vst.msk [vmem:[%s640_s3 + $0x2c] sm:$0xf] %vm321_vm1, %v387_v1  ;;  %v227_v11 = vadd.f32 %v418_v49, %v226_v3  ;;  %v452_v12 = vpop.f32.mrf.mxu0  ;;  %v460_v13 = vpop.f32.mrf.mxu1 }
  0xd7   :  { %323 = vst.msk [vmem:[%s640_s3 + $0x4] sm:$0xf] %vm321_vm1, %v377_v6  ;;  %v382_v14 = vpack.c.bf16 %v247_v8, %v247_v8  ;;  %v390_v15 = vpack.c.bf16 %v255_v9, %v255_v9  ;;  %v206_v16 = vadd.f32 %v452_v12, %v407_v58  ;;  %v238_v17 = vadd.f32 %v460_v13, %v423_v59 }
  0xd8   :  { %331 = vst.msk [vmem:[%s640_s3 + $0x24] sm:$0xf] %vm321_vm1, %v385_v7  ;;  %v245_v18 = vmax.f32 %v195_v10, 0.0  ;;  %v253_v19 = vmax.f32 %v227_v11, 0.0  ;;  %v197_v20 = vpop.f32.mrf.mxu0  ;;  %v229_v21 = vpop.f32.mrf.mxu1 }
  0xd9   :  { %328 = vst.msk [vmem:[%s640_s3 + $0x18] sm:$0xf] %vm321_vm1, %v382_v14  ;;  %336 = vst.msk [vmem:[%s640_s3 + $0x38] sm:$0xf] %vm321_vm1, %v390_v15  ;;  %v248_v22 = vmax.f32 %v206_v16, 0.0  ;;  %v256_v23 = vmax.f32 %v238_v17, 0.0  ;;  %v198_v24 = vadd.f32 %v403_v4, %v197_v20  ;;  %v230_v25 = vadd.f32 %v419_v5, %v229_v21 }
  0xda   :  { %v380_v26 = vpack.c.bf16 %v245_v18, %v245_v18  ;;  %v388_v27 = vpack.c.bf16 %v253_v19, %v253_v19 }
  0xdb   :  { %v383_v28 = vpack.c.bf16 %v248_v22, %v248_v22  ;;  %v391_v29 = vpack.c.bf16 %v256_v23, %v256_v23  ;;  %v246_v30 = vmax.f32 %v198_v24, 0.0  ;;  %v254_v31 = vmax.f32 %v230_v25, 0.0 }
  0xdc   :  { %326 = vst.msk [vmem:[%s640_s3 + $0x10] sm:$0xf] %vm321_vm1, %v380_v26  ;;  %334 = vst.msk [vmem:[%s640_s3 + $0x30] sm:$0xf] %vm321_vm1, %v388_v27 }
  0xdd   :  { %329 = vst.msk [vmem:[%s640_s3 + $0x1c] sm:$0xf] %vm321_vm1, %v383_v28  ;;  %337 = vst.msk [vmem:[%s640_s3 + $0x3c] sm:$0xf] %vm321_vm1, %v391_v29  ;;  %v381_v32 = vpack.c.bf16 %v246_v30, %v246_v30  ;;  %v389_v33 = vpack.c.bf16 %v254_v31, %v254_v31 }
  0xdf   :  { %327 = vst.msk [vmem:[%s640_s3 + $0x14] sm:$0xf] %vm321_vm1, %v381_v32  ;;  %335 = vst.msk [vmem:[%s640_s3 + $0x34] sm:$0xf] %vm321_vm1, %v389_v33 }

// kernel: _forward_impl.16
= control target key start
LH: loop header
LB: loop body
LE: loop exit
PB: predicated region body
PF: predicated region fallthrough
CT: control target
= control target key end

     0   :  { %vm167_vm0 = vcmask 130048   ;;  %s1280_s16 = smov 112   ;;  %s1281_s22 = smov 16   ;;  %vm1034_vm1 = vcmask 257024   ;;  %s1749_s0 = inlined_call_operand.vmem [shape: bf16[256,32], index: 0, kind: input, shape index: {}]   ;;  %s1750_s2 = inlined_call_operand.vmem [shape: bf16[16,16], index: 2, kind: input, shape index: {}]   ;;  %s1751_s1 = inlined_call_operand.vmem [shape: bf16[128,16], index: 1, kind: input, shape index: {}]   ;;  %s1752_s3 = inlined_call_operand.vmem [shape: bf16[256,32], index: 3, kind: output, shape index: {}]  }
   0x1   :  { %v1263_v0 = vld [vmem:[%s1749_s0] sm:$0xff]   ;;  %v1264_v1 = vld [vmem:[%s1749_s0 + $0x8] sm:$0xff]   ;;  %v1265_v2 = vld [vmem:[%s1749_s0 + $0x10] sm:$0xff]  }
   0x2   :  { %377 = vrot.lane.b32.xlu0 %v1263_v0, %s1280_s16  ;;  %1195 = vmatprep.mubr.msk.bf16.mxu0 %vm167_vm0, %v1263_v0  ;;  %v1266_v3 = vld [vmem:[%s1749_s0 + $0x18] sm:$0xff]   ;;  %v1267_v4 = vld [vmem:[%s1749_s0 + $0x20] sm:$0xff]   ;;  %v1268_v5 = vld [vmem:[%s1749_s0 + $0x28] sm:$0xff]  }
   0x3   :  { %381 = vrot.lane.b32.xlu1 %v1265_v2, %s1280_s16  ;;  %v1269_v6 = vld [vmem:[%s1749_s0 + $0x30] sm:$0xff]   ;;  %v1270_v7 = vld [vmem:[%s1749_s0 + $0x38] sm:$0xff]   ;;  %v1271_v8 = vld [vmem:[%s1749_s0 + $0x40] sm:$0xff]  }
   0x4   :  { %v1272_v9 = vld [vmem:[%s1749_s0 + $0x48] sm:$0xff]   ;;  %v1279_v10 = vld [vmem:[%s1750_s2] sm:$0xff]   ;;  %v1273_v11 = vld [vmem:[%s1749_s0 + $0x50] sm:$0xff]  }
   0x5   :  { %1227 = vmatprep.subr.bf16.mxu1 %v1279_v10  ;;  %1193 = vmatprep.subr.bf16.mxu0 %v1279_v10  ;;  %v1274_v12 = vld [vmem:[%s1749_s0 + $0x58] sm:$0xff]   ;;  %v1275_v13 = vld [vmem:[%s1749_s0 + $0x60] sm:$0xff]   ;;  %v1276_v14 = vld [vmem:[%s1749_s0 + $0x68] sm:$0xff]  }
   0x6   :  { %379 = vrot.lane.b32.xlu0 %v1264_v1, %s1280_s16  ;;  %1228 = vmatpush3.bf16.msra.mxu1 %v1279_v10  ;;  %v1277_v15 = vld [vmem:[%s1749_s0 + $0x70] sm:$0xff]   ;;  %v1278_v16 = vld [vmem:[%s1749_s0 + $0x78] sm:$0xff]   ;;  %v1121_v33 = vld [vmem:[%s1751_s1] sm:$0xff]  }
   0x7   :  { %383 = vrot.lane.b32.xlu1 %v1266_v3, %s1280_s16  ;;  %1194 = vmatpush3.bf16.msra.mxu0 %v1279_v10  ;;  %v1404_v34 = vunpack.c.h.bf16 %v1121_v33  ;;  %v1406_v35 = vunpack.c.l.bf16 %v1121_v33  ;;  %v1152_v39 = vld [vmem:[%s1751_s1 + $0x8] sm:$0xff]   ;;  %v1153_v56 = vld [vmem:[%s1751_s1 + $0x10] sm:$0xff]  }
   0x8   :  { %v1414_v46 = vunpack.c.h.bf16 %v1152_v39  ;;  %v1418_v50 = vunpack.c.l.bf16 %v1152_v39  ;;  %v1427_v61 = vunpack.c.h.bf16 %v1153_v56 }
   0xa   :  { %385 = vrot.lane.b32.xlu0 %v1267_v4, %s1280_s16  ;;  %1196 = vmatmul.mubr.msk.bf16.vlgmr.msra.gmra.mxu0 %vm167_vm0, %v1264_v1 }
   0xb   :  { %387 = vrot.lane.b32.xlu1 %v1268_v5, %s1280_s16  ;;  %1199 = vmatprep.mubr.msk.bf16.mxu0 %vm167_vm0, %v1265_v2 }
   0xe   :  { %389 = vrot.lane.b32.xlu0 %v1269_v6, %s1280_s16 }
   0xf   :  { %391 = vrot.lane.b32.xlu1 %v1270_v7, %s1280_s16 }
  0x12   :  { %393 = vrot.lane.b32.xlu0 %v1271_v8, %s1280_s16  ;;  %1200 = vmatmul.mubr.msk.bf16.gmra.mxu0 %vm167_vm0, %v1266_v3 }
  0x13   :  { %395 = vrot.lane.b32.xlu1 %v1272_v9, %s1280_s16  ;;  %1203 = vmatprep.mubr.msk.bf16.mxu0 %vm167_vm0, %v1267_v4 }
  0x16   :  { %397 = vrot.lane.b32.xlu0 %v1273_v11, %s1280_s16 }
  0x17   :  { %399 = vrot.lane.b32.xlu1 %v1274_v12, %s1280_s16 }
  0x1a   :  { %401 = vrot.lane.b32.xlu0 %v1275_v13, %s1280_s16  ;;  %1204 = vmatmul.mubr.msk.bf16.gmra.mxu0 %vm167_vm0, %v1268_v5  ;;  %v1433_v5 = vunpack.c.l.bf16 %v1153_v56 }
  0x1b   :  { %403 = vrot.lane.b32.xlu1 %v1276_v14, %s1280_s16  ;;  %1207 = vmatprep.mubr.msk.bf16.mxu0 %vm167_vm0, %v1269_v6 }
  0x1e   :  { %405 = vrot.lane.b32.xlu0 %v1277_v15, %s1280_s16 }
  0x1f   :  { %407 = vrot.lane.b32.xlu1 %v1278_v16, %s1280_s16 }
  0x22   :  { %1208 = vmatmul.mubr.msk.bf16.gmra.mxu0 %vm167_vm0, %v1270_v7 }
  0x23   :  { %1211 = vmatprep.mubr.msk.bf16.mxu0 %vm167_vm0, %v1271_v8 }
  0x2a   :  { %1212 = vmatmul.mubr.msk.bf16.gmra.mxu0 %vm167_vm0, %v1272_v9 }
  0x2b   :  { %1215 = vmatprep.mubr.msk.bf16.mxu0 %vm167_vm0, %v1273_v11  ;;  %v1154_v11 = vld [vmem:[%s1751_s1 + $0x18] sm:$0xff]  }
  0x32   :  { %1216 = vmatmul.mubr.msk.bf16.gmra.mxu0 %vm167_vm0, %v1274_v12 }
  0x33   :  { %1219 = vmatprep.mubr.msk.bf16.mxu0 %vm167_vm0, %v1275_v13 }
  0x3a   :  { %1220 = vmatmul.mubr.msk.bf16.gmra.mxu0 %vm167_vm0, %v1276_v14 }
  0x3b   :  { %1223 = vmatprep.mubr.msk.bf16.mxu0 %vm167_vm0, %v1277_v15 }
  0x42   :  { %1224 = vmatmul.mubr.msk.bf16.gmra.mxu0 %vm167_vm0, %v1278_v16  ;;  %v1442_v16 = vunpack.c.h.bf16 %v1154_v11 }
  0x74   :  { %v378_v17 = vpop.permute.xlu0 %377 }
  0x75   :  { %1229 = vmatprep.mubr.msk.bf16.mxu1 %vm167_vm0, %v378_v17  ;;  %v382_v18 = vpop.permute.xlu1 %381 }
  0x78   :  { %v380_v19 = vpop.permute.xlu0 %379 }
  0x79   :  { %1230 = vmatmul.mubr.msk.bf16.vlgmr.msra.gmra.mxu1 %vm167_vm0, %v380_v19  ;;  %v384_v20 = vpop.permute.xlu1 %383 }
  0x7a   :  { %1233 = vmatprep.mubr.msk.bf16.mxu1 %vm167_vm0, %v382_v18 }
  0x7c   :  { %v386_v21 = vpop.permute.xlu0 %385 }
  0x7d   :  { %v388_v22 = vpop.permute.xlu1 %387 }
  0x80   :  { %v390_v23 = vpop.permute.xlu0 %389 }
  0x81   :  { %1234 = vmatmul.mubr.msk.bf16.gmra.mxu1 %vm167_vm0, %v384_v20  ;;  %v392_v24 = vpop.permute.xlu1 %391 }
  0x82   :  { %1237 = vmatprep.mubr.msk.bf16.mxu1 %vm167_vm0, %v386_v21 }
  0x84   :  { %v394_v25 = vpop.permute.xlu0 %393 }
  0x85   :  { %v396_v26 = vpop.permute.xlu1 %395 }
  0x88   :  { %v398_v27 = vpop.permute.xlu0 %397 }
  0x89   :  { %1238 = vmatmul.mubr.msk.bf16.gmra.mxu1 %vm167_vm0, %v388_v22  ;;  %v400_v28 = vpop.permute.xlu1 %399 }
  0x8a   :  { %1241 = vmatprep.mubr.msk.bf16.mxu1 %vm167_vm0, %v390_v23 }
  0x8c   :  { %v402_v29 = vpop.permute.xlu0 %401 }
  0x8d   :  { %v404_v30 = vpop.permute.xlu1 %403 }
  0x90   :  { %v406_v31 = vpop.permute.xlu0 %405 }
  0x91   :  { %1242 = vmatmul.mubr.msk.bf16.gmra.mxu1 %vm167_vm0, %v392_v24  ;;  %v408_v32 = vpop.permute.xlu1 %407  ;;  %v1448_v24 = vunpack.c.l.bf16 %v1154_v11 }
  0x92   :  { %1245 = vmatprep.mubr.msk.bf16.mxu1 %vm167_vm0, %v394_v25 }
  0x99   :  { %1246 = vmatmul.mubr.msk.bf16.gmra.mxu1 %vm167_vm0, %v396_v26 }
  0x9a   :  { %1249 = vmatprep.mubr.msk.bf16.mxu1 %vm167_vm0, %v398_v27 }
  0xa1   :  { %1250 = vmatmul.mubr.msk.bf16.gmra.mxu1 %vm167_vm0, %v400_v28 }
  0xa2   :  { %1253 = vmatprep.mubr.msk.bf16.mxu1 %vm167_vm0, %v402_v29 }
  0xa9   :  { %1254 = vmatmul.mubr.msk.bf16.gmra.mxu1 %vm167_vm0, %v404_v30  ;;  %v1155_v30 = vld [vmem:[%s1751_s1 + $0x20] sm:$0xff]  }
  0xaa   :  { %1257 = vmatprep.mubr.msk.bf16.mxu1 %vm167_vm0, %v406_v31 }
  0xb1   :  { %1258 = vmatmul.mubr.msk.bf16.gmra.mxu1 %vm167_vm0, %v408_v32 }
 0x139   :  { %v1231_v36 = vpop.f32.mrf.mxu1 }
 0x13a   :  { %v716_v37 = vadd.f32 %v1231_v36, %v1404_v34 }
 0x13b   :  { %v491_v38 = vpop.f32.mrf.mxu1 }
 0x13c   :  { %v748_v40 = vmax.f32 %v716_v37, 0.0  ;;  %v714_v41 = vadd.f32 %v1406_v35, %v491_v38  ;;  %v1457_v37 = vunpack.c.h.bf16 %v1155_v30 }
 0x13d   :  { %v1232_v42 = vpop.f32.mrf.mxu1 }
 0x13e   :  { %v780_v43 = vpack.c.bf16 %v748_v40, %v748_v40  ;;  %v746_v44 = vmax.f32 %v714_v41, 0.0  ;;  %v717_v45 = vadd.f32 %v1232_v42, %v1404_v34 }
 0x13f   :  { %v494_v47 = vpop.f32.mrf.mxu1 }
 0x140   :  { %v749_v48 = vmax.f32 %v717_v45, 0.0  ;;  %v715_v49 = vadd.f32 %v1406_v35, %v494_v47  ;;  %846 = vrot.lane.b32.xlu0 %v780_v43, %s1281_s22  ;;  %v778_v52 = vpack.c.bf16 %v746_v44, %v746_v44  ;;  %v1463_v45 = vunpack.c.l.bf16 %v1155_v30 }
 0x141   :  { %v1235_v51 = vpop.f32.mrf.mxu1 }
 0x142   :  { %v781_v53 = vpack.c.bf16 %v749_v48, %v749_v48  ;;  %v747_v54 = vmax.f32 %v715_v49, 0.0  ;;  %v720_v55 = vadd.f32 %v1235_v51, %v1414_v46 }
 0x143   :  { %v507_v57 = vpop.f32.mrf.mxu1 }
 0x144   :  { %v752_v58 = vmax.f32 %v720_v55, 0.0  ;;  %v718_v59 = vadd.f32 %v1418_v50, %v507_v57  ;;  %842 = vrot.lane.b32.xlu0 %v778_v52, %s1281_s22  ;;  %848 = vrot.lane.b32.xlu1 %v781_v53, %s1281_s22  ;;  %v779_v62 = vpack.c.bf16 %v747_v54, %v747_v54  ;;  %v1156_v53 = vld [vmem:[%s1751_s1 + $0x28] sm:$0xff]  }
 0x145   :  { %v1236_v60 = vpop.f32.mrf.mxu1 }
 0x146   :  { %v784_v63 = vpack.c.bf16 %v752_v58, %v752_v58  ;;  %v750_v0 = vmax.f32 %v718_v59, 0.0  ;;  %v721_v1 = vadd.f32 %v1236_v60, %v1414_v46  ;;  %v1472_v58 = vunpack.c.h.bf16 %v1156_v53 }
 0x147   :  { %v510_v2 = vpop.f32.mrf.mxu1 }
 0x148   :  { %v753_v3 = vmax.f32 %v721_v1, 0.0  ;;  %v719_v4 = vadd.f32 %v1418_v50, %v510_v2  ;;  %844 = vrot.lane.b32.xlu1 %v779_v62, %s1281_s22  ;;  %854 = vrot.lane.b32.xlu0 %v784_v63, %s1281_s22  ;;  %v782_v7 = vpack.c.bf16 %v750_v0, %v750_v0 }
 0x149   :  { %v1239_v6 = vpop.f32.mrf.mxu1 }
 0x14a   :  { %v785_v8 = vpack.c.bf16 %v753_v3, %v753_v3  ;;  %v751_v9 = vmax.f32 %v719_v4, 0.0  ;;  %v724_v10 = vadd.f32 %v1239_v6, %v1427_v61  ;;  %v1478_v3 = vunpack.c.l.bf16 %v1156_v53 }
 0x14b   :  { %v523_v12 = vpop.f32.mrf.mxu1 }
 0x14c   :  { %v756_v13 = vmax.f32 %v724_v10, 0.0  ;;  %v722_v14 = vadd.f32 %v1433_v5, %v523_v12  ;;  %850 = vrot.lane.b32.xlu0 %v782_v7, %s1281_s22  ;;  %856 = vrot.lane.b32.xlu1 %v785_v8, %s1281_s22  ;;  %v783_v17 = vpack.c.bf16 %v751_v9, %v751_v9  ;;  %v1157_v10 = vld [vmem:[%s1751_s1 + $0x30] sm:$0xff]  }
 0x14d   :  { %v1240_v15 = vpop.f32.mrf.mxu1 }
 0x14e   :  { %v788_v18 = vpack.c.bf16 %v756_v13, %v756_v13  ;;  %v754_v19 = vmax.f32 %v722_v14, 0.0  ;;  %v725_v20 = vadd.f32 %v1240_v15, %v1427_v61  ;;  %v1487_v15 = vunpack.c.h.bf16 %v1157_v10 }
 0x14f   :  { %v526_v21 = vpop.f32.mrf.mxu1 }
 0x150   :  { %v757_v22 = vmax.f32 %v725_v20, 0.0  ;;  %v723_v23 = vadd.f32 %v1433_v5, %v526_v21  ;;  %852 = vrot.lane.b32.xlu1 %v783_v17, %s1281_s22  ;;  %862 = vrot.lane.b32.xlu0 %v788_v18, %s1281_s22  ;;  %v786_v26 = vpack.c.bf16 %v754_v19, %v754_v19 }
 0x151   :  { %v1243_v25 = vpop.f32.mrf.mxu1 }
 0x152   :  { %v789_v27 = vpack.c.bf16 %v757_v22, %v757_v22  ;;  %v755_v28 = vmax.f32 %v723_v23, 0.0  ;;  %v728_v29 = vadd.f32 %v1243_v25, %v1442_v16  ;;  %v1493_v25 = vunpack.c.l.bf16 %v1157_v10 }
 0x153   :  { %v539_v31 = vpop.f32.mrf.mxu1 }
 0x154   :  { %v760_v32 = vmax.f32 %v728_v29, 0.0  ;;  %v726_v33 = vadd.f32 %v1448_v24, %v539_v31  ;;  %858 = vrot.lane.b32.xlu0 %v786_v26, %s1281_s22  ;;  %864 = vrot.lane.b32.xlu1 %v789_v27, %s1281_s22  ;;  %v787_v38 = vpack.c.bf16 %v755_v28, %v755_v28  ;;  %v1495_v26 = vpop.f32.mrf.mxu0 }
 0x155   :  { %v1244_v36 = vpop.f32.mrf.mxu1 }
 0x156   :  { %v792_v39 = vpack.c.bf16 %v760_v32, %v760_v32  ;;  %v758_v40 = vmax.f32 %v726_v33, 0.0  ;;  %v729_v41 = vadd.f32 %v1244_v36, %v1442_v16 }
 0x157   :  { %v542_v42 = vpop.f32.mrf.mxu1 }
 0x158   :  { %v761_v43 = vmax.f32 %v729_v41, 0.0  ;;  %v727_v44 = vadd.f32 %v1448_v24, %v542_v42  ;;  %860 = vrot.lane.b32.xlu1 %v787_v38, %s1281_s22  ;;  %870 = vrot.lane.b32.xlu0 %v792_v39, %s1281_s22  ;;  %v790_v48 = vpack.c.bf16 %v758_v40, %v758_v40  ;;  %v250_v38 = vpop.f32.mrf.mxu0  ;;  %v1158_v40 = vld [vmem:[%s1751_s1 + $0x38] sm:$0xff]  }
 0x159   :  { %v1247_v47 = vpop.f32.mrf.mxu1 }
 0x15a   :  { %v793_v49 = vpack.c.bf16 %v761_v43, %v761_v43  ;;  %v759_v51 = vmax.f32 %v727_v44, 0.0  ;;  %v732_v52 = vadd.f32 %v1247_v47, %v1457_v37  ;;  %v1198_v53 = vpop.f32.mrf.mxu0 }
 0x15b   :  { %v555_v54 = vpop.f32.mrf.mxu1 }
 0x15c   :  { %v764_v55 = vmax.f32 %v732_v52, 0.0  ;;  %v730_v56 = vadd.f32 %v1463_v45, %v555_v54  ;;  %866 = vrot.lane.b32.xlu0 %v790_v48, %s1281_s22  ;;  %872 = vrot.lane.b32.xlu1 %v793_v49, %s1281_s22  ;;  %v791_v59 = vpack.c.bf16 %v759_v51, %v759_v51  ;;  %v1508_v51 = vunpack.c.h.bf16 %v1158_v40 }
 0x15d   :  { %v1248_v57 = vpop.f32.mrf.mxu1  ;;  %v1510_v52 = vunpack.c.l.bf16 %v1158_v40  ;;  %v621_v40 = vadd.f32 %v1198_v53, %v1404_v34 }
 0x15e   :  { %v796_v60 = vpack.c.bf16 %v764_v55, %v764_v55  ;;  %v762_v62 = vmax.f32 %v730_v56, 0.0  ;;  %v733_v63 = vadd.f32 %v1248_v57, %v1457_v37 }
 0x15f   :  { %v558_v0 = vpop.f32.mrf.mxu1 }
 0x160   :  { %v765_v1 = vmax.f32 %v733_v63, 0.0  ;;  %v731_v2 = vadd.f32 %v1463_v45, %v558_v0  ;;  %868 = vrot.lane.b32.xlu1 %v791_v59, %s1281_s22  ;;  %878 = vrot.lane.b32.xlu0 %v796_v60, %s1281_s22  ;;  %v794_v6 = vpack.c.bf16 %v762_v62, %v762_v62  ;;  %v253_v63 = vpop.f32.mrf.mxu0 }
 0x161   :  { %v1251_v4 = vpop.f32.mrf.mxu1 }
 0x162   :  { %v797_v7 = vpack.c.bf16 %v765_v1, %v765_v1  ;;  %v763_v8 = vmax.f32 %v731_v2, 0.0  ;;  %v736_v9 = vadd.f32 %v1251_v4, %v1472_v58  ;;  %v1201_v10 = vpop.f32.mrf.mxu0 }
 0x163   :  { %v571_v11 = vpop.f32.mrf.mxu1 }
 0x164   :  { %v768_v12 = vmax.f32 %v736_v9, 0.0  ;;  %v734_v13 = vadd.f32 %v1478_v3, %v571_v11  ;;  %874 = vrot.lane.b32.xlu0 %v794_v6, %s1281_s22  ;;  %880 = vrot.lane.b32.xlu1 %v797_v7, %s1281_s22  ;;  %v795_v17 = vpack.c.bf16 %v763_v8, %v763_v8 }
 0x165   :  { %v1252_v14 = vpop.f32.mrf.mxu1 }
 0x166   :  { %v800_v18 = vpack.c.bf16 %v768_v12, %v768_v12  ;;  %v766_v19 = vmax.f32 %v734_v13, 0.0  ;;  %v737_v20 = vadd.f32 %v1252_v14, %v1472_v58 }
 0x167   :  { %v574_v21 = vpop.f32.mrf.mxu1 }
 0x168   :  { %v769_v22 = vmax.f32 %v737_v20, 0.0  ;;  %v735_v23 = vadd.f32 %v1478_v3, %v574_v21  ;;  %876 = vrot.lane.b32.xlu1 %v795_v17, %s1281_s22  ;;  %886 = vrot.lane.b32.xlu0 %v800_v18, %s1281_s22  ;;  %v798_v28 = vpack.c.bf16 %v766_v19, %v766_v19  ;;  %v266_v17 = vpop.f32.mrf.mxu0 }
 0x169   :  { %v1255_v27 = vpop.f32.mrf.mxu1 }
 0x16a   :  { %v801_v29 = vpack.c.bf16 %v769_v22, %v769_v22  ;;  %v767_v30 = vmax.f32 %v735_v23, 0.0  ;;  %v740_v31 = vadd.f32 %v1255_v27, %v1487_v15  ;;  %v1202_v19 = vpop.f32.mrf.mxu0 }
 0x16b   :  { %v587_v32 = vpop.f32.mrf.mxu1  ;;  %v625_v53 = vadd.f32 %v1202_v19, %v1414_v46 }
 0x16c   :  { %v772_v33 = vmax.f32 %v740_v31, 0.0  ;;  %v738_v36 = vadd.f32 %v1493_v25, %v587_v32  ;;  %882 = vrot.lane.b32.xlu0 %v798_v28, %s1281_s22  ;;  %888 = vrot.lane.b32.xlu1 %v801_v29, %s1281_s22  ;;  %v799_v41 = vpack.c.bf16 %v767_v30, %v767_v30  ;;  %v269_v20 = vpop.f32.mrf.mxu0  ;;  %v620_v32 = vadd.f32 %v1495_v26, %v1404_v34 }
 0x16d   :  { %v1256_v39 = vpop.f32.mrf.mxu1 }
 0x16e   :  { %v804_v42 = vpack.c.bf16 %v772_v33, %v772_v33  ;;  %v770_v43 = vmax.f32 %v738_v36, 0.0  ;;  %v741_v44 = vadd.f32 %v1256_v39, %v1487_v15  ;;  %v1205_v21 = vpop.f32.mrf.mxu0  ;;  %v652_v36 = vmax.f32 %v620_v32, 0.0 }
 0x16f   :  { %v590_v47 = vpop.f32.mrf.mxu1  ;;  %v618_v39 = vadd.f32 %v1406_v35, %v250_v38 }
 0x170   :  { %v773_v48 = vmax.f32 %v741_v44, 0.0  ;;  %v739_v49 = vadd.f32 %v1493_v25, %v590_v47  ;;  %884 = vrot.lane.b32.xlu1 %v799_v41, %s1281_s22  ;;  %894 = vrot.lane.b32.xlu0 %v804_v42, %s1281_s22  ;;  %v802_v55 = vpack.c.bf16 %v770_v43, %v770_v43  ;;  %v282_v22 = vpop.f32.mrf.mxu0  ;;  %v624_v42 = vadd.f32 %v1201_v10, %v1414_v46 }
 0x171   :  { %v1259_v54 = vpop.f32.mrf.mxu1  ;;  %v684_v43 = vpack.c.bf16 %v652_v36, %v652_v36  ;;  %v650_v44 = vmax.f32 %v618_v39, 0.0  ;;  %v653_v47 = vmax.f32 %v621_v40, 0.0 }
 0x172   :  { %v805_v56 = vpack.c.bf16 %v773_v48, %v773_v48  ;;  %v771_v57 = vmax.f32 %v739_v49, 0.0  ;;  %v744_v60 = vadd.f32 %v1259_v54, %v1508_v51  ;;  %v1206_v23 = vpop.f32.mrf.mxu0  ;;  %v619_v49 = vadd.f32 %v1406_v35, %v253_v63 }
 0x173   :  { %v603_v59 = vpop.f32.mrf.mxu1  ;;  %v656_v54 = vmax.f32 %v624_v42, 0.0  ;;  %v685_v38 = vpack.c.bf16 %v653_v47, %v653_v47 }
 0x174   :  { %v742_v62 = vadd.f32 %v1510_v52, %v603_v59  ;;  %890 = vrot.lane.b32.xlu0 %v802_v55, %s1281_s22  ;;  %896 = vrot.lane.b32.xlu1 %v805_v56, %s1281_s22  ;;  %v803_v1 = vpack.c.bf16 %v771_v57, %v771_v57  ;;  %v776_v6 = vmax.f32 %v744_v60, 0.0  ;;  %v1523_v27 = vpop.f32.mrf.mxu0  ;;  %v622_v55 = vadd.f32 %v1418_v50, %v266_v17 }
 0x175   :  { %v1260_v0 = vpop.f32.mrf.mxu1  ;;  %v682_v56 = vpack.c.bf16 %v650_v44, %v650_v44  ;;  %v651_v59 = vmax.f32 %v619_v49, 0.0  ;;  %v688_v35 = vpack.c.bf16 %v656_v54, %v656_v54 }
 0x176   :  { %v774_v2 = vmax.f32 %v742_v62, 0.0  ;;  %v745_v8 = vadd.f32 %v1260_v0, %v1508_v51  ;;  %v808_v12 = vpack.c.bf16 %v776_v6, %v776_v6  ;;  %v1209_v28 = vpop.f32.mrf.mxu0  ;;  %v654_v60 = vmax.f32 %v622_v55, 0.0 }
 0x177   :  { %v606_v4 = vpop.f32.mrf.mxu1  ;;  %v683_v6 = vpack.c.bf16 %v651_v59, %v651_v59  ;;  %v632_v39 = vadd.f32 %v1209_v28, %v1442_v16 }
 0x178   :  { %v806_v7 = vpack.c.bf16 %v774_v2, %v774_v2  ;;  %v743_v9 = vadd.f32 %v1510_v52, %v606_v4  ;;  %892 = vrot.lane.b32.xlu1 %v803_v1, %s1281_s22  ;;  %v777_v13 = vmax.f32 %v745_v8, 0.0  ;;  %v1525_v29 = vpop.f32.mrf.mxu0  ;;  %v657_v2 = vmax.f32 %v625_v53, 0.0 }
 0x179   :  { %v628_v4 = vadd.f32 %v1205_v21, %v1427_v61  ;;  %v686_v8 = vpack.c.bf16 %v654_v60, %v654_v60  ;;  %v630_v28 = vadd.f32 %v1448_v24, %v1525_v29 }
 0x17a   :  { %v775_v11 = vmax.f32 %v743_v9, 0.0  ;;  %898 = vrot.lane.b32.xlu0 %v806_v7, %s1281_s22  ;;  %v809_v18 = vpack.c.bf16 %v777_v13, %v777_v13  ;;  %v1527_v30 = vpop.f32.mrf.mxu0  ;;  %v623_v7 = vadd.f32 %v1418_v50, %v269_v20  ;;  %v689_v13 = vpack.c.bf16 %v657_v2, %v657_v2 }
 0x17b   :  { %v662_v29 = vmax.f32 %v630_v28, 0.0 }
 0x17c   :  { %v807_v14 = vpack.c.bf16 %v775_v11, %v775_v11  ;;  %v1529_v31 = vpop.f32.mrf.mxu0  ;;  %v626_v11 = vadd.f32 %v1433_v5, %v282_v22  ;;  %v655_v19 = vmax.f32 %v623_v7, 0.0 }
 0x17e   :  { %902 = vrot.lane.b32.xlu0 %v808_v12, %s1281_s22  ;;  %900 = vrot.lane.b32.xlu1 %v807_v14, %s1281_s22  ;;  %v1533_v33 = vpop.f32.mrf.mxu0  ;;  %v629_v12 = vadd.f32 %v1206_v23, %v1427_v61  ;;  %v658_v61 = vmax.f32 %v626_v11, 0.0  ;;  %v687_v42 = vpack.c.bf16 %v655_v19, %v655_v19 }
 0x17f   :  { %v636_v59 = vadd.f32 %v1533_v33, %v1457_v37  ;;  %v631_v33 = vadd.f32 %v1448_v24, %v1529_v31 }
 0x180   :  { %v1537_v41 = vpop.f32.mrf.mxu0  ;;  %v661_v22 = vmax.f32 %v629_v12, 0.0  ;;  %v690_v44 = vpack.c.bf16 %v658_v61, %v658_v61 }
 0x181   :  { %v663_v31 = vmax.f32 %v631_v33, 0.0 }
 0x182   :  { %904 = vrot.lane.b32.xlu1 %v809_v18, %s1281_s22  ;;  %v1540_v48 = vpop.f32.mrf.mxu0  ;;  %v660_v18 = vmax.f32 %v628_v4, 0.0  ;;  %v693_v47 = vpack.c.bf16 %v661_v22, %v661_v22  ;;  %v668_v4 = vmax.f32 %v636_v59, 0.0 }
 0x183   :  { %v695_v19 = vpack.c.bf16 %v663_v31, %v663_v31 }
 0x184   :  { %v1550_v57 = vpop.f32.mrf.mxu0  ;;  %v692_v23 = vpack.c.bf16 %v660_v18, %v660_v18 }
 0x185   :  { %v635_v61 = vadd.f32 %v1463_v45, %v1550_v57 }
 0x186   :  { %v1563_v46 = vpop.f32.mrf.mxu0 }
 0x187   :  { %v667_v57 = vmax.f32 %v635_v61, 0.0 }
 0x188   :  { %v1578_v50 = vpop.f32.mrf.mxu0 }
 0x18a   :  { %v1218_v40 = vpop.f32.mrf.mxu0 }
 0x1b2   :  { %v847_v26 = vpop.permute.xlu0 %846 }
 0x1b3   :  { %v916_v34 = vsel %vm167_vm0, %v684_v43, %v847_v26  ;;  %v627_v43 = vadd.f32 %v1433_v5, %v1523_v27  ;;  %v1607_v5 = vpop.f32.mrf.mxu0 }
 0x1b4   :  { %1037 = vst.msk [vmem:[%s1752_s3 + $0x8] sm:$0xf] %vm1034_vm1, %v916_v34 }
 0x1b5   :  { %v659_v27 = vmax.f32 %v627_v43, 0.0 }
 0x1b6   :  { %v849_v62 = vpop.permute.xlu1 %848  ;;  %v843_v63 = vpop.permute.xlu0 %842 }
 0x1b7   :  { %v920_v0 = vsel %vm167_vm0, %v685_v38, %v849_v62  ;;  %v908_v1 = vsel %vm167_vm0, %v682_v56, %v843_v63  ;;  %v664_v56 = vmax.f32 %v632_v39, 0.0  ;;  %v633_v38 = vadd.f32 %v1527_v30, %v1442_v16  ;;  %v1221_v62 = vpop.f32.mrf.mxu0 }
 0x1b8   :  { %1038 = vst.msk [vmem:[%s1752_s3 + $0xc] sm:$0xf] %vm1034_vm1, %v920_v0  ;;  %1035 = vst.msk [vmem:[%s1752_s3] sm:$0xf] %vm1034_vm1, %v908_v1  ;;  %v691_v63 = vpack.c.bf16 %v659_v27, %v659_v27  ;;  %v694_v0 = vpack.c.bf16 %v662_v29, %v662_v29 }
 0x1b9   :  { %v696_v16 = vpack.c.bf16 %v664_v56, %v664_v56  ;;  %v665_v60 = vmax.f32 %v633_v38, 0.0  ;;  %v346_v24 = vpop.f32.mrf.mxu0 }
 0x1ba   :  { %v845_v9 = vpop.permute.xlu1 %844  ;;  %v855_v10 = vpop.permute.xlu0 %854 }
 0x1bb   :  { %v912_v14 = vsel %vm167_vm0, %v683_v6, %v845_v9  ;;  %v932_v17 = vsel %vm167_vm0, %v688_v35, %v855_v10  ;;  %v634_v6 = vadd.f32 %v1463_v45, %v1537_v41  ;;  %v697_v7 = vpack.c.bf16 %v665_v60, %v665_v60  ;;  %v1222_v18 = vpop.f32.mrf.mxu0 }
 0x1bc   :  { %1036 = vst.msk [vmem:[%s1752_s3 + $0x4] sm:$0xf] %vm1034_vm1, %v912_v14  ;;  %1041 = vst.msk [vmem:[%s1752_s3 + $0x18] sm:$0xf] %vm1034_vm1, %v932_v17  ;;  %v637_v10 = vadd.f32 %v1540_v48, %v1457_v37  ;;  %v700_v41 = vpack.c.bf16 %v668_v4, %v668_v4  ;;  %v640_v17 = vadd.f32 %v1563_v46, %v1472_v58 }
 0x1bd   :  { %v666_v11 = vmax.f32 %v634_v6, 0.0  ;;  %v638_v46 = vadd.f32 %v1478_v3, %v1578_v50  ;;  %v349_v45 = vpop.f32.mrf.mxu0 }
 0x1be   :  { %v857_v20 = vpop.permute.xlu1 %856  ;;  %v851_v21 = vpop.permute.xlu0 %850  ;;  %v669_v48 = vmax.f32 %v637_v10, 0.0  ;;  %v643_v4 = vadd.f32 %v1493_v25, %v349_v45 }
 0x1bf   :  { %v936_v32 = vsel %vm167_vm0, %v689_v13, %v857_v20  ;;  %v924_v36 = vsel %vm167_vm0, %v686_v8, %v851_v21  ;;  %v698_v20 = vpack.c.bf16 %v666_v11, %v666_v11  ;;  %v670_v50 = vmax.f32 %v638_v46, 0.0  ;;  %v1225_v28 = vpop.f32.mrf.mxu0 }
 0x1c0   :  { %1042 = vst.msk [vmem:[%s1752_s3 + $0x1c] sm:$0xf] %vm1034_vm1, %v936_v32  ;;  %1039 = vst.msk [vmem:[%s1752_s3 + $0x10] sm:$0xf] %vm1034_vm1, %v924_v36  ;;  %v701_v32 = vpack.c.bf16 %v669_v48, %v669_v48 }
 0x1c1   :  { %v702_v56 = vpack.c.bf16 %v670_v50, %v670_v50 }
 0x1c2   :  { %v853_v49 = vpop.permute.xlu1 %852  ;;  %v863_v26 = vpop.permute.xlu0 %862 }
 0x1c3   :  { %v928_v54 = vsel %vm167_vm0, %v687_v42, %v853_v49  ;;  %v948_v55 = vsel %vm167_vm0, %v692_v23, %v863_v26  ;;  %v641_v23 = vadd.f32 %v1218_v40, %v1472_v58  ;;  %v672_v42 = vmax.f32 %v640_v17, 0.0 }
 0x1c4   :  { %1040 = vst.msk [vmem:[%s1752_s3 + $0x14] sm:$0xf] %vm1034_vm1, %v928_v54  ;;  %1045 = vst.msk [vmem:[%s1752_s3 + $0x28] sm:$0xf] %vm1034_vm1, %v948_v55  ;;  %v644_v26 = vadd.f32 %v1221_v62, %v1487_v15  ;;  %v699_v54 = vpack.c.bf16 %v667_v57, %v667_v57  ;;  %v639_v55 = vadd.f32 %v1478_v3, %v1607_v5  ;;  %v362_v3 = vpop.f32.mrf.mxu0 }
 0x1c5   :  { %v673_v43 = vmax.f32 %v641_v23, 0.0  ;;  %v646_v6 = vadd.f32 %v1510_v52, %v362_v3 }
 0x1c6   :  { %v865_v34 = vpop.permute.xlu1 %864  ;;  %v859_v53 = vpop.permute.xlu0 %858  ;;  %v671_v5 = vmax.f32 %v639_v55, 0.0 }
 0x1c7   :  { %v952_v30 = vsel %vm167_vm0, %v693_v47, %v865_v34  ;;  %v940_v35 = vsel %vm167_vm0, %v690_v44, %v859_v53  ;;  %v704_v44 = vpack.c.bf16 %v672_v42, %v672_v42  ;;  %v705_v38 = vpack.c.bf16 %v673_v43, %v673_v43 }
 0x1c8   :  { %1046 = vst.msk [vmem:[%s1752_s3 + $0x2c] sm:$0xf] %vm1034_vm1, %v952_v30  ;;  %1043 = vst.msk [vmem:[%s1752_s3 + $0x20] sm:$0xf] %vm1034_vm1, %v940_v35  ;;  %v642_v34 = vadd.f32 %v1493_v25, %v346_v24  ;;  %v645_v30 = vadd.f32 %v1222_v18, %v1487_v15  ;;  %v678_v11 = vmax.f32 %v646_v6, 0.0 }
 0x1ca   :  { %v861_v1 = vpop.permute.xlu1 %860  ;;  %v871_v2 = vpop.permute.xlu0 %870  ;;  %v674_v35 = vmax.f32 %v642_v34, 0.0 }
 0x1cb   :  { %v944_v8 = vsel %vm167_vm0, %v691_v63, %v861_v1  ;;  %v964_v9 = vsel %vm167_vm0, %v696_v16, %v871_v2  ;;  %v676_v16 = vmax.f32 %v644_v26, 0.0  ;;  %v1226_v1 = vpop.f32.mrf.mxu0  ;;  %v703_v2 = vpack.c.bf16 %v671_v5, %v671_v5 }
 0x1cc   :  { %1044 = vst.msk [vmem:[%s1752_s3 + $0x24] sm:$0xf] %vm1034_vm1, %v944_v8  ;;  %1049 = vst.msk [vmem:[%s1752_s3 + $0x38] sm:$0xf] %vm1034_vm1, %v964_v9  ;;  %v706_v9 = vpack.c.bf16 %v674_v35, %v674_v35 }
 0x1cd   :  { %v708_v63 = vpack.c.bf16 %v676_v16, %v676_v16  ;;  %v365_v25 = vpop.f32.mrf.mxu0 }
 0x1ce   :  { %v873_v12 = vpop.permute.xlu1 %872  ;;  %v867_v13 = vpop.permute.xlu0 %866  ;;  %v647_v17 = vadd.f32 %v1510_v52, %v365_v25 }
 0x1cf   :  { %v968_v14 = vsel %vm167_vm0, %v697_v7, %v873_v12  ;;  %v956_v37 = vsel %vm167_vm0, %v694_v0, %v867_v13  ;;  %v677_v0 = vmax.f32 %v645_v30, 0.0 }
 0x1d0   :  { %1050 = vst.msk [vmem:[%s1752_s3 + $0x3c] sm:$0xf] %vm1034_vm1, %v968_v14  ;;  %1047 = vst.msk [vmem:[%s1752_s3 + $0x30] sm:$0xf] %vm1034_vm1, %v956_v37  ;;  %v648_v14 = vadd.f32 %v1225_v28, %v1508_v51 }
 0x1d1   :  { %v709_v10 = vpack.c.bf16 %v677_v0, %v677_v0 }
 0x1d2   :  { %v869_v21 = vpop.permute.xlu1 %868  ;;  %v879_v22 = vpop.permute.xlu0 %878 }
 0x1d3   :  { %v960_v36 = vsel %vm167_vm0, %v695_v19, %v869_v21  ;;  %v980_v39 = vsel %vm167_vm0, %v700_v41, %v879_v22  ;;  %v675_v41 = vmax.f32 %v643_v4, 0.0  ;;  %v710_v19 = vpack.c.bf16 %v678_v11, %v678_v11 }
 0x1d4   :  { %1048 = vst.msk [vmem:[%s1752_s3 + $0x34] sm:$0xf] %vm1034_vm1, %v960_v36  ;;  %1053 = vst.msk [vmem:[%s1752_s3 + $0x48] sm:$0xf] %vm1034_vm1, %v980_v39  ;;  %v649_v21 = vadd.f32 %v1226_v1, %v1508_v51  ;;  %v679_v22 = vmax.f32 %v647_v17, 0.0 }
 0x1d5   :  { %v707_v18 = vpack.c.bf16 %v675_v41, %v675_v41 }
 0x1d6   :  { %v881_v58 = vpop.permute.xlu1 %880  ;;  %v875_v40 = vpop.permute.xlu0 %874  ;;  %v681_v36 = vmax.f32 %v649_v21, 0.0  ;;  %v711_v39 = vpack.c.bf16 %v679_v22, %v679_v22 }
 0x1d7   :  { %v984_v47 = vsel %vm167_vm0, %v701_v32, %v881_v58  ;;  %v972_v49 = vsel %vm167_vm0, %v698_v20, %v875_v40  ;;  %v680_v20 = vmax.f32 %v648_v14, 0.0 }
 0x1d8   :  { %1054 = vst.msk [vmem:[%s1752_s3 + $0x4c] sm:$0xf] %vm1034_vm1, %v984_v47  ;;  %1051 = vst.msk [vmem:[%s1752_s3 + $0x40] sm:$0xf] %vm1034_vm1, %v972_v49  ;;  %v713_v50 = vpack.c.bf16 %v681_v36, %v681_v36 }
 0x1d9   :  { %v712_v32 = vpack.c.bf16 %v680_v20, %v680_v20 }
 0x1da   :  { %v877_v27 = vpop.permute.xlu1 %876  ;;  %v887_v29 = vpop.permute.xlu0 %886 }
 0x1db   :  { %v976_v53 = vsel %vm167_vm0, %v699_v54, %v877_v27  ;;  %v996_v59 = vsel %vm167_vm0, %v704_v44, %v887_v29 }
 0x1dc   :  { %1052 = vst.msk [vmem:[%s1752_s3 + $0x44] sm:$0xf] %vm1034_vm1, %v976_v53  ;;  %1057 = vst.msk [vmem:[%s1752_s3 + $0x58] sm:$0xf] %vm1034_vm1, %v996_v59 }
 0x1de   :  { %v889_v60 = vpop.permute.xlu1 %888  ;;  %v883_v62 = vpop.permute.xlu0 %882 }
 0x1df   :  { %v1000_v33 = vsel %vm167_vm0, %v705_v38, %v889_v60  ;;  %v988_v15 = vsel %vm167_vm0, %v702_v56, %v883_v62 }
 0x1e0   :  { %1058 = vst.msk [vmem:[%s1752_s3 + $0x5c] sm:$0xf] %vm1034_vm1, %v1000_v33  ;;  %1055 = vst.msk [vmem:[%s1752_s3 + $0x50] sm:$0xf] %vm1034_vm1, %v988_v15 }
 0x1e2   :  { %v885_v7 = vpop.permute.xlu1 %884  ;;  %v895_v8 = vpop.permute.xlu0 %894 }
 0x1e3   :  { %v992_v24 = vsel %vm167_vm0, %v703_v2, %v885_v7  ;;  %v1012_v31 = vsel %vm167_vm0, %v708_v63, %v895_v8 }
 0x1e4   :  { %1056 = vst.msk [vmem:[%s1752_s3 + $0x54] sm:$0xf] %vm1034_vm1, %v992_v24  ;;  %1061 = vst.msk [vmem:[%s1752_s3 + $0x68] sm:$0xf] %vm1034_vm1, %v1012_v31 }
 0x1e6   :  { %v897_v12 = vpop.permute.xlu1 %896  ;;  %v891_v13 = vpop.permute.xlu0 %890 }
 0x1e7   :  { %v1016_v37 = vsel %vm167_vm0, %v709_v10, %v897_v12  ;;  %v1004_v48 = vsel %vm167_vm0, %v706_v9, %v891_v13 }
 0x1e8   :  { %1062 = vst.msk [vmem:[%s1752_s3 + $0x6c] sm:$0xf] %vm1034_vm1, %v1016_v37  ;;  %1059 = vst.msk [vmem:[%s1752_s3 + $0x60] sm:$0xf] %vm1034_vm1, %v1004_v48 }
 0x1ea   :  { %v893_v61 = vpop.permute.xlu1 %892 }
 0x1eb   :  { %v1008_v46 = vsel %vm167_vm0, %v707_v18, %v893_v61 }
 0x1ec   :  { %1060 = vst.msk [vmem:[%s1752_s3 + $0x64] sm:$0xf] %vm1034_vm1, %v1008_v46  ;;  %v899_v52 = vpop.permute.xlu0 %898 }
 0x1ed   :  { %v1020_v23 = vsel %vm167_vm0, %v710_v19, %v899_v52 }
 0x1ee   :  { %1063 = vst.msk [vmem:[%s1752_s3 + $0x70] sm:$0xf] %vm1034_vm1, %v1020_v23 }
 0x1f0   :  { %v901_v51 = vpop.permute.xlu1 %900  ;;  %v903_v42 = vpop.permute.xlu0 %902 }
 0x1f1   :  { %v1024_v45 = vsel %vm167_vm0, %v711_v39, %v901_v51  ;;  %v1028_v57 = vsel %vm167_vm0, %v712_v32, %v903_v42 }
 0x1f2   :  { %1064 = vst.msk [vmem:[%s1752_s3 + $0x74] sm:$0xf] %vm1034_vm1, %v1024_v45  ;;  %1065 = vst.msk [vmem:[%s1752_s3 + $0x78] sm:$0xf] %vm1034_vm1, %v1028_v57 }
 0x1f4   :  { %v905_v58 = vpop.permute.xlu1 %904 }
 0x1f5   :  { %v1032_v40 = vsel %vm167_vm0, %v713_v50, %v905_v58 }
 0x1f6   :  { %1066 = vst.msk [vmem:[%s1752_s3 + $0x7c] sm:$0xf] %vm1034_vm1, %v1032_v40 }

// kernel: _forward_impl.17
= control target key start
LH: loop header
LB: loop body
LE: loop exit
PB: predicated region body
PF: predicated region fallthrough
CT: control target
= control target key end

     0   :  { %vm254_vm0 = vcmask 130048   ;;  %vm640_vm1 = vcmask 23552   ;;  %s1385_s1 = inlined_call_operand.vmem [shape: bf16[16,3], index: 1, kind: input, shape index: {}]   ;;  %s1386_s0 = inlined_call_operand.vmem [shape: bf16[512,16], index: 0, kind: input, shape index: {}]   ;;  %s1387_s2 = inlined_call_operand.vmem [shape: f32[1,3], index: 2, kind: input, shape index: {}]   ;;  %s1388_s3 = inlined_call_operand.vmem [shape: f32[512,3], index: 3, kind: output, shape index: {}]  }
   0x1   :  { %v876_v0 = vld [vmem:[%s1385_s1] sm:$0xff]   ;;  %v879_v3 = vld [vmem:[%s1386_s0 + $0x8] sm:$0xff]   ;;  %v881_v5 = vld [vmem:[%s1386_s0 + $0x10] sm:$0xff]  }
   0x2   :  { %v877_v1 = vld [vmem:[%s1386_s0] sm:$0xff]   ;;  %808 = vmatprep.subr.bf16.mxu0 %v876_v0  ;;  %874 = vmatprep.subr.bf16.mxu1 %v876_v0  ;;  %v880_v4 = vld [vmem:[%s1386_s0 + $0x88] sm:$0xff]   ;;  %v882_v6 = vld [vmem:[%s1386_s0 + $0x90] sm:$0xff]  }
   0x3   :  { %v878_v2 = vld [vmem:[%s1386_s0 + $0x80] sm:$0xff]   ;;  %809 = vmatpush3.bf16.msra.mxu0 %v876_v0  ;;  %875 = vmatpush3.bf16.msra.mxu1 %v876_v0  ;;  %v883_v7 = vld [vmem:[%s1386_s0 + $0x18] sm:$0xff]   ;;  %v887_v11 = vld [vmem:[%s1386_s0 + $0x28] sm:$0xff]  }
   0x4   :  { %810 = vmatprep.mubr.msk.bf16.mxu0 %vm254_vm0, %v877_v1  ;;  %842 = vmatprep.mubr.msk.bf16.mxu1 %vm254_vm0, %v878_v2  ;;  %v884_v8 = vld [vmem:[%s1386_s0 + $0x98] sm:$0xff]   ;;  %v885_v9 = vld [vmem:[%s1386_s0 + $0x20] sm:$0xff]   ;;  %v888_v12 = vld [vmem:[%s1386_s0 + $0xa8] sm:$0xff]  }
   0x5   :  { %v886_v10 = vld [vmem:[%s1386_s0 + $0xa0] sm:$0xff]   ;;  %v889_v13 = vld [vmem:[%s1386_s0 + $0x30] sm:$0xff]   ;;  %v891_v15 = vld [vmem:[%s1386_s0 + $0x38] sm:$0xff]  }
   0x6   :  { %811 = vmatmul.mubr.msk.bf16.vlgmr.msra.gmra.mxu0 %vm254_vm0, %v879_v3  ;;  %843 = vmatmul.mubr.msk.bf16.vlgmr.msra.gmra.mxu1 %vm254_vm0, %v880_v4  ;;  %v890_v14 = vld [vmem:[%s1386_s0 + $0xb0] sm:$0xff]   ;;  %v892_v16 = vld [vmem:[%s1386_s0 + $0xb8] sm:$0xff]   ;;  %v893_v17 = vld [vmem:[%s1386_s0 + $0x40] sm:$0xff]  }
   0x7   :  { %814 = vmatprep.mubr.msk.bf16.mxu0 %vm254_vm0, %v881_v5  ;;  %846 = vmatprep.mubr.msk.bf16.mxu1 %vm254_vm0, %v882_v6  ;;  %v894_v18 = vld [vmem:[%s1386_s0 + $0xc0] sm:$0xff]   ;;  %v895_v19 = vld [vmem:[%s1386_s0 + $0x48] sm:$0xff]   ;;  %v897_v21 = vld [vmem:[%s1386_s0 + $0x50] sm:$0xff]  }
   0x8   :  { %v896_v20 = vld [vmem:[%s1386_s0 + $0xc8] sm:$0xff]   ;;  %v898_v22 = vld [vmem:[%s1386_s0 + $0xd0] sm:$0xff]   ;;  %v899_v23 = vld [vmem:[%s1386_s0 + $0x58] sm:$0xff]  }
   0x9   :  { %v900_v24 = vld [vmem:[%s1386_s0 + $0xd8] sm:$0xff]   ;;  %v901_v25 = vld [vmem:[%s1386_s0 + $0x60] sm:$0xff]   ;;  %v903_v27 = vld [vmem:[%s1386_s0 + $0x68] sm:$0xff]  }
   0xa   :  { %v902_v26 = vld [vmem:[%s1386_s0 + $0xe0] sm:$0xff]   ;;  %v904_v28 = vld [vmem:[%s1386_s0 + $0xe8] sm:$0xff]   ;;  %v905_v29 = vld [vmem:[%s1386_s0 + $0x70] sm:$0xff]  }
   0xb   :  { %v906_v30 = vld [vmem:[%s1386_s0 + $0xf0] sm:$0xff]   ;;  %v907_v31 = vld [vmem:[%s1386_s0 + $0x78] sm:$0xff]   ;;  %v1063_v33 = vld [vmem:[%s1387_s2] ss:$0 sm:$0xff] }
   0xc   :  { %v908_v32 = vld [vmem:[%s1386_s0 + $0xf8] sm:$0xff]  }
   0xe   :  { %815 = vmatmul.mubr.msk.bf16.gmra.mxu0 %vm254_vm0, %v883_v7  ;;  %847 = vmatmul.mubr.msk.bf16.gmra.mxu1 %vm254_vm0, %v884_v8 }
   0xf   :  { %818 = vmatprep.mubr.msk.bf16.mxu0 %vm254_vm0, %v885_v9  ;;  %850 = vmatprep.mubr.msk.bf16.mxu1 %vm254_vm0, %v886_v10 }
  0x16   :  { %819 = vmatmul.mubr.msk.bf16.gmra.mxu0 %vm254_vm0, %v887_v11  ;;  %851 = vmatmul.mubr.msk.bf16.gmra.mxu1 %vm254_vm0, %v888_v12 }
  0x17   :  { %822 = vmatprep.mubr.msk.bf16.mxu0 %vm254_vm0, %v889_v13  ;;  %854 = vmatprep.mubr.msk.bf16.mxu1 %vm254_vm0, %v890_v14 }
  0x1e   :  { %823 = vmatmul.mubr.msk.bf16.gmra.mxu0 %vm254_vm0, %v891_v15  ;;  %855 = vmatmul.mubr.msk.bf16.gmra.mxu1 %vm254_vm0, %v892_v16 }
  0x1f   :  { %826 = vmatprep.mubr.msk.bf16.mxu0 %vm254_vm0, %v893_v17  ;;  %858 = vmatprep.mubr.msk.bf16.mxu1 %vm254_vm0, %v894_v18 }
  0x26   :  { %827 = vmatmul.mubr.msk.bf16.gmra.mxu0 %vm254_vm0, %v895_v19  ;;  %859 = vmatmul.mubr.msk.bf16.gmra.mxu1 %vm254_vm0, %v896_v20 }
  0x27   :  { %830 = vmatprep.mubr.msk.bf16.mxu0 %vm254_vm0, %v897_v21  ;;  %862 = vmatprep.mubr.msk.bf16.mxu1 %vm254_vm0, %v898_v22 }
  0x2e   :  { %831 = vmatmul.mubr.msk.bf16.gmra.mxu0 %vm254_vm0, %v899_v23  ;;  %863 = vmatmul.mubr.msk.bf16.gmra.mxu1 %vm254_vm0, %v900_v24 }
  0x2f   :  { %834 = vmatprep.mubr.msk.bf16.mxu0 %vm254_vm0, %v901_v25  ;;  %866 = vmatprep.mubr.msk.bf16.mxu1 %vm254_vm0, %v902_v26 }
  0x36   :  { %835 = vmatmul.mubr.msk.bf16.gmra.mxu0 %vm254_vm0, %v903_v27  ;;  %867 = vmatmul.mubr.msk.bf16.gmra.mxu1 %vm254_vm0, %v904_v28 }
  0x37   :  { %838 = vmatprep.mubr.msk.bf16.mxu0 %vm254_vm0, %v905_v29  ;;  %870 = vmatprep.mubr.msk.bf16.mxu1 %vm254_vm0, %v906_v30 }
  0x3e   :  { %839 = vmatmul.mubr.msk.bf16.gmra.mxu0 %vm254_vm0, %v907_v31  ;;  %871 = vmatmul.mubr.msk.bf16.gmra.mxu1 %vm254_vm0, %v908_v32 }
  0xc6   :  { %v812_v34 = vpop.f32.mrf.mxu0  ;;  %v844_v35 = vpop.f32.mrf.mxu1 }
  0xc7   :  { %v394_v36 = vadd.f32 %v812_v34, %v1063_v33  ;;  %v522_v37 = vadd.f32 %v844_v35, %v1063_v33 }
  0xc8   :  { %v385_v38 = vpop.f32.mrf.mxu0  ;;  %v513_v39 = vpop.f32.mrf.mxu1 }
  0xc9   :  { %643 = vst.msk [vmem:[%s1388_s3 + $0x10] sm:$0xff] %vm640_vm1, %v394_v36  ;;  %675 = vst.msk [vmem:[%s1388_s3 + $0x110] sm:$0xff] %vm640_vm1, %v522_v37  ;;  %v386_v40 = vadd.f32 %v1063_v33, %v385_v38  ;;  %v514_v41 = vadd.f32 %v1063_v33, %v513_v39 }
  0xca   :  { %v813_v42 = vpop.f32.mrf.mxu0  ;;  %v845_v43 = vpop.f32.mrf.mxu1 }
  0xcb   :  { %641 = vst.msk [vmem:[%s1388_s3] sm:$0xff] %vm640_vm1, %v386_v40  ;;  %673 = vst.msk [vmem:[%s1388_s3 + $0x100] sm:$0xff] %vm640_vm1, %v514_v41  ;;  %v397_v44 = vadd.f32 %v813_v42, %v1063_v33  ;;  %v525_v45 = vadd.f32 %v845_v43, %v1063_v33 }
  0xcc   :  { %v388_v46 = vpop.f32.mrf.mxu0  ;;  %v516_v47 = vpop.f32.mrf.mxu1 }
  0xcd   :  { %644 = vst.msk [vmem:[%s1388_s3 + $0x18] sm:$0xff] %vm640_vm1, %v397_v44  ;;  %676 = vst.msk [vmem:[%s1388_s3 + $0x118] sm:$0xff] %vm640_vm1, %v525_v45  ;;  %v389_v48 = vadd.f32 %v1063_v33, %v388_v46  ;;  %v517_v49 = vadd.f32 %v1063_v33, %v516_v47 }
  0xce   :  { %v816_v50 = vpop.f32.mrf.mxu0  ;;  %v848_v51 = vpop.f32.mrf.mxu1 }
  0xcf   :  { %642 = vst.msk [vmem:[%s1388_s3 + $0x8] sm:$0xff] %vm640_vm1, %v389_v48  ;;  %674 = vst.msk [vmem:[%s1388_s3 + $0x108] sm:$0xff] %vm640_vm1, %v517_v49  ;;  %v410_v52 = vadd.f32 %v816_v50, %v1063_v33  ;;  %v538_v53 = vadd.f32 %v848_v51, %v1063_v33 }
  0xd0   :  { %v401_v54 = vpop.f32.mrf.mxu0  ;;  %v529_v55 = vpop.f32.mrf.mxu1 }
  0xd1   :  { %647 = vst.msk [vmem:[%s1388_s3 + $0x30] sm:$0xff] %vm640_vm1, %v410_v52  ;;  %679 = vst.msk [vmem:[%s1388_s3 + $0x130] sm:$0xff] %vm640_vm1, %v538_v53  ;;  %v402_v56 = vadd.f32 %v1063_v33, %v401_v54  ;;  %v530_v57 = vadd.f32 %v1063_v33, %v529_v55 }
  0xd2   :  { %v817_v58 = vpop.f32.mrf.mxu0  ;;  %v849_v59 = vpop.f32.mrf.mxu1 }
  0xd3   :  { %645 = vst.msk [vmem:[%s1388_s3 + $0x20] sm:$0xff] %vm640_vm1, %v402_v56  ;;  %677 = vst.msk [vmem:[%s1388_s3 + $0x120] sm:$0xff] %vm640_vm1, %v530_v57  ;;  %v413_v60 = vadd.f32 %v817_v58, %v1063_v33  ;;  %v541_v61 = vadd.f32 %v849_v59, %v1063_v33 }
  0xd4   :  { %v404_v62 = vpop.f32.mrf.mxu0  ;;  %v532_v63 = vpop.f32.mrf.mxu1 }
  0xd5   :  { %648 = vst.msk [vmem:[%s1388_s3 + $0x38] sm:$0xff] %vm640_vm1, %v413_v60  ;;  %680 = vst.msk [vmem:[%s1388_s3 + $0x138] sm:$0xff] %vm640_vm1, %v541_v61  ;;  %v405_v0 = vadd.f32 %v1063_v33, %v404_v62  ;;  %v533_v1 = vadd.f32 %v1063_v33, %v532_v63 }
  0xd6   :  { %v820_v2 = vpop.f32.mrf.mxu0  ;;  %v852_v3 = vpop.f32.mrf.mxu1 }
  0xd7   :  { %646 = vst.msk [vmem:[%s1388_s3 + $0x28] sm:$0xff] %vm640_vm1, %v405_v0  ;;  %678 = vst.msk [vmem:[%s1388_s3 + $0x128] sm:$0xff] %vm640_vm1, %v533_v1  ;;  %v426_v4 = vadd.f32 %v820_v2, %v1063_v33  ;;  %v554_v5 = vadd.f32 %v852_v3, %v1063_v33 }
  0xd8   :  { %v417_v6 = vpop.f32.mrf.mxu0  ;;  %v545_v7 = vpop.f32.mrf.mxu1 }
  0xd9   :  { %651 = vst.msk [vmem:[%s1388_s3 + $0x50] sm:$0xff] %vm640_vm1, %v426_v4  ;;  %683 = vst.msk [vmem:[%s1388_s3 + $0x150] sm:$0xff] %vm640_vm1, %v554_v5  ;;  %v418_v8 = vadd.f32 %v1063_v33, %v417_v6  ;;  %v546_v9 = vadd.f32 %v1063_v33, %v545_v7 }
  0xda   :  { %v821_v10 = vpop.f32.mrf.mxu0  ;;  %v853_v11 = vpop.f32.mrf.mxu1 }
  0xdb   :  { %649 = vst.msk [vmem:[%s1388_s3 + $0x40] sm:$0xff] %vm640_vm1, %v418_v8  ;;  %681 = vst.msk [vmem:[%s1388_s3 + $0x140] sm:$0xff] %vm640_vm1, %v546_v9  ;;  %v429_v12 = vadd.f32 %v821_v10, %v1063_v33  ;;  %v557_v13 = vadd.f32 %v853_v11, %v1063_v33 }
  0xdc   :  { %v420_v14 = vpop.f32.mrf.mxu0  ;;  %v548_v15 = vpop.f32.mrf.mxu1 }
  0xdd   :  { %652 = vst.msk [vmem:[%s1388_s3 + $0x58] sm:$0xff] %vm640_vm1, %v429_v12  ;;  %684 = vst.msk [vmem:[%s1388_s3 + $0x158] sm:$0xff] %vm640_vm1, %v557_v13  ;;  %v421_v16 = vadd.f32 %v1063_v33, %v420_v14  ;;  %v549_v17 = vadd.f32 %v1063_v33, %v548_v15 }
  0xde   :  { %v824_v18 = vpop.f32.mrf.mxu0  ;;  %v856_v19 = vpop.f32.mrf.mxu1 }
  0xdf   :  { %650 = vst.msk [vmem:[%s1388_s3 + $0x48] sm:$0xff] %vm640_vm1, %v421_v16  ;;  %682 = vst.msk [vmem:[%s1388_s3 + $0x148] sm:$0xff] %vm640_vm1, %v549_v17  ;;  %v442_v20 = vadd.f32 %v824_v18, %v1063_v33  ;;  %v570_v21 = vadd.f32 %v856_v19, %v1063_v33 }
  0xe0   :  { %v433_v22 = vpop.f32.mrf.mxu0  ;;  %v561_v23 = vpop.f32.mrf.mxu1 }
  0xe1   :  { %655 = vst.msk [vmem:[%s1388_s3 + $0x70] sm:$0xff] %vm640_vm1, %v442_v20  ;;  %687 = vst.msk [vmem:[%s1388_s3 + $0x170] sm:$0xff] %vm640_vm1, %v570_v21  ;;  %v434_v24 = vadd.f32 %v1063_v33, %v433_v22  ;;  %v562_v25 = vadd.f32 %v1063_v33, %v561_v23 }
  0xe2   :  { %v825_v26 = vpop.f32.mrf.mxu0  ;;  %v857_v27 = vpop.f32.mrf.mxu1 }
  0xe3   :  { %653 = vst.msk [vmem:[%s1388_s3 + $0x60] sm:$0xff] %vm640_vm1, %v434_v24  ;;  %685 = vst.msk [vmem:[%s1388_s3 + $0x160] sm:$0xff] %vm640_vm1, %v562_v25  ;;  %v445_v28 = vadd.f32 %v825_v26, %v1063_v33  ;;  %v573_v29 = vadd.f32 %v857_v27, %v1063_v33 }
  0xe4   :  { %v436_v30 = vpop.f32.mrf.mxu0  ;;  %v564_v31 = vpop.f32.mrf.mxu1 }
  0xe5   :  { %656 = vst.msk [vmem:[%s1388_s3 + $0x78] sm:$0xff] %vm640_vm1, %v445_v28  ;;  %688 = vst.msk [vmem:[%s1388_s3 + $0x178] sm:$0xff] %vm640_vm1, %v573_v29  ;;  %v437_v32 = vadd.f32 %v1063_v33, %v436_v30  ;;  %v565_v34 = vadd.f32 %v1063_v33, %v564_v31 }
  0xe6   :  { %v828_v35 = vpop.f32.mrf.mxu0  ;;  %v860_v36 = vpop.f32.mrf.mxu1 }
  0xe7   :  { %654 = vst.msk [vmem:[%s1388_s3 + $0x68] sm:$0xff] %vm640_vm1, %v437_v32  ;;  %686 = vst.msk [vmem:[%s1388_s3 + $0x168] sm:$0xff] %vm640_vm1, %v565_v34  ;;  %v458_v37 = vadd.f32 %v828_v35, %v1063_v33  ;;  %v586_v38 = vadd.f32 %v860_v36, %v1063_v33 }
  0xe8   :  { %v449_v39 = vpop.f32.mrf.mxu0  ;;  %v577_v40 = vpop.f32.mrf.mxu1 }
  0xe9   :  { %659 = vst.msk [vmem:[%s1388_s3 + $0x90] sm:$0xff] %vm640_vm1, %v458_v37  ;;  %691 = vst.msk [vmem:[%s1388_s3 + $0x190] sm:$0xff] %vm640_vm1, %v586_v38  ;;  %v450_v41 = vadd.f32 %v1063_v33, %v449_v39  ;;  %v578_v42 = vadd.f32 %v1063_v33, %v577_v40 }
  0xea   :  { %v829_v43 = vpop.f32.mrf.mxu0  ;;  %v861_v44 = vpop.f32.mrf.mxu1 }
  0xeb   :  { %657 = vst.msk [vmem:[%s1388_s3 + $0x80] sm:$0xff] %vm640_vm1, %v450_v41  ;;  %689 = vst.msk [vmem:[%s1388_s3 + $0x180] sm:$0xff] %vm640_vm1, %v578_v42  ;;  %v461_v45 = vadd.f32 %v829_v43, %v1063_v33  ;;  %v589_v46 = vadd.f32 %v861_v44, %v1063_v33 }
  0xec   :  { %v452_v47 = vpop.f32.mrf.mxu0  ;;  %v580_v48 = vpop.f32.mrf.mxu1 }
  0xed   :  { %660 = vst.msk [vmem:[%s1388_s3 + $0x98] sm:$0xff] %vm640_vm1, %v461_v45  ;;  %692 = vst.msk [vmem:[%s1388_s3 + $0x198] sm:$0xff] %vm640_vm1, %v589_v46  ;;  %v453_v49 = vadd.f32 %v1063_v33, %v452_v47  ;;  %v581_v50 = vadd.f32 %v1063_v33, %v580_v48 }
  0xee   :  { %v832_v51 = vpop.f32.mrf.mxu0  ;;  %v864_v52 = vpop.f32.mrf.mxu1 }
  0xef   :  { %658 = vst.msk [vmem:[%s1388_s3 + $0x88] sm:$0xff] %vm640_vm1, %v453_v49  ;;  %690 = vst.msk [vmem:[%s1388_s3 + $0x188] sm:$0xff] %vm640_vm1, %v581_v50  ;;  %v474_v53 = vadd.f32 %v832_v51, %v1063_v33  ;;  %v602_v54 = vadd.f32 %v864_v52, %v1063_v33 }
  0xf0   :  { %v465_v55 = vpop.f32.mrf.mxu0  ;;  %v593_v56 = vpop.f32.mrf.mxu1 }
  0xf1   :  { %663 = vst.msk [vmem:[%s1388_s3 + $0xb0] sm:$0xff] %vm640_vm1, %v474_v53  ;;  %695 = vst.msk [vmem:[%s1388_s3 + $0x1b0] sm:$0xff] %vm640_vm1, %v602_v54  ;;  %v466_v57 = vadd.f32 %v1063_v33, %v465_v55  ;;  %v594_v58 = vadd.f32 %v1063_v33, %v593_v56 }
  0xf2   :  { %v833_v59 = vpop.f32.mrf.mxu0  ;;  %v865_v60 = vpop.f32.mrf.mxu1 }
  0xf3   :  { %661 = vst.msk [vmem:[%s1388_s3 + $0xa0] sm:$0xff] %vm640_vm1, %v466_v57  ;;  %693 = vst.msk [vmem:[%s1388_s3 + $0x1a0] sm:$0xff] %vm640_vm1, %v594_v58  ;;  %v477_v61 = vadd.f32 %v833_v59, %v1063_v33  ;;  %v605_v62 = vadd.f32 %v865_v60, %v1063_v33 }
  0xf4   :  { %v468_v63 = vpop.f32.mrf.mxu0  ;;  %v596_v0 = vpop.f32.mrf.mxu1 }
  0xf5   :  { %664 = vst.msk [vmem:[%s1388_s3 + $0xb8] sm:$0xff] %vm640_vm1, %v477_v61  ;;  %696 = vst.msk [vmem:[%s1388_s3 + $0x1b8] sm:$0xff] %vm640_vm1, %v605_v62  ;;  %v469_v1 = vadd.f32 %v1063_v33, %v468_v63  ;;  %v597_v2 = vadd.f32 %v1063_v33, %v596_v0 }
  0xf6   :  { %v836_v3 = vpop.f32.mrf.mxu0  ;;  %v868_v4 = vpop.f32.mrf.mxu1 }
  0xf7   :  { %662 = vst.msk [vmem:[%s1388_s3 + $0xa8] sm:$0xff] %vm640_vm1, %v469_v1  ;;  %694 = vst.msk [vmem:[%s1388_s3 + $0x1a8] sm:$0xff] %vm640_vm1, %v597_v2  ;;  %v490_v5 = vadd.f32 %v836_v3, %v1063_v33  ;;  %v618_v6 = vadd.f32 %v868_v4, %v1063_v33 }
  0xf8   :  { %v481_v7 = vpop.f32.mrf.mxu0  ;;  %v609_v8 = vpop.f32.mrf.mxu1 }
  0xf9   :  { %667 = vst.msk [vmem:[%s1388_s3 + $0xd0] sm:$0xff] %vm640_vm1, %v490_v5  ;;  %699 = vst.msk [vmem:[%s1388_s3 + $0x1d0] sm:$0xff] %vm640_vm1, %v618_v6  ;;  %v482_v9 = vadd.f32 %v1063_v33, %v481_v7  ;;  %v610_v10 = vadd.f32 %v1063_v33, %v609_v8 }
  0xfa   :  { %v837_v11 = vpop.f32.mrf.mxu0  ;;  %v869_v12 = vpop.f32.mrf.mxu1 }
  0xfb   :  { %665 = vst.msk [vmem:[%s1388_s3 + $0xc0] sm:$0xff] %vm640_vm1, %v482_v9  ;;  %697 = vst.msk [vmem:[%s1388_s3 + $0x1c0] sm:$0xff] %vm640_vm1, %v610_v10  ;;  %v493_v13 = vadd.f32 %v837_v11, %v1063_v33  ;;  %v621_v14 = vadd.f32 %v869_v12, %v1063_v33 }
  0xfc   :  { %v484_v15 = vpop.f32.mrf.mxu0  ;;  %v612_v16 = vpop.f32.mrf.mxu1 }
  0xfd   :  { %668 = vst.msk [vmem:[%s1388_s3 + $0xd8] sm:$0xff] %vm640_vm1, %v493_v13  ;;  %700 = vst.msk [vmem:[%s1388_s3 + $0x1d8] sm:$0xff] %vm640_vm1, %v621_v14  ;;  %v485_v17 = vadd.f32 %v1063_v33, %v484_v15  ;;  %v613_v18 = vadd.f32 %v1063_v33, %v612_v16 }
  0xfe   :  { %v840_v19 = vpop.f32.mrf.mxu0  ;;  %v872_v20 = vpop.f32.mrf.mxu1 }
  0xff   :  { %666 = vst.msk [vmem:[%s1388_s3 + $0xc8] sm:$0xff] %vm640_vm1, %v485_v17  ;;  %698 = vst.msk [vmem:[%s1388_s3 + $0x1c8] sm:$0xff] %vm640_vm1, %v613_v18  ;;  %v506_v21 = vadd.f32 %v840_v19, %v1063_v33  ;;  %v634_v22 = vadd.f32 %v872_v20, %v1063_v33 }
 0x100   :  { %v497_v23 = vpop.f32.mrf.mxu0  ;;  %v625_v24 = vpop.f32.mrf.mxu1 }
 0x101   :  { %671 = vst.msk [vmem:[%s1388_s3 + $0xf0] sm:$0xff] %vm640_vm1, %v506_v21  ;;  %703 = vst.msk [vmem:[%s1388_s3 + $0x1f0] sm:$0xff] %vm640_vm1, %v634_v22  ;;  %v498_v25 = vadd.f32 %v1063_v33, %v497_v23  ;;  %v626_v26 = vadd.f32 %v1063_v33, %v625_v24 }
 0x102   :  { %v841_v27 = vpop.f32.mrf.mxu0  ;;  %v873_v28 = vpop.f32.mrf.mxu1 }
 0x103   :  { %669 = vst.msk [vmem:[%s1388_s3 + $0xe0] sm:$0xff] %vm640_vm1, %v498_v25  ;;  %701 = vst.msk [vmem:[%s1388_s3 + $0x1e0] sm:$0xff] %vm640_vm1, %v626_v26  ;;  %v509_v29 = vadd.f32 %v841_v27, %v1063_v33  ;;  %v637_v30 = vadd.f32 %v873_v28, %v1063_v33 }
 0x104   :  { %v500_v31 = vpop.f32.mrf.mxu0  ;;  %v628_v32 = vpop.f32.mrf.mxu1 }
 0x105   :  { %672 = vst.msk [vmem:[%s1388_s3 + $0xf8] sm:$0xff] %vm640_vm1, %v509_v29  ;;  %704 = vst.msk [vmem:[%s1388_s3 + $0x1f8] sm:$0xff] %vm640_vm1, %v637_v30  ;;  %v501_v34 = vadd.f32 %v1063_v33, %v500_v31  ;;  %v629_v35 = vadd.f32 %v1063_v33, %v628_v32 }
 0x107   :  { %670 = vst.msk [vmem:[%s1388_s3 + $0xe8] sm:$0xff] %vm640_vm1, %v501_v34  ;;  %702 = vst.msk [vmem:[%s1388_s3 + $0x1e8] sm:$0xff] %vm640_vm1, %v629_v35 }

</bundles_post_ra>
